<compile_context>
chip_gen: v7x
topology: tpu7x:2x2x1
jax: 0.10.0
libtpu: 0.0.40
codegen_flags: <defaults>
</compile_context>

<pallas_src>
import functools
import math

import jax
import jax.numpy as jnp
from jax.experimental import pallas as pl
from jax.experimental.pallas import tpu as pltpu


NEG_INF = -1e9
VMEM_LIMIT_BYTES = 32 * 1024 * 1024


# ----------------------------- helpers -----------------------------

def _round_up(x, m):
    return (x + m - 1) // m * m


def _choose_tile(dim, max_tile, align):
    """Largest multiple of `align` that divides `dim` and is <= max_tile.

    `dim` is assumed to already be a multiple of `align` (weights are padded
    once at prepare time)."""
    best = align
    t = align
    while t <= min(dim, max_tile):
        if dim % t == 0:
            best = t
        t += align
    return best


def _seq_tile(length, max_tile):
    """(tile, padded_length) for a sequence axis: whole (8-aligned) axis if it
    fits one tile, otherwise a 128-multiple max_tile."""
    lp = _round_up(length, 8)
    if lp <= max_tile:
        return lp, lp
    return max_tile, _round_up(lp, max_tile)


def _cparams(*dim_sem):
    return pltpu.CompilerParams(dimension_semantics=tuple(dim_sem),
                                vmem_limit_bytes=VMEM_LIMIT_BYTES)


# ----------------------------- Pallas kernels -----------------------------

def _matmul_kernel(x_ref, w_ref, b_ref, o_ref, acc_ref, *, activation):
    """Tiled matmul: bf16 MXU operands, f32 accumulation, bias(+relu) epilogue."""
    @pl.when(pl.program_id(2) == 0)
    def _init():
        acc_ref[...] = jnp.zeros_like(acc_ref)

    acc_ref[...] += jnp.dot(x_ref[...].astype(jnp.bfloat16), w_ref[...],
                            preferred_element_type=jnp.float32)

    @pl.when(pl.program_id(2) == pl.num_programs(2) - 1)
    def _finalize():
        y = acc_ref[...] + b_ref[...]
        if activation == "relu":
            y = jnp.maximum(y, 0.0)
        o_ref[...] = y.astype(o_ref.dtype)


def _matmul_add_ln_kernel(x_ref, w_ref, b_ref, r_ref, g_ref, beta_ref, o_ref,
                          acc_ref, *, d_real):
    """LayerNorm(residual + x @ w + b) fused into the matmul epilogue.

    The whole output row lives in one N tile.  Lane-padded columns (>= d_real)
    of acc/bias/residual are exactly zero by construction, so the mean needs no
    mask; the variance masks the padded lanes explicitly."""
    @pl.when(pl.program_id(1) == 0)
    def _init():
        acc_ref[...] = jnp.zeros_like(acc_ref)

    acc_ref[...] += jnp.dot(x_ref[...].astype(jnp.bfloat16), w_ref[...],
                            preferred_element_type=jnp.float32)

    @pl.when(pl.program_id(1) == pl.num_programs(1) - 1)
    def _finalize():
        y = acc_ref[...] + b_ref[...] + r_ref[...]
        n = y.shape[-1]
        inv_d = 1.0 / d_real
        mean = jnp.sum(y, axis=-1, keepdims=True) * inv_d
        dev = y - mean
        if d_real != n:
            lane = jax.lax.broadcasted_iota(jnp.int32, y.shape, 1)
            dev = jnp.where(lane < d_real, dev, 0.0)
        var = jnp.sum(dev * dev, axis=-1, keepdims=True) * inv_d
        yhat = dev * jax.lax.rsqrt(var + 1e-5)
        o_ref[...] = (yhat * g_ref[...] + beta_ref[...]).astype(o_ref.dtype)


def _mha_flash_kernel(kbias_ref, q_ref, k_ref, v_ref, o_ref,
                      m_sc, l_sc, acc_sc, *, num_heads, d_model, causal):
    """Flash-style online-softmax attention over one (q-tile, kv-tile) pair.

    kbias_ref: (1, tk)  additive key-pad bias (0 / NEG_INF).
    q_ref:     (tq, Dp) bf16 (softmax scale already folded into Wq).
    k_ref/v_ref: (tk, Dp) bf16.
    o_ref:     (tq, Dp) bf16, written once on the last KV step.
    m_sc/l_sc: (tq, num_heads) f32 running max / denominator.
    acc_sc:    (tq, Dp) f32 running numerator (pad lanes stay zero).
    """
    kv_step = pl.program_id(2)
    tq = q_ref.shape[0]
    tk = k_ref.shape[0]
    dh = d_model // num_heads

    @pl.when(kv_step == 0)
    def _init():
        m_sc[...] = jnp.full_like(m_sc, -1e30)
        l_sc[...] = jnp.zeros_like(l_sc)
        acc_sc[...] = jnp.zeros_like(acc_sc)

    bias = kbias_ref[...]                                   # (1, tk)
    if causal:
        q0 = pl.program_id(1) * tq
        k0 = kv_step * tk
        qi = q0 + jax.lax.broadcasted_iota(jnp.int32, (tq, tk), 0)
        ki = k0 + jax.lax.broadcasted_iota(jnp.int32, (tq, tk), 1)
        bias = bias + jnp.where(ki > qi, NEG_INF, 0.0)      # (tq, tk)

    for h in range(num_heads):                              # static unroll
        lo = h * dh
        qh = q_ref[:, lo:lo + dh]
        kh = k_ref[:, lo:lo + dh]
        vh = v_ref[:, lo:lo + dh]
        s = jax.lax.dot_general(qh, kh, (((1,), (1,)), ((), ())),
                                preferred_element_type=jnp.float32)
        s = s + bias
        m_prev = m_sc[:, h:h + 1]
        m_new = jnp.maximum(m_prev, jnp.max(s, axis=-1, keepdims=True))
        alpha = jnp.exp(m_prev - m_new)
        p = jnp.exp(s - m_new)
        l_sc[:, h:h + 1] = alpha * l_sc[:, h:h + 1] + jnp.sum(p, axis=-1,
                                                              keepdims=True)
        acc_sc[:, lo:lo + dh] = alpha * acc_sc[:, lo:lo + dh] + jnp.dot(
            p.astype(jnp.bfloat16), vh, preferred_element_type=jnp.float32)
        m_sc[:, h:h + 1] = m_new

    @pl.when(kv_step == pl.num_programs(2) - 1)
    def _finalize():
        for h in range(num_heads):
            lo = h * dh
            inv = pl.reciprocal(l_sc[:, h:h + 1], approx=True)
            acc_sc[:, lo:lo + dh] = acc_sc[:, lo:lo + dh] * inv
        o_ref[...] = acc_sc[...].astype(o_ref.dtype)


# ----------------------------- kernel wrappers -----------------------------

def linear(x, w, b, *, activation=None, out_dtype=jnp.float32):
    """x: (M, K); w: (K, N) bf16 pre-padded; b: (1, N) f32 pre-padded.

    K and N are multiples of 128 (padded once at prepare time); only M may need
    padding here.  Activations are cast to bf16 inside the kernel."""
    M, K = x.shape
    Kw, N = w.shape
    assert K == Kw and K % 128 == 0 and N % 128 == 0

    tm = min(512, _round_up(M, 16))
    Mp = _round_up(M, tm)
    tk = _choose_tile(K, 512, 128)
    tn = _choose_tile(N, 512, 128)
    if Mp != M:
        x = jnp.pad(x, ((0, Mp - M), (0, 0)))

    grid = (Mp // tm, N // tn, K // tk)
    kernel = functools.partial(_matmul_kernel, activation=activation)
    out = pl.pallas_call(
        kernel,
        out_shape=jax.ShapeDtypeStruct((Mp, N), out_dtype),
        grid_spec=pltpu.PrefetchScalarGridSpec(
            num_scalar_prefetch=0,
            grid=grid,
            in_specs=[
                pl.BlockSpec((tm, tk), lambda i, j, k: (i, k)),
                pl.BlockSpec((tk, tn), lambda i, j, k: (k, j)),
                pl.BlockSpec((1, tn), lambda i, j, k: (0, j)),
            ],
            out_specs=pl.BlockSpec((tm, tn), lambda i, j, k: (i, j)),
            scratch_shapes=[pltpu.VMEM((tm, tn), jnp.float32)],
        ),
        compiler_params=_cparams("parallel", "parallel", "arbitrary"),
    )(x, w, b)
    return out[:M] if Mp != M else out


def linear_add_ln(x, w, b, residual, gamma, beta, *, d_real):
    """LayerNorm(residual + x @ w + b) with the add+LN fused into the matmul
    epilogue.  Requires the full output row in one N tile."""
    M, K = x.shape
    Kw, N = w.shape
    assert K == Kw and K % 128 == 0 and N % 128 == 0

    tm = min(512, _round_up(M, 16))
    Mp = _round_up(M, tm)
    tk = _choose_tile(K, 512, 128)
    if Mp != M:
        x = jnp.pad(x, ((0, Mp - M), (0, 0)))
        residual = jnp.pad(residual, ((0, Mp - M), (0, 0)))

    grid = (Mp // tm, K // tk)
    kernel = functools.partial(_matmul_add_ln_kernel, d_real=d_real)
    out = pl.pallas_call(
        kernel,
        out_shape=jax.ShapeDtypeStruct((Mp, N), jnp.float32),
        grid_spec=pltpu.PrefetchScalarGridSpec(
            num_scalar_prefetch=0,
            grid=grid,
            in_specs=[
                pl.BlockSpec((tm, tk), lambda i, k: (i, k)),
                pl.BlockSpec((tk, N), lambda i, k: (k, 0)),
                pl.BlockSpec((1, N), lambda i, k: (0, 0)),
                pl.BlockSpec((tm, N), lambda i, k: (i, 0)),
                pl.BlockSpec((1, N), lambda i, k: (0, 0)),
                pl.BlockSpec((1, N), lambda i, k: (0, 0)),
            ],
            out_specs=pl.BlockSpec((tm, N), lambda i, k: (i, 0)),
            scratch_shapes=[pltpu.VMEM((tm, N), jnp.float32)],
        ),
        compiler_params=_cparams("parallel", "arbitrary"),
    )(x, w, b, residual, gamma, beta)
    return out[:M] if Mp != M else out


def _attention(q_src, kv_src, key_bias, *, num_heads, d_model, causal,
               q_off, k_off, v_off):
    """Flash-style multi-head attention.

    q_src:  (B, Lq, nq*Dp) bf16 containing Q at lane-block q_off.
    kv_src: (B, Lk, nk*Dp) bf16 containing K at lane-block k_off and V at v_off
            (for self-attention q_src is kv_src is the fused QKV projection).
    key_bias: (B, 1, Lk) f32 additive key-pad bias.
    Returns (B, Lq, Dp) bf16.
    """
    B, Lq, _ = q_src.shape
    Lk = kv_src.shape[1]
    dp = _round_up(d_model, 128)

    tq, Lqp = _seq_tile(Lq, 256)
    tk, Lkp = _seq_tile(Lk, 512)
    if Lqp != Lq:
        q_src = jnp.pad(q_src, ((0, 0), (0, Lqp - Lq), (0, 0)))
    if Lkp != Lk:
        kv_src = jnp.pad(kv_src, ((0, 0), (0, Lkp - Lk), (0, 0)))
        key_bias = jnp.pad(key_bias, ((0, 0), (0, 0), (0, Lkp - Lk)),
                           constant_values=NEG_INF)

    grid = (B, Lqp // tq, Lkp // tk)
    kernel = functools.partial(_mha_flash_kernel, num_heads=num_heads,
                               d_model=d_model, causal=causal)
    out = pl.pallas_call(
        kernel,
        out_shape=jax.ShapeDtypeStruct((B, Lqp, dp), jnp.bfloat16),
        grid_spec=pltpu.PrefetchScalarGridSpec(
            num_scalar_prefetch=0,
            grid=grid,
            in_specs=[
                pl.BlockSpec((None, 1, tk), lambda b, qi, kv: (b, 0, kv)),
                pl.BlockSpec((None, tq, dp), lambda b, qi, kv: (b, qi, q_off)),
                pl.BlockSpec((None, tk, dp), lambda b, qi, kv: (b, kv, k_off)),
                pl.BlockSpec((None, tk, dp), lambda b, qi, kv: (b, kv, v_off)),
            ],
            out_specs=pl.BlockSpec((None, tq, dp), lambda b, qi, kv: (b, qi, 0)),
            scratch_shapes=[
                pltpu.VMEM((tq, num_heads), jnp.float32),   # running max
                pltpu.VMEM((tq, num_heads), jnp.float32),   # running denom
                pltpu.VMEM((tq, dp), jnp.float32),          # running numerator
            ],
        ),
        compiler_params=_cparams("parallel", "parallel", "arbitrary"),
    )(key_bias, q_src, kv_src, kv_src)
    if Lqp != Lq:
        out = out[:, :Lq]
    return out


# ----------------------------- model -----------------------------

def encoder_layer(p, x, key_bias, num_heads, d_model):
    B, L, dp = x.shape
    xf = x.reshape(B * L, dp)
    qkv = linear(xf, p["w_qkv"], p["b_qkv"], out_dtype=jnp.bfloat16)
    qkv = qkv.reshape(B, L, 3 * dp)
    attn = _attention(qkv, qkv, key_bias, num_heads=num_heads, d_model=d_model,
                      causal=False, q_off=0, k_off=1, v_off=2)
    x1 = linear_add_ln(attn.reshape(B * L, dp), p["wo"], p["bo"], xf,
                       p["ln1_g"], p["ln1_b"], d_real=d_model)
    h = linear(x1, p["w1"], p["b1"], activation="relu", out_dtype=jnp.bfloat16)
    x2 = linear_add_ln(h, p["w2"], p["b2"], x1, p["ln2_g"], p["ln2_b"],
                       d_real=d_model)
    return x2.reshape(B, L, dp)


def decoder_layer(p, y, memory, tgt_key_bias, src_key_bias, num_heads, d_model):
    B, Lt, dp = y.shape
    Ls = memory.shape[1]
    yf = y.reshape(B * Lt, dp)

    sa = p["self_attn"]
    qkv = linear(yf, sa["w_qkv"], sa["b_qkv"], out_dtype=jnp.bfloat16)
    qkv = qkv.reshape(B, Lt, 3 * dp)
    a = _attention(qkv, qkv, tgt_key_bias, num_heads=num_heads, d_model=d_model,
                   causal=True, q_off=0, k_off=1, v_off=2)
    y1 = linear_add_ln(a.reshape(B * Lt, dp), sa["wo"], sa["bo"], yf,
                       p["ln1_g"], p["ln1_b"], d_real=d_model)

    ca = p["cross_attn"]
    q = linear(y1, ca["wq"], ca["bq"], out_dtype=jnp.bfloat16).reshape(B, Lt, dp)
    kv = linear(memory.reshape(B * Ls, dp), ca["w_kv"], ca["b_kv"],
                out_dtype=jnp.bfloat16).reshape(B, Ls, 2 * dp)
    c = _attention(q, kv, src_key_bias, num_heads=num_heads, d_model=d_model,
                   causal=False, q_off=0, k_off=0, v_off=1)
    y2 = linear_add_ln(c.reshape(B * Lt, dp), ca["wo"], ca["bo"], y1,
                       p["ln2_g"], p["ln2_b"], d_real=d_model)

    f = p["ffn"]
    h = linear(y2, f["w1"], f["b1"], activation="relu", out_dtype=jnp.bfloat16)
    y3 = linear_add_ln(h, f["w2"], f["b2"], y2, p["ln3_g"], p["ln3_b"],
                       d_real=d_model)
    return y3.reshape(B, Lt, dp)


def generate_key_biases(src, tgt, src_pad_idx, tgt_pad_idx):
    """Additive key-padding biases (0 / NEG_INF), shape (B, 1, L).

    The causal part of the decoder self-attention mask is built in-kernel."""
    src_bias = jnp.where(src == src_pad_idx, NEG_INF, 0.0).astype(jnp.float32)
    tgt_bias = jnp.where(tgt == tgt_pad_idx, NEG_INF, 0.0).astype(jnp.float32)
    return src_bias[:, None, :], tgt_bias[:, None, :]


def transformer_forward(params, src, tgt, cfg):
    num_heads = cfg["num_heads"]
    d_model = cfg["embed_dim"]
    src_bias, tgt_bias = generate_key_biases(
        src, tgt, cfg["src_pad_idx"], cfg["tgt_pad_idx"])

    # ----- encoder -----
    B, Ls = src.shape
    x = params["enc_tok_emb"][src] + params["enc_pos_emb"][:Ls][None, :, :]
    for layer in params["enc_layers"]:
        x = encoder_layer(layer, x, src_bias, num_heads, d_model)
    memory = x

    # ----- decoder -----
    _, Lt = tgt.shape
    y = params["dec_tok_emb"][tgt] + params["dec_pos_emb"][:Lt][None, :, :]
    for layer in params["dec_layers"]:
        y = decoder_layer(layer, y, memory, tgt_bias, src_bias,
                          num_heads, d_model)

    # final projection to target vocab (padded to 128 lanes, slice at the end)
    dp = y.shape[-1]
    logits = linear(y.reshape(B * Lt, dp), params["out_w"], params["out_b"])
    logits = logits[:, :cfg["tgt_vocab_size"]]
    return logits.reshape(B, Lt, cfg["tgt_vocab_size"])


# ----------------------------- parameter init / prep -----------------------------

def _init_dense(key, din, dout):
    w = jax.random.normal(key, (din, dout), jnp.float32) * 0.02
    b = jnp.zeros((dout,), jnp.float32)
    return w, b


def _init_mha(keys, d):
    wq, bq = _init_dense(keys[0], d, d)
    wk, bk = _init_dense(keys[1], d, d)
    wv, bv = _init_dense(keys[2], d, d)
    wo, bo = _init_dense(keys[3], d, d)
    return dict(wq=wq, bq=bq, wk=wk, bk=bk, wv=wv, bv=bv, wo=wo, bo=bo)


def _init_ffn(keys, d, h):
    w1, b1 = _init_dense(keys[0], d, h)
    w2, b2 = _init_dense(keys[1], h, d)
    return dict(w1=w1, b1=b1, w2=w2, b2=b2)


def init_transformer_params(key, cfg):
    d, h = cfg["embed_dim"], cfg["hidden_dim"]
    keys = iter(jax.random.split(key, 256))
    nk = lambda n=1: [next(keys) for _ in range(n)]

    params = {
        "enc_tok_emb": jax.random.normal(nk()[0], (cfg["src_vocab_size"], d)) * 0.02,
        "enc_pos_emb": jax.random.normal(nk()[0], (cfg["max_length"], d)) * 0.02,
        "dec_tok_emb": jax.random.normal(nk()[0], (cfg["tgt_vocab_size"], d)) * 0.02,
        "dec_pos_emb": jax.random.normal(nk()[0], (cfg["max_length"], d)) * 0.02,
        "enc_layers": [],
        "dec_layers": [],
    }
    for _ in range(cfg["num_enc_layers"]):
        params["enc_layers"].append(dict(
            self_attn=_init_mha(nk(4), d),
            ffn=_init_ffn(nk(2), d, h),
            ln1_g=jnp.ones((d,)), ln1_b=jnp.zeros((d,)),
            ln2_g=jnp.ones((d,)), ln2_b=jnp.zeros((d,)),
        ))
    for _ in range(cfg["num_dec_layers"]):
        params["dec_layers"].append(dict(
            self_attn=_init_mha(nk(4), d),
            cross_attn=_init_mha(nk(4), d),
            ffn=_init_ffn(nk(2), d, h),
            ln1_g=jnp.ones((d,)), ln1_b=jnp.zeros((d,)),
            ln2_g=jnp.ones((d,)), ln2_b=jnp.zeros((d,)),
            ln3_g=jnp.ones((d,)), ln3_b=jnp.zeros((d,)),
        ))
    ow, ob = _init_dense(nk()[0], d, cfg["tgt_vocab_size"])
    params["out_w"], params["out_b"] = ow, ob
    return params


def prepare_params(raw, cfg):
    """One-time weight prep: pad all matmul dims to 128-multiples, cast weights
    to bf16, fuse QKV / KV projections, fold 1/sqrt(Dh) into Wq/bq, pad
    embeddings and LN params to the carried Dp lane width."""
    d, hid, heads = cfg["embed_dim"], cfg["hidden_dim"], cfg["num_heads"]
    dp = _round_up(d, 128)
    hp = _round_up(hid, 128)
    vtp = _round_up(cfg["tgt_vocab_size"], 128)
    scale = 1.0 / math.sqrt(d // heads)

    def pw(w, kp, np_):
        return jnp.pad(w, ((0, kp - w.shape[0]),
                           (0, np_ - w.shape[1]))).astype(jnp.bfloat16)

    def pb(v, np_):
        return jnp.pad(v, (0, np_ - v.shape[0])).reshape(1, np_).astype(jnp.float32)

    def pemb(e):
        return jnp.pad(e, ((0, 0), (0, dp - e.shape[1]))).astype(jnp.float32)

    def prep_fused_attn(a):
        wq, bq = a["wq"] * scale, a["bq"] * scale
        return {
            "w_qkv": jnp.concatenate(
                [pw(wq, dp, dp), pw(a["wk"], dp, dp), pw(a["wv"], dp, dp)], axis=1),
            "b_qkv": jnp.concatenate(
                [pb(bq, dp), pb(a["bk"], dp), pb(a["bv"], dp)], axis=1),
            "wo": pw(a["wo"], dp, dp), "bo": pb(a["bo"], dp),
        }

    def prep_cross_attn(a):
        wq, bq = a["wq"] * scale, a["bq"] * scale
        return {
            "wq": pw(wq, dp, dp), "bq": pb(bq, dp),
            "w_kv": jnp.concatenate([pw(a["wk"], dp, dp), pw(a["wv"], dp, dp)], axis=1),
            "b_kv": jnp.concatenate([pb(a["bk"], dp), pb(a["bv"], dp)], axis=1),
            "wo": pw(a["wo"], dp, dp), "bo": pb(a["bo"], dp),
        }

    def prep_ffn(f):
        return {"w1": pw(f["w1"], dp, hp), "b1": pb(f["b1"], hp),
                "w2": pw(f["w2"], hp, dp), "b2": pb(f["b2"], dp)}

    prep = {
        "enc_tok_emb": pemb(raw["enc_tok_emb"]),
        "enc_pos_emb": pemb(raw["enc_pos_emb"]),
        "dec_tok_emb": pemb(raw["dec_tok_emb"]),
        "dec_pos_emb": pemb(raw["dec_pos_emb"]),
        "out_w": pw(raw["out_w"], dp, vtp),
        "out_b": pb(raw["out_b"], vtp),
        "enc_layers": [],
        "dec_layers": [],
    }
    for lyr in raw["enc_layers"]:
        prep["enc_layers"].append({
            **prep_fused_attn(lyr["self_attn"]),
            **prep_ffn(lyr["ffn"]),
            "ln1_g": pb(lyr["ln1_g"], dp), "ln1_b": pb(lyr["ln1_b"], dp),
            "ln2_g": pb(lyr["ln2_g"], dp), "ln2_b": pb(lyr["ln2_b"], dp),
        })
    for lyr in raw["dec_layers"]:
        prep["dec_layers"].append({
            "self_attn": prep_fused_attn(lyr["self_attn"]),
            "cross_attn": prep_cross_attn(lyr["cross_attn"]),
            "ffn": prep_ffn(lyr["ffn"]),
            "ln1_g": pb(lyr["ln1_g"], dp), "ln1_b": pb(lyr["ln1_b"], dp),
            "ln2_g": pb(lyr["ln2_g"], dp), "ln2_b": pb(lyr["ln2_b"], dp),
            "ln3_g": pb(lyr["ln3_g"], dp), "ln3_b": pb(lyr["ln3_b"], dp),
        })
    return prep


# ----------------------------- main -----------------------------

if __name__ == "__main__":
    cfg = dict(
        src_vocab_size=32, tgt_vocab_size=32,
        embed_dim=32, num_heads=4, hidden_dim=64,
        num_enc_layers=2, num_dec_layers=2,
        max_length=16, dropout_p=0.0,
        src_pad_idx=0, tgt_pad_idx=0,
    )
    B, Ls, Lt = 2, 8, 8

    key = jax.random.PRNGKey(0)
    k_src, k_tgt, k_par = jax.random.split(key, 3)

    src = jax.random.randint(k_src, (B, Ls), 1, cfg["src_vocab_size"], jnp.int32)
    tgt = jax.random.randint(k_tgt, (B, Lt), 1, cfg["tgt_vocab_size"], jnp.int32)
    # introduce some padding to exercise the masks
    src = src.at[1, -2:].set(cfg["src_pad_idx"])
    tgt = tgt.at[1, -1:].set(cfg["tgt_pad_idx"])

    raw_params = init_transformer_params(k_par, cfg)
    params = jax.tree_util.tree_map(jax.block_until_ready,
                                    prepare_params(raw_params, cfg))

    forward = jax.jit(lambda p, s, t: transformer_forward(p, s, t, cfg))
    out = forward(params, src, tgt)
    out = jax.block_until_ready(out)

    assert out.shape == (B, Lt, cfg["tgt_vocab_size"])
    assert bool(jnp.all(jnp.isfinite(out)))
    print("KERNEL_OK")
</pallas_src>

<mosaic_0001>
module attributes {stable_mosaic.version = 11 : i64} {
  func.func @_matmul_kernel(%arg0: i32, %arg1: i32, %arg2: i32, %arg3: memref<16x128xf32, #tpu.memory_space<vmem>>, %arg4: memref<128x384xbf16, #tpu.memory_space<vmem>>, %arg5: memref<1x384xf32, #tpu.memory_space<vmem>>, %arg6: memref<16x384xbf16, #tpu.memory_space<vmem>>, %arg7: memref<16x384xf32, #tpu.memory_space<vmem>>) attributes {dimension_semantics = [#tpu.dimension_semantics<parallel>, #tpu.dimension_semantics<parallel>, #tpu.dimension_semantics<arbitrary>], iteration_bounds = array<i64: 1, 1, 1>, scalar_prefetch = 0 : i64, scratch_operands = 1 : i64, tpu.core_type = #tpu.core_type<tc>, window_params = [{transform_indices = @transform_0, window_bounds = array<i64: 16, 128>}, {transform_indices = @transform_1, window_bounds = array<i64: 128, 384>}, {transform_indices = @transform_2, window_bounds = array<i64: 1, 384>}, {transform_indices = @transform_3, window_bounds = array<i64: 16, 384>}]} {
    %c0_i32 = arith.constant 0 : i32
    %0 = arith.cmpi eq, %arg2, %c0_i32 : i32
    %1 = arith.extui %0 : i1 to i32
    %c0_i32_0 = arith.constant 0 : i32
    %2 = arith.cmpi ne, %1, %c0_i32_0 : i32
    scf.if %2 {
      %cst_10 = arith.constant 0.000000e+00 : f32
      %13 = vector.broadcast %cst_10 : f32 to vector<16x384xf32>
      %c0_11 = arith.constant 0 : index
      %c0_12 = arith.constant 0 : index
      %14 = vector.load %arg7[%c0_11, %c0_12] : memref<16x384xf32, #tpu.memory_space<vmem>>, vector<16x384xf32>
      tpu.vector_store %arg7[%c0_11, %c0_12], %13 {strides = array<i32>} : memref<16x384xf32, #tpu.memory_space<vmem>>, vector<16x384xf32>,
    } else {
    }
    %c0 = arith.constant 0 : index
    %c0_1 = arith.constant 0 : index
    %3 = vector.load %arg7[%c0, %c0_1] : memref<16x384xf32, #tpu.memory_space<vmem>>, vector<16x384xf32>
    %c0_2 = arith.constant 0 : index
    %c0_3 = arith.constant 0 : index
    %4 = vector.load %arg3[%c0_2, %c0_3] : memref<16x128xf32, #tpu.memory_space<vmem>>, vector<16x128xf32>
    %5 = arith.truncf %4 : vector<16x128xf32> to vector<16x128xbf16>
    %c0_4 = arith.constant 0 : index
    %c0_5 = arith.constant 0 : index
    %6 = vector.load %arg4[%c0_4, %c0_5] : memref<128x384xbf16, #tpu.memory_space<vmem>>, vector<128x384xbf16>
    %cst = arith.constant dense<0.000000e+00> : vector<16x384xf32>
    %7 = tpu.matmul %5, %6, %cst {dimension_numbers = #tpu.dot_dimension_numbers<[1], [0], [0], [1], [0, 0, 1, 1], [], []>} : vector<16x128xbf16>, vector<128x384xbf16>, vector<16x384xf32> -> vector<16x384xf32>
    %8 = arith.addf %3, %7 : vector<16x384xf32>
    %c0_6 = arith.constant 0 : index
    %c0_7 = arith.constant 0 : index
    %9 = vector.load %arg7[%c0_6, %c0_7] : memref<16x384xf32, #tpu.memory_space<vmem>>, vector<16x384xf32>
    tpu.vector_store %arg7[%c0_6, %c0_7], %8 {strides = array<i32>} : memref<16x384xf32, #tpu.memory_space<vmem>>, vector<16x384xf32>,
    %c0_i32_8 = arith.constant 0 : i32
    %10 = arith.cmpi eq, %arg2, %c0_i32_8 : i32
    %11 = arith.extui %10 : i1 to i32
    %c0_i32_9 = arith.constant 0 : i32
    %12 = arith.cmpi ne, %11, %c0_i32_9 : i32
    scf.if %12 {
      %c0_10 = arith.constant 0 : index
      %c0_11 = arith.constant 0 : index
      %13 = vector.load %arg7[%c0_10, %c0_11] : memref<16x384xf32, #tpu.memory_space<vmem>>, vector<16x384xf32>
      %c0_12 = arith.constant 0 : index
      %c0_13 = arith.constant 0 : index
      %14 = vector.load %arg5[%c0_12, %c0_13] : memref<1x384xf32, #tpu.memory_space<vmem>>, vector<1x384xf32>
      %15 = vector.broadcast %14 : vector<1x384xf32> to vector<16x384xf32>
      %16 = arith.addf %13, %15 : vector<16x384xf32>
      %17 = arith.truncf %16 : vector<16x384xf32> to vector<16x384xbf16>
      %c0_14 = arith.constant 0 : index
      %c0_15 = arith.constant 0 : index
      %18 = vector.load %arg6[%c0_14, %c0_15] : memref<16x384xbf16, #tpu.memory_space<vmem>>, vector<16x384xbf16>
      tpu.vector_store %arg6[%c0_14, %c0_15], %17 {strides = array<i32>} : memref<16x384xbf16, #tpu.memory_space<vmem>>, vector<16x384xbf16>,
    } else {
    }
    return
  }
  func.func @transform_0(%arg0: i32, %arg1: i32, %arg2: i32) -> (i32, i32) {
    %c0_i32 = arith.constant 0 : i32
    return %arg0, %arg2 : i32, i32
  }
  func.func @transform_1(%arg0: i32, %arg1: i32, %arg2: i32) -> (i32, i32) {
    %c0_i32 = arith.constant 0 : i32
    return %arg2, %arg1 : i32, i32
  }
  func.func @transform_2(%arg0: i32, %arg1: i32, %arg2: i32) -> (i32, i32) {
    %c0_i32 = arith.constant 0 : i32
    %c0_i32_0 = arith.constant 0 : i32
    return %c0_i32, %arg1 : i32, i32
  }
  func.func @transform_3(%arg0: i32, %arg1: i32, %arg2: i32) -> (i32, i32) {
    %c0_i32 = arith.constant 0 : i32
    return %arg0, %arg1 : i32, i32
  }
}

module attributes {stable_mosaic.version = 11 : i64} {
  func.func @_matmul_kernel(%arg0: i32, %arg1: i32, %arg2: i32, %arg3: memref<16x128xf32, #tpu.memory_space<vmem>>, %arg4: memref<128x128xbf16, #tpu.memory_space<vmem>>, %arg5: memref<1x128xf32, #tpu.memory_space<vmem>>, %arg6: memref<16x128xbf16, #tpu.memory_space<vmem>>, %arg7: memref<16x128xf32, #tpu.memory_space<vmem>>) attributes {dimension_semantics = [#tpu.dimension_semantics<parallel>, #tpu.dimension_semantics<parallel>, #tpu.dimension_semantics<arbitrary>], iteration_bounds = array<i64: 1, 1, 1>, scalar_prefetch = 0 : i64, scratch_operands = 1 : i64, tpu.core_type = #tpu.core_type<tc>, window_params = [{transform_indices = @transform_0, window_bounds = array<i64: 16, 128>}, {transform_indices = @transform_1, window_bounds = array<i64: 128, 128>}, {transform_indices = @transform_2, window_bounds = array<i64: 1, 128>}, {transform_indices = @transform_3, window_bounds = array<i64: 16, 128>}]} {
    %c0_i32 = arith.constant 0 : i32
    %0 = arith.cmpi eq, %arg2, %c0_i32 : i32
    %1 = arith.extui %0 : i1 to i32
    %c0_i32_0 = arith.constant 0 : i32
    %2 = arith.cmpi ne, %1, %c0_i32_0 : i32
    scf.if %2 {
      %cst_10 = arith.constant 0.000000e+00 : f32
      %13 = vector.broadcast %cst_10 : f32 to vector<16x128xf32>
      %c0_11 = arith.constant 0 : index
      %c0_12 = arith.constant 0 : index
      %14 = vector.load %arg7[%c0_11, %c0_12] : memref<16x128xf32, #tpu.memory_space<vmem>>, vector<16x128xf32>
      tpu.vector_store %arg7[%c0_11, %c0_12], %13 {strides = array<i32>} : memref<16x128xf32, #tpu.memory_space<vmem>>, vector<16x128xf32>,
    } else {
    }
    %c0 = arith.constant 0 : index
    %c0_1 = arith.constant 0 : index
    %3 = vector.load %arg7[%c0, %c0_1] : memref<16x128xf32, #tpu.memory_space<vmem>>, vector<16x128xf32>
    %c0_2 = arith.constant 0 : index
    %c0_3 = arith.constant 0 : index
    %4 = vector.load %arg3[%c0_2, %c0_3] : memref<16x128xf32, #tpu.memory_space<vmem>>, vector<16x128xf32>
    %5 = arith.truncf %4 : vector<16x128xf32> to vector<16x128xbf16>
    %c0_4 = arith.constant 0 : index
    %c0_5 = arith.constant 0 : index
    %6 = vector.load %arg4[%c0_4, %c0_5] : memref<128x128xbf16, #tpu.memory_space<vmem>>, vector<128x128xbf16>
    %cst = arith.constant dense<0.000000e+00> : vector<16x128xf32>
    %7 = tpu.matmul %5, %6, %cst {dimension_numbers = #tpu.dot_dimension_numbers<[1], [0], [0], [1], [0, 0, 1, 1], [], []>} : vector<16x128xbf16>, vector<128x128xbf16>, vector<16x128xf32> -> vector<16x128xf32>
    %8 = arith.addf %3, %7 : vector<16x128xf32>
    %c0_6 = arith.constant 0 : index
    %c0_7 = arith.constant 0 : index
    %9 = vector.load %arg7[%c0_6, %c0_7] : memref<16x128xf32, #tpu.memory_space<vmem>>, vector<16x128xf32>
    tpu.vector_store %arg7[%c0_6, %c0_7], %8 {strides = array<i32>} : memref<16x128xf32, #tpu.memory_space<vmem>>, vector<16x128xf32>,
    %c0_i32_8 = arith.constant 0 : i32
    %10 = arith.cmpi eq, %arg2, %c0_i32_8 : i32
    %11 = arith.extui %10 : i1 to i32
    %c0_i32_9 = arith.constant 0 : i32
    %12 = arith.cmpi ne, %11, %c0_i32_9 : i32
    scf.if %12 {
      %c0_10 = arith.constant 0 : index
      %c0_11 = arith.constant 0 : index
      %13 = vector.load %arg7[%c0_10, %c0_11] : memref<16x128xf32, #tpu.memory_space<vmem>>, vector<16x128xf32>
      %c0_12 = arith.constant 0 : index
      %c0_13 = arith.constant 0 : index
      %14 = vector.load %arg5[%c0_12, %c0_13] : memref<1x128xf32, #tpu.memory_space<vmem>>, vector<1x128xf32>
      %15 = vector.broadcast %14 : vector<1x128xf32> to vector<16x128xf32>
      %16 = arith.addf %13, %15 : vector<16x128xf32>
      %17 = arith.truncf %16 : vector<16x128xf32> to vector<16x128xbf16>
      %c0_14 = arith.constant 0 : index
      %c0_15 = arith.constant 0 : index
      %18 = vector.load %arg6[%c0_14, %c0_15] : memref<16x128xbf16, #tpu.memory_space<vmem>>, vector<16x128xbf16>
      tpu.vector_store %arg6[%c0_14, %c0_15], %17 {strides = array<i32>} : memref<16x128xbf16, #tpu.memory_space<vmem>>, vector<16x128xbf16>,
    } else {
    }
    return
  }
  func.func @transform_0(%arg0: i32, %arg1: i32, %arg2: i32) -> (i32, i32) {
    %c0_i32 = arith.constant 0 : i32
    return %arg0, %arg2 : i32, i32
  }
  func.func @transform_1(%arg0: i32, %arg1: i32, %arg2: i32) -> (i32, i32) {
    %c0_i32 = arith.constant 0 : i32
    return %arg2, %arg1 : i32, i32
  }
  func.func @transform_2(%arg0: i32, %arg1: i32, %arg2: i32) -> (i32, i32) {
    %c0_i32 = arith.constant 0 : i32
    %c0_i32_0 = arith.constant 0 : i32
    return %c0_i32, %arg1 : i32, i32
  }
  func.func @transform_3(%arg0: i32, %arg1: i32, %arg2: i32) -> (i32, i32) {
    %c0_i32 = arith.constant 0 : i32
    return %arg0, %arg1 : i32, i32
  }
}

module attributes {stable_mosaic.version = 11 : i64} {
  func.func @_matmul_add_ln_kernel(%arg0: i32, %arg1: i32, %arg2: memref<16x128xbf16, #tpu.memory_space<vmem>>, %arg3: memref<128x128xbf16, #tpu.memory_space<vmem>>, %arg4: memref<1x128xf32, #tpu.memory_space<vmem>>, %arg5: memref<16x128xf32, #tpu.memory_space<vmem>>, %arg6: memref<1x128xf32, #tpu.memory_space<vmem>>, %arg7: memref<1x128xf32, #tpu.memory_space<vmem>>, %arg8: memref<16x128xf32, #tpu.memory_space<vmem>>, %arg9: memref<16x128xf32, #tpu.memory_space<vmem>>) attributes {dimension_semantics = [#tpu.dimension_semantics<parallel>, #tpu.dimension_semantics<arbitrary>], iteration_bounds = array<i64: 1, 1>, scalar_prefetch = 0 : i64, scratch_operands = 1 : i64, tpu.core_type = #tpu.core_type<tc>, window_params = [{transform_indices = @transform_0, window_bounds = array<i64: 16, 128>}, {transform_indices = @transform_1, window_bounds = array<i64: 128, 128>}, {pipeline_mode = #tpu.pipeline_mode<synchronous>, transform_indices = @transform_2, window_bounds = array<i64: 1, 128>}, {transform_indices = @transform_3, window_bounds = array<i64: 16, 128>}, {pipeline_mode = #tpu.pipeline_mode<synchronous>, transform_indices = @transform_4, window_bounds = array<i64: 1, 128>}, {pipeline_mode = #tpu.pipeline_mode<synchronous>, transform_indices = @transform_5, window_bounds = array<i64: 1, 128>}, {transform_indices = @transform_6, window_bounds = array<i64: 16, 128>}]} {
    %c0_i32 = arith.constant 0 : i32
    %0 = arith.cmpi eq, %arg1, %c0_i32 : i32
    %1 = arith.extui %0 : i1 to i32
    %c0_i32_0 = arith.constant 0 : i32
    %2 = arith.cmpi ne, %1, %c0_i32_0 : i32
    scf.if %2 {
      %cst_10 = arith.constant 0.000000e+00 : f32
      %12 = vector.broadcast %cst_10 : f32 to vector<16x128xf32>
      %c0_11 = arith.constant 0 : index
      %c0_12 = arith.constant 0 : index
      %13 = vector.load %arg9[%c0_11, %c0_12] : memref<16x128xf32, #tpu.memory_space<vmem>>, vector<16x128xf32>
      tpu.vector_store %arg9[%c0_11, %c0_12], %12 {strides = array<i32>} : memref<16x128xf32, #tpu.memory_space<vmem>>, vector<16x128xf32>,
    } else {
    }
    %c0 = arith.constant 0 : index
    %c0_1 = arith.constant 0 : index
    %3 = vector.load %arg9[%c0, %c0_1] : memref<16x128xf32, #tpu.memory_space<vmem>>, vector<16x128xf32>
    %c0_2 = arith.constant 0 : index
    %c0_3 = arith.constant 0 : index
    %4 = vector.load %arg2[%c0_2, %c0_3] : memref<16x128xbf16, #tpu.memory_space<vmem>>, vector<16x128xbf16>
    %c0_4 = arith.constant 0 : index
    %c0_5 = arith.constant 0 : index
    %5 = vector.load %arg3[%c0_4, %c0_5] : memref<128x128xbf16, #tpu.memory_space<vmem>>, vector<128x128xbf16>
    %cst = arith.constant dense<0.000000e+00> : vector<16x128xf32>
    %6 = tpu.matmul %4, %5, %cst {dimension_numbers = #tpu.dot_dimension_numbers<[1], [0], [0], [1], [0, 0, 1, 1], [], []>} : vector<16x128xbf16>, vector<128x128xbf16>, vector<16x128xf32> -> vector<16x128xf32>
    %7 = arith.addf %3, %6 : vector<16x128xf32>
    %c0_6 = arith.constant 0 : index
    %c0_7 = arith.constant 0 : index
    %8 = vector.load %arg9[%c0_6, %c0_7] : memref<16x128xf32, #tpu.memory_space<vmem>>, vector<16x128xf32>
    tpu.vector_store %arg9[%c0_6, %c0_7], %7 {strides = array<i32>} : memref<16x128xf32, #tpu.memory_space<vmem>>, vector<16x128xf32>,
    %c0_i32_8 = arith.constant 0 : i32
    %9 = arith.cmpi eq, %arg1, %c0_i32_8 : i32
    %10 = arith.extui %9 : i1 to i32
    %c0_i32_9 = arith.constant 0 : i32
    %11 = arith.cmpi ne, %10, %c0_i32_9 : i32
    scf.if %11 {
      %c0_10 = arith.constant 0 : index
      %c0_11 = arith.constant 0 : index
      %12 = vector.load %arg9[%c0_10, %c0_11] : memref<16x128xf32, #tpu.memory_space<vmem>>, vector<16x128xf32>
      %c0_12 = arith.constant 0 : index
      %c0_13 = arith.constant 0 : index
      %13 = vector.load %arg4[%c0_12, %c0_13] : memref<1x128xf32, #tpu.memory_space<vmem>>, vector<1x128xf32>
      %14 = vector.broadcast %13 : vector<1x128xf32> to vector<16x128xf32>
      %15 = arith.addf %12, %14 : vector<16x128xf32>
      %c0_14 = arith.constant 0 : index
      %c0_15 = arith.constant 0 : index
      %16 = vector.load %arg5[%c0_14, %c0_15] : memref<16x128xf32, #tpu.memory_space<vmem>>, vector<16x128xf32>
      %17 = arith.addf %15, %16 : vector<16x128xf32>
      %cst_16 = arith.constant dense<0.000000e+00> : vector<16xf32>
      %18 = vector.multi_reduction <add>, %17, %cst_16 [1] : vector<16x128xf32> to vector<16xf32>
      %19 = vector.shape_cast %18 : vector<16xf32> to vector<16x1xf32>
      %cst_17 = arith.constant 3.125000e-02 : f32
      %20 = vector.broadcast %cst_17 : f32 to vector<16x1xf32>
      %21 = arith.mulf %19, %20 : vector<16x1xf32>
      %22 = vector.broadcast %21 : vector<16x1xf32> to vector<16x128xf32>
      %23 = arith.subf %17, %22 : vector<16x128xf32>
      %24 = tpu.iota {dimensions = array<i32: 1>} : vector<16x128xi32>
      %c32_i32 = arith.constant 32 : i32
      %25 = vector.broadcast %c32_i32 : i32 to vector<16x128xi32>
      %26 = arith.cmpi slt, %24, %25 : vector<16x128xi32>
      %cst_18 = arith.constant 0.000000e+00 : f32
      %27 = vector.broadcast %cst_18 : f32 to vector<16x128xf32>
      %28 = arith.select %26, %23, %27 : vector<16x128xi1>, vector<16x128xf32>
      %29 = arith.mulf %28, %28 : vector<16x128xf32>
      %cst_19 = arith.constant dense<0.000000e+00> : vector<16xf32>
      %30 = vector.multi_reduction <add>, %29, %cst_19 [1] : vector<16x128xf32> to vector<16xf32>
      %31 = vector.shape_cast %30 : vector<16xf32> to vector<16x1xf32>
      %cst_20 = arith.constant 3.125000e-02 : f32
      %32 = vector.broadcast %cst_20 : f32 to vector<16x1xf32>
      %33 = arith.mulf %31, %32 : vector<16x1xf32>
      %cst_21 = arith.constant 9.99999974E-6 : f32
      %34 = vector.broadcast %cst_21 : f32 to vector<16x1xf32>
      %35 = arith.addf %33, %34 : vector<16x1xf32>
      %36 = math.rsqrt %35 : vector<16x1xf32>
      %37 = vector.broadcast %36 : vector<16x1xf32> to vector<16x128xf32>
      %38 = arith.mulf %28, %37 : vector<16x128xf32>
      %c0_22 = arith.constant 0 : index
      %c0_23 = arith.constant 0 : index
      %39 = vector.load %arg6[%c0_22, %c0_23] : memref<1x128xf32, #tpu.memory_space<vmem>>, vector<1x128xf32>
      %40 = vector.broadcast %39 : vector<1x128xf32> to vector<16x128xf32>
      %41 = arith.mulf %38, %40 : vector<16x128xf32>
      %c0_24 = arith.constant 0 : index
      %c0_25 = arith.constant 0 : index
      %42 = vector.load %arg7[%c0_24, %c0_25] : memref<1x128xf32, #tpu.memory_space<vmem>>, vector<1x128xf32>
      %43 = vector.broadcast %42 : vector<1x128xf32> to vector<16x128xf32>
      %44 = arith.addf %41, %43 : vector<16x128xf32>
      %c0_26 = arith.constant 0 : index
      %c0_27 = arith.constant 0 : index
      %45 = vector.load %arg8[%c0_26, %c0_27] : memref<16x128xf32, #tpu.memory_space<vmem>>, vector<16x128xf32>
      tpu.vector_store %arg8[%c0_26, %c0_27], %44 {strides = array<i32>} : memref<16x128xf32, #tpu.memory_space<vmem>>, vector<16x128xf32>,
    } else {
    }
    return
  }
  func.func @transform_0(%arg0: i32, %arg1: i32) -> (i32, i32) {
    %c0_i32 = arith.constant 0 : i32
    return %arg0, %arg1 : i32, i32
  }
  func.func @transform_1(%arg0: i32, %arg1: i32) -> (i32, i32) {
    %c0_i32 = arith.constant 0 : i32
    %c0_i32_0 = arith.constant 0 : i32
    return %arg1, %c0_i32 : i32, i32
  }
  func.func @transform_2(%arg0: i32, %arg1: i32) -> (i32, i32) {
    %c0_i32 = arith.constant 0 : i32
    %c0_i32_0 = arith.constant 0 : i32
    %c0_i32_1 = arith.constant 0 : i32
    return %c0_i32, %c0_i32_0 : i32, i32
  }
  func.func @transform_3(%arg0: i32, %arg1: i32) -> (i32, i32) {
    %c0_i32 = arith.constant 0 : i32
    %c0_i32_0 = arith.constant 0 : i32
    return %arg0, %c0_i32 : i32, i32
  }
  func.func @transform_4(%arg0: i32, %arg1: i32) -> (i32, i32) {
    %c0_i32 = arith.constant 0 : i32
    %c0_i32_0 = arith.constant 0 : i32
    %c0_i32_1 = arith.constant 0 : i32
    return %c0_i32, %c0_i32_0 : i32, i32
  }
  func.func @transform_5(%arg0: i32, %arg1: i32) -> (i32, i32) {
    %c0_i32 = arith.constant 0 : i32
    %c0_i32_0 = arith.constant 0 : i32
    %c0_i32_1 = arith.constant 0 : i32
    return %c0_i32, %c0_i32_0 : i32, i32
  }
  func.func @transform_6(%arg0: i32, %arg1: i32) -> (i32, i32) {
    %c0_i32 = arith.constant 0 : i32
    %c0_i32_0 = arith.constant 0 : i32
    return %arg0, %c0_i32 : i32, i32
  }
}

module attributes {stable_mosaic.version = 11 : i64} {
  func.func @_mha_flash_kernel(%arg0: i32, %arg1: i32, %arg2: i32, %arg3: memref<1x1x8xf32, #tpu.memory_space<vmem>>, %arg4: memref<1x8x128xbf16, #tpu.memory_space<vmem>>, %arg5: memref<1x8x128xbf16, #tpu.memory_space<vmem>>, %arg6: memref<1x8x128xbf16, #tpu.memory_space<vmem>>, %arg7: memref<1x8x128xbf16, #tpu.memory_space<vmem>>, %arg8: memref<8x4xf32, #tpu.memory_space<vmem>>, %arg9: memref<8x4xf32, #tpu.memory_space<vmem>>, %arg10: memref<8x128xf32, #tpu.memory_space<vmem>>) attributes {dimension_semantics = [#tpu.dimension_semantics<parallel>, #tpu.dimension_semantics<parallel>, #tpu.dimension_semantics<arbitrary>], iteration_bounds = array<i64: 2, 1, 1>, scalar_prefetch = 0 : i64, scratch_operands = 3 : i64, tpu.core_type = #tpu.core_type<tc>, window_params = [{transform_indices = @transform_0, window_bounds = array<i64: 1, 1, 8>}, {transform_indices = @transform_1, window_bounds = array<i64: 1, 8, 128>}, {transform_indices = @transform_2, window_bounds = array<i64: 1, 8, 128>}, {transform_indices = @transform_3, window_bounds = array<i64: 1, 8, 128>}, {transform_indices = @transform_4, window_bounds = array<i64: 1, 8, 128>}]} {
    %c0_i32 = arith.constant 0 : i32
    %0 = arith.cmpi eq, %arg2, %c0_i32 : i32
    %1 = arith.extui %0 : i1 to i32
    %c0_i32_0 = arith.constant 0 : i32
    %2 = arith.cmpi ne, %1, %c0_i32_0 : i32
    scf.if %2 {
      %cst_101 = arith.constant -1.000000e+30 : f32
      %146 = vector.broadcast %cst_101 : f32 to vector<8x4xf32>
      %c0_102 = arith.constant 0 : index
      %c0_103 = arith.constant 0 : index
      %147 = vector.load %arg8[%c0_102, %c0_103] : memref<8x4xf32, #tpu.memory_space<vmem>>, vector<8x4xf32>
      tpu.vector_store %arg8[%c0_102, %c0_103], %146 {strides = array<i32>} : memref<8x4xf32, #tpu.memory_space<vmem>>, vector<8x4xf32>,
      %cst_104 = arith.constant 0.000000e+00 : f32
      %148 = vector.broadcast %cst_104 : f32 to vector<8x4xf32>
      %c0_105 = arith.constant 0 : index
      %c0_106 = arith.constant 0 : index
      %149 = vector.load %arg9[%c0_105, %c0_106] : memref<8x4xf32, #tpu.memory_space<vmem>>, vector<8x4xf32>
      tpu.vector_store %arg9[%c0_105, %c0_106], %148 {strides = array<i32>} : memref<8x4xf32, #tpu.memory_space<vmem>>, vector<8x4xf32>,
      %cst_107 = arith.constant 0.000000e+00 : f32
      %150 = vector.broadcast %cst_107 : f32 to vector<8x128xf32>
      %c0_108 = arith.constant 0 : index
      %c0_109 = arith.constant 0 : index
      %151 = vector.load %arg10[%c0_108, %c0_109] : memref<8x128xf32, #tpu.memory_space<vmem>>, vector<8x128xf32>
      tpu.vector_store %arg10[%c0_108, %c0_109], %150 {strides = array<i32>} : memref<8x128xf32, #tpu.memory_space<vmem>>, vector<8x128xf32>,
    } else {
    }
    %c0 = arith.constant 0 : index
    %c0_1 = arith.constant 0 : index
    %c0_2 = arith.constant 0 : index
    %3 = vector.load %arg3[%c0, %c0_1, %c0_2] : memref<1x1x8xf32, #tpu.memory_space<vmem>>, vector<1x1x8xf32>
    %4 = vector.shape_cast %3 : vector<1x1x8xf32> to vector<1x8xf32>
    %c8_i32 = arith.constant 8 : i32
    %5 = arith.muli %arg1, %c8_i32 : i32
    %c8_i32_3 = arith.constant 8 : i32
    %6 = arith.muli %arg2, %c8_i32_3 : i32
    %7 = tpu.iota {dimensions = array<i32: 0>} : vector<8x8xi32>
    %8 = vector.broadcast %5 : i32 to vector<8x8xi32>
    %9 = arith.addi %8, %7 : vector<8x8xi32>
    %10 = tpu.iota {dimensions = array<i32: 1>} : vector<8x8xi32>
    %11 = vector.broadcast %6 : i32 to vector<8x8xi32>
    %12 = arith.addi %11, %10 : vector<8x8xi32>
    %13 = arith.cmpi sgt, %12, %9 : vector<8x8xi32>
    %cst = arith.constant -1.000000e+09 : f32
    %cst_4 = arith.constant 0.000000e+00 : f32
    %14 = vector.broadcast %cst : f32 to vector<8x8xf32>
    %15 = vector.broadcast %cst_4 : f32 to vector<8x8xf32>
    %16 = arith.select %13, %14, %15 : vector<8x8xi1>, vector<8x8xf32>
    %17 = vector.broadcast %4 : vector<1x8xf32> to vector<8x8xf32>
    %18 = arith.addf %17, %16 : vector<8x8xf32>
    %c0_5 = arith.constant 0 : index
    %c0_6 = arith.constant 0 : index
    %c0_7 = arith.constant 0 : index
    %19 = vector.load %arg4[%c0_5, %c0_6, %c0_7] : memref<1x8x128xbf16, #tpu.memory_space<vmem>>, vector<1x8x8xbf16>
    %20 = vector.shape_cast %19 : vector<1x8x8xbf16> to vector<8x8xbf16>
    %c0_8 = arith.constant 0 : index
    %c0_9 = arith.constant 0 : index
    %c0_10 = arith.constant 0 : index
    %21 = vector.load %arg5[%c0_8, %c0_9, %c0_10] : memref<1x8x128xbf16, #tpu.memory_space<vmem>>, vector<1x8x8xbf16>
    %22 = vector.shape_cast %21 : vector<1x8x8xbf16> to vector<8x8xbf16>
    %c0_11 = arith.constant 0 : index
    %c0_12 = arith.constant 0 : index
    %c0_13 = arith.constant 0 : index
    %23 = vector.load %arg6[%c0_11, %c0_12, %c0_13] : memref<1x8x128xbf16, #tpu.memory_space<vmem>>, vector<1x8x8xbf16>
    %24 = vector.shape_cast %23 : vector<1x8x8xbf16> to vector<8x8xbf16>
    %cst_14 = arith.constant dense<0.000000e+00> : vector<8x8xf32>
    %25 = tpu.matmul %20, %22, %cst_14 {dimension_numbers = #tpu.dot_dimension_numbers<[1], [1], [0], [0], [0, 0, 1, 0], [], []>} : vector<8x8xbf16>, vector<8x8xbf16>, vector<8x8xf32> -> vector<8x8xf32>
    %26 = arith.addf %25, %18 : vector<8x8xf32>
    %c0_15 = arith.constant 0 : index
    %c0_16 = arith.constant 0 : index
    %27 = vector.load %arg8[%c0_15, %c0_16] : memref<8x4xf32, #tpu.memory_space<vmem>>, vector<8x1xf32>
    %cst_17 = arith.constant dense<0xFF800000> : vector<8xf32>
    %28 = vector.multi_reduction <maximumf>, %26, %cst_17 [1] : vector<8x8xf32> to vector<8xf32>
    %29 = vector.shape_cast %28 : vector<8xf32> to vector<8x1xf32>
    %30 = arith.maximumf %27, %29 : vector<8x1xf32>
    %31 = arith.subf %27, %30 : vector<8x1xf32>
    %32 = math.exp %31 : vector<8x1xf32>
    %33 = vector.broadcast %30 : vector<8x1xf32> to vector<8x8xf32>
    %34 = arith.subf %26, %33 : vector<8x8xf32>
    %35 = math.exp %34 : vector<8x8xf32>
    %c0_18 = arith.constant 0 : index
    %c0_19 = arith.constant 0 : index
    %36 = vector.load %arg9[%c0_18, %c0_19] : memref<8x4xf32, #tpu.memory_space<vmem>>, vector<8x1xf32>
    %37 = arith.mulf %32, %36 : vector<8x1xf32>
    %cst_20 = arith.constant dense<0.000000e+00> : vector<8xf32>
    %38 = vector.multi_reduction <add>, %35, %cst_20 [1] : vector<8x8xf32> to vector<8xf32>
    %39 = vector.shape_cast %38 : vector<8xf32> to vector<8x1xf32>
    %40 = arith.addf %37, %39 : vector<8x1xf32>
    %c0_21 = arith.constant 0 : index
    %c0_22 = arith.constant 0 : index
    %41 = vector.load %arg9[%c0_21, %c0_22] : memref<8x4xf32, #tpu.memory_space<vmem>>, vector<8x1xf32>
    tpu.vector_store %arg9[%c0_21, %c0_22], %40 {strides = array<i32>} : memref<8x4xf32, #tpu.memory_space<vmem>>, vector<8x1xf32>,
    %c0_23 = arith.constant 0 : index
    %c0_24 = arith.constant 0 : index
    %42 = vector.load %arg10[%c0_23, %c0_24] : memref<8x128xf32, #tpu.memory_space<vmem>>, vector<8x8xf32>
    %43 = vector.broadcast %32 : vector<8x1xf32> to vector<8x8xf32>
    %44 = arith.mulf %43, %42 : vector<8x8xf32>
    %45 = arith.truncf %35 : vector<8x8xf32> to vector<8x8xbf16>
    %cst_25 = arith.constant dense<0.000000e+00> : vector<8x8xf32>
    %46 = tpu.matmul %45, %24, %cst_25 {dimension_numbers = #tpu.dot_dimension_numbers<[1], [0], [0], [1], [0, 0, 1, 1], [], []>} : vector<8x8xbf16>, vector<8x8xbf16>, vector<8x8xf32> -> vector<8x8xf32>
    %47 = arith.addf %44, %46 : vector<8x8xf32>
    %c0_26 = arith.constant 0 : index
    %c0_27 = arith.constant 0 : index
    %48 = vector.load %arg10[%c0_26, %c0_27] : memref<8x128xf32, #tpu.memory_space<vmem>>, vector<8x8xf32>
    tpu.vector_store %arg10[%c0_26, %c0_27], %47 {strides = array<i32>} : memref<8x128xf32, #tpu.memory_space<vmem>>, vector<8x8xf32>,
    %c0_28 = arith.constant 0 : index
    %c0_29 = arith.constant 0 : index
    %49 = vector.load %arg8[%c0_28, %c0_29] : memref<8x4xf32, #tpu.memory_space<vmem>>, vector<8x1xf32>
    tpu.vector_store %arg8[%c0_28, %c0_29], %30 {strides = array<i32>} : memref<8x4xf32, #tpu.memory_space<vmem>>, vector<8x1xf32>,
    %c0_30 = arith.constant 0 : index
    %c0_31 = arith.constant 0 : index
    %c8 = arith.constant 8 : index
    %50 = vector.load %arg4[%c0_30, %c0_31, %c8] : memref<1x8x128xbf16, #tpu.memory_space<vmem>>, vector<1x8x8xbf16>
    %51 = vector.shape_cast %50 : vector<1x8x8xbf16> to vector<8x8xbf16>
    %c0_32 = arith.constant 0 : index
    %c0_33 = arith.constant 0 : index
    %c8_34 = arith.constant 8 : index
    %52 = vector.load %arg5[%c0_32, %c0_33, %c8_34] : memref<1x8x128xbf16, #tpu.memory_space<vmem>>, vector<1x8x8xbf16>
    %53 = vector.shape_cast %52 : vector<1x8x8xbf16> to vector<8x8xbf16>
    %c0_35 = arith.constant 0 : index
    %c0_36 = arith.constant 0 : index
    %c8_37 = arith.constant 8 : index
    %54 = vector.load %arg6[%c0_35, %c0_36, %c8_37] : memref<1x8x128xbf16, #tpu.memory_space<vmem>>, vector<1x8x8xbf16>
    %55 = vector.shape_cast %54 : vector<1x8x8xbf16> to vector<8x8xbf16>
    %cst_38 = arith.constant dense<0.000000e+00> : vector<8x8xf32>
    %56 = tpu.matmul %51, %53, %cst_38 {dimension_numbers = #tpu.dot_dimension_numbers<[1], [1], [0], [0], [0, 0, 1, 0], [], []>} : vector<8x8xbf16>, vector<8x8xbf16>, vector<8x8xf32> -> vector<8x8xf32>
    %57 = arith.addf %56, %18 : vector<8x8xf32>
    %c0_39 = arith.constant 0 : index
    %c1 = arith.constant 1 : index
    %58 = vector.load %arg8[%c0_39, %c1] : memref<8x4xf32, #tpu.memory_space<vmem>>, vector<8x1xf32>
    %cst_40 = arith.constant dense<0xFF800000> : vector<8xf32>
    %59 = vector.multi_reduction <maximumf>, %57, %cst_40 [1] : vector<8x8xf32> to vector<8xf32>
    %60 = vector.shape_cast %59 : vector<8xf32> to vector<8x1xf32>
    %61 = arith.maximumf %58, %60 : vector<8x1xf32>
    %62 = arith.subf %58, %61 : vector<8x1xf32>
    %63 = math.exp %62 : vector<8x1xf32>
    %64 = vector.broadcast %61 : vector<8x1xf32> to vector<8x8xf32>
    %65 = arith.subf %57, %64 : vector<8x8xf32>
    %66 = math.exp %65 : vector<8x8xf32>
    %c0_41 = arith.constant 0 : index
    %c1_42 = arith.constant 1 : index
    %67 = vector.load %arg9[%c0_41, %c1_42] : memref<8x4xf32, #tpu.memory_space<vmem>>, vector<8x1xf32>
    %68 = arith.mulf %63, %67 : vector<8x1xf32>
    %cst_43 = arith.constant dense<0.000000e+00> : vector<8xf32>
    %69 = vector.multi_reduction <add>, %66, %cst_43 [1] : vector<8x8xf32> to vector<8xf32>
    %70 = vector.shape_cast %69 : vector<8xf32> to vector<8x1xf32>
    %71 = arith.addf %68, %70 : vector<8x1xf32>
    %c0_44 = arith.constant 0 : index
    %c1_45 = arith.constant 1 : index
    %72 = vector.load %arg9[%c0_44, %c1_45] : memref<8x4xf32, #tpu.memory_space<vmem>>, vector<8x1xf32>
    tpu.vector_store %arg9[%c0_44, %c1_45], %71 {strides = array<i32>} : memref<8x4xf32, #tpu.memory_space<vmem>>, vector<8x1xf32>,
    %c0_46 = arith.constant 0 : index
    %c8_47 = arith.constant 8 : index
    %73 = vector.load %arg10[%c0_46, %c8_47] : memref<8x128xf32, #tpu.memory_space<vmem>>, vector<8x8xf32>
    %74 = vector.broadcast %63 : vector<8x1xf32> to vector<8x8xf32>
    %75 = arith.mulf %74, %73 : vector<8x8xf32>
    %76 = arith.truncf %66 : vector<8x8xf32> to vector<8x8xbf16>
    %cst_48 = arith.constant dense<0.000000e+00> : vector<8x8xf32>
    %77 = tpu.matmul %76, %55, %cst_48 {dimension_numbers = #tpu.dot_dimension_numbers<[1], [0], [0], [1], [0, 0, 1, 1], [], []>} : vector<8x8xbf16>, vector<8x8xbf16>, vector<8x8xf32> -> vector<8x8xf32>
    %78 = arith.addf %75, %77 : vector<8x8xf32>
    %c0_49 = arith.constant 0 : index
    %c8_50 = arith.constant 8 : index
    %79 = vector.load %arg10[%c0_49, %c8_50] : memref<8x128xf32, #tpu.memory_space<vmem>>, vector<8x8xf32>
    tpu.vector_store %arg10[%c0_49, %c8_50], %78 {strides = array<i32>} : memref<8x128xf32, #tpu.memory_space<vmem>>, vector<8x8xf32>,
    %c0_51 = arith.constant 0 : index
    %c1_52 = arith.constant 1 : index
    %80 = vector.load %arg8[%c0_51, %c1_52] : memref<8x4xf32, #tpu.memory_space<vmem>>, vector<8x1xf32>
    tpu.vector_store %arg8[%c0_51, %c1_52], %61 {strides = array<i32>} : memref<8x4xf32, #tpu.memory_space<vmem>>, vector<8x1xf32>,
    %c0_53 = arith.constant 0 : index
    %c0_54 = arith.constant 0 : index
    %c16 = arith.constant 16 : index
    %81 = vector.load %arg4[%c0_53, %c0_54, %c16] : memref<1x8x128xbf16, #tpu.memory_space<vmem>>, vector<1x8x8xbf16>
    %82 = vector.shape_cast %81 : vector<1x8x8xbf16> to vector<8x8xbf16>
    %c0_55 = arith.constant 0 : index
    %c0_56 = arith.constant 0 : index
    %c16_57 = arith.constant 16 : index
    %83 = vector.load %arg5[%c0_55, %c0_56, %c16_57] : memref<1x8x128xbf16, #tpu.memory_space<vmem>>, vector<1x8x8xbf16>
    %84 = vector.shape_cast %83 : vector<1x8x8xbf16> to vector<8x8xbf16>
    %c0_58 = arith.constant 0 : index
    %c0_59 = arith.constant 0 : index
    %c16_60 = arith.constant 16 : index
    %85 = vector.load %arg6[%c0_58, %c0_59, %c16_60] : memref<1x8x128xbf16, #tpu.memory_space<vmem>>, vector<1x8x8xbf16>
    %86 = vector.shape_cast %85 : vector<1x8x8xbf16> to vector<8x8xbf16>
    %cst_61 = arith.constant dense<0.000000e+00> : vector<8x8xf32>
    %87 = tpu.matmul %82, %84, %cst_61 {dimension_numbers = #tpu.dot_dimension_numbers<[1], [1], [0], [0], [0, 0, 1, 0], [], []>} : vector<8x8xbf16>, vector<8x8xbf16>, vector<8x8xf32> -> vector<8x8xf32>
    %88 = arith.addf %87, %18 : vector<8x8xf32>
    %c0_62 = arith.constant 0 : index
    %c2 = arith.constant 2 : index
    %89 = vector.load %arg8[%c0_62, %c2] : memref<8x4xf32, #tpu.memory_space<vmem>>, vector<8x1xf32>
    %cst_63 = arith.constant dense<0xFF800000> : vector<8xf32>
    %90 = vector.multi_reduction <maximumf>, %88, %cst_63 [1] : vector<8x8xf32> to vector<8xf32>
    %91 = vector.shape_cast %90 : vector<8xf32> to vector<8x1xf32>
    %92 = arith.maximumf %89, %91 : vector<8x1xf32>
    %93 = arith.subf %89, %92 : vector<8x1xf32>
    %94 = math.exp %93 : vector<8x1xf32>
    %95 = vector.broadcast %92 : vector<8x1xf32> to vector<8x8xf32>
    %96 = arith.subf %88, %95 : vector<8x8xf32>
    %97 = math.exp %96 : vector<8x8xf32>
    %c0_64 = arith.constant 0 : index
    %c2_65 = arith.constant 2 : index
    %98 = vector.load %arg9[%c0_64, %c2_65] : memref<8x4xf32, #tpu.memory_space<vmem>>, vector<8x1xf32>
    %99 = arith.mulf %94, %98 : vector<8x1xf32>
    %cst_66 = arith.constant dense<0.000000e+00> : vector<8xf32>
    %100 = vector.multi_reduction <add>, %97, %cst_66 [1] : vector<8x8xf32> to vector<8xf32>
    %101 = vector.shape_cast %100 : vector<8xf32> to vector<8x1xf32>
    %102 = arith.addf %99, %101 : vector<8x1xf32>
    %c0_67 = arith.constant 0 : index
    %c2_68 = arith.constant 2 : index
    %103 = vector.load %arg9[%c0_67, %c2_68] : memref<8x4xf32, #tpu.memory_space<vmem>>, vector<8x1xf32>
    tpu.vector_store %arg9[%c0_67, %c2_68], %102 {strides = array<i32>} : memref<8x4xf32, #tpu.memory_space<vmem>>, vector<8x1xf32>,
    %c0_69 = arith.constant 0 : index
    %c16_70 = arith.constant 16 : index
    %104 = vector.load %arg10[%c0_69, %c16_70] : memref<8x128xf32, #tpu.memory_space<vmem>>, vector<8x8xf32>
    %105 = vector.broadcast %94 : vector<8x1xf32> to vector<8x8xf32>
    %106 = arith.mulf %105, %104 : vector<8x8xf32>
    %107 = arith.truncf %97 : vector<8x8xf32> to vector<8x8xbf16>
    %cst_71 = arith.constant dense<0.000000e+00> : vector<8x8xf32>
    %108 = tpu.matmul %107, %86, %cst_71 {dimension_numbers = #tpu.dot_dimension_numbers<[1], [0], [0], [1], [0, 0, 1, 1], [], []>} : vector<8x8xbf16>, vector<8x8xbf16>, vector<8x8xf32> -> vector<8x8xf32>
    %109 = arith.addf %106, %108 : vector<8x8xf32>
    %c0_72 = arith.constant 0 : index
    %c16_73 = arith.constant 16 : index
    %110 = vector.load %arg10[%c0_72, %c16_73] : memref<8x128xf32, #tpu.memory_space<vmem>>, vector<8x8xf32>
    tpu.vector_store %arg10[%c0_72, %c16_73], %109 {strides = array<i32>} : memref<8x128xf32, #tpu.memory_space<vmem>>, vector<8x8xf32>,
    %c0_74 = arith.constant 0 : index
    %c2_75 = arith.constant 2 : index
    %111 = vector.load %arg8[%c0_74, %c2_75] : memref<8x4xf32, #tpu.memory_space<vmem>>, vector<8x1xf32>
    tpu.vector_store %arg8[%c0_74, %c2_75], %92 {strides = array<i32>} : memref<8x4xf32, #tpu.memory_space<vmem>>, vector<8x1xf32>,
    %c0_76 = arith.constant 0 : index
    %c0_77 = arith.constant 0 : index
    %c24 = arith.constant 24 : index
    %112 = vector.load %arg4[%c0_76, %c0_77, %c24] : memref<1x8x128xbf16, #tpu.memory_space<vmem>>, vector<1x8x8xbf16>
    %113 = vector.shape_cast %112 : vector<1x8x8xbf16> to vector<8x8xbf16>
    %c0_78 = arith.constant 0 : index
    %c0_79 = arith.constant 0 : index
    %c24_80 = arith.constant 24 : index
    %114 = vector.load %arg5[%c0_78, %c0_79, %c24_80] : memref<1x8x128xbf16, #tpu.memory_space<vmem>>, vector<1x8x8xbf16>
    %115 = vector.shape_cast %114 : vector<1x8x8xbf16> to vector<8x8xbf16>
    %c0_81 = arith.constant 0 : index
    %c0_82 = arith.constant 0 : index
    %c24_83 = arith.constant 24 : index
    %116 = vector.load %arg6[%c0_81, %c0_82, %c24_83] : memref<1x8x128xbf16, #tpu.memory_space<vmem>>, vector<1x8x8xbf16>
    %117 = vector.shape_cast %116 : vector<1x8x8xbf16> to vector<8x8xbf16>
    %cst_84 = arith.constant dense<0.000000e+00> : vector<8x8xf32>
    %118 = tpu.matmul %113, %115, %cst_84 {dimension_numbers = #tpu.dot_dimension_numbers<[1], [1], [0], [0], [0, 0, 1, 0], [], []>} : vector<8x8xbf16>, vector<8x8xbf16>, vector<8x8xf32> -> vector<8x8xf32>
    %119 = arith.addf %118, %18 : vector<8x8xf32>
    %c0_85 = arith.constant 0 : index
    %c3 = arith.constant 3 : index
    %120 = vector.load %arg8[%c0_85, %c3] : memref<8x4xf32, #tpu.memory_space<vmem>>, vector<8x1xf32>
    %cst_86 = arith.constant dense<0xFF800000> : vector<8xf32>
    %121 = vector.multi_reduction <maximumf>, %119, %cst_86 [1] : vector<8x8xf32> to vector<8xf32>
    %122 = vector.shape_cast %121 : vector<8xf32> to vector<8x1xf32>
    %123 = arith.maximumf %120, %122 : vector<8x1xf32>
    %124 = arith.subf %120, %123 : vector<8x1xf32>
    %125 = math.exp %124 : vector<8x1xf32>
    %126 = vector.broadcast %123 : vector<8x1xf32> to vector<8x8xf32>
    %127 = arith.subf %119, %126 : vector<8x8xf32>
    %128 = math.exp %127 : vector<8x8xf32>
    %c0_87 = arith.constant 0 : index
    %c3_88 = arith.constant 3 : index
    %129 = vector.load %arg9[%c0_87, %c3_88] : memref<8x4xf32, #tpu.memory_space<vmem>>, vector<8x1xf32>
    %130 = arith.mulf %125, %129 : vector<8x1xf32>
    %cst_89 = arith.constant dense<0.000000e+00> : vector<8xf32>
    %131 = vector.multi_reduction <add>, %128, %cst_89 [1] : vector<8x8xf32> to vector<8xf32>
    %132 = vector.shape_cast %131 : vector<8xf32> to vector<8x1xf32>
    %133 = arith.addf %130, %132 : vector<8x1xf32>
    %c0_90 = arith.constant 0 : index
    %c3_91 = arith.constant 3 : index
    %134 = vector.load %arg9[%c0_90, %c3_91] : memref<8x4xf32, #tpu.memory_space<vmem>>, vector<8x1xf32>
    tpu.vector_store %arg9[%c0_90, %c3_91], %133 {strides = array<i32>} : memref<8x4xf32, #tpu.memory_space<vmem>>, vector<8x1xf32>,
    %c0_92 = arith.constant 0 : index
    %c24_93 = arith.constant 24 : index
    %135 = vector.load %arg10[%c0_92, %c24_93] : memref<8x128xf32, #tpu.memory_space<vmem>>, vector<8x8xf32>
    %136 = vector.broadcast %125 : vector<8x1xf32> to vector<8x8xf32>
    %137 = arith.mulf %136, %135 : vector<8x8xf32>
    %138 = arith.truncf %128 : vector<8x8xf32> to vector<8x8xbf16>
    %cst_94 = arith.constant dense<0.000000e+00> : vector<8x8xf32>
    %139 = tpu.matmul %138, %117, %cst_94 {dimension_numbers = #tpu.dot_dimension_numbers<[1], [0], [0], [1], [0, 0, 1, 1], [], []>} : vector<8x8xbf16>, vector<8x8xbf16>, vector<8x8xf32> -> vector<8x8xf32>
    %140 = arith.addf %137, %139 : vector<8x8xf32>
    %c0_95 = arith.constant 0 : index
    %c24_96 = arith.constant 24 : index
    %141 = vector.load %arg10[%c0_95, %c24_96] : memref<8x128xf32, #tpu.memory_space<vmem>>, vector<8x8xf32>
    tpu.vector_store %arg10[%c0_95, %c24_96], %140 {strides = array<i32>} : memref<8x128xf32, #tpu.memory_space<vmem>>, vector<8x8xf32>,
    %c0_97 = arith.constant 0 : index
    %c3_98 = arith.constant 3 : index
    %142 = vector.load %arg8[%c0_97, %c3_98] : memref<8x4xf32, #tpu.memory_space<vmem>>, vector<8x1xf32>
    tpu.vector_store %arg8[%c0_97, %c3_98], %123 {strides = array<i32>} : memref<8x4xf32, #tpu.memory_space<vmem>>, vector<8x1xf32>,
    %c0_i32_99 = arith.constant 0 : i32
    %143 = arith.cmpi eq, %arg2, %c0_i32_99 : i32
    %144 = arith.extui %143 : i1 to i32
    %c0_i32_100 = arith.constant 0 : i32
    %145 = arith.cmpi ne, %144, %c0_i32_100 : i32
    scf.if %145 {
      %c0_101 = arith.constant 0 : index
      %c0_102 = arith.constant 0 : index
      %146 = vector.load %arg9[%c0_101, %c0_102] : memref<8x4xf32, #tpu.memory_space<vmem>>, vector<8x1xf32>
      %147 = tpu.reciprocal %146 {approx = true} : vector<8x1xf32> -> vector<8x1xf32>
      %c0_103 = arith.constant 0 : index
      %c0_104 = arith.constant 0 : index
      %148 = vector.load %arg10[%c0_103, %c0_104] : memref<8x128xf32, #tpu.memory_space<vmem>>, vector<8x8xf32>
      %149 = vector.broadcast %147 : vector<8x1xf32> to vector<8x8xf32>
      %150 = arith.mulf %148, %149 : vector<8x8xf32>
      %c0_105 = arith.constant 0 : index
      %c0_106 = arith.constant 0 : index
      %151 = vector.load %arg10[%c0_105, %c0_106] : memref<8x128xf32, #tpu.memory_space<vmem>>, vector<8x8xf32>
      tpu.vector_store %arg10[%c0_105, %c0_106], %150 {strides = array<i32>} : memref<8x128xf32, #tpu.memory_space<vmem>>, vector<8x8xf32>,
      %c0_107 = arith.constant 0 : index
      %c1_108 = arith.constant 1 : index
      %152 = vector.load %arg9[%c0_107, %c1_108] : memref<8x4xf32, #tpu.memory_space<vmem>>, vector<8x1xf32>
      %153 = tpu.reciprocal %152 {approx = true} : vector<8x1xf32> -> vector<8x1xf32>
      %c0_109 = arith.constant 0 : index
      %c8_110 = arith.constant 8 : index
      %154 = vector.load %arg10[%c0_109, %c8_110] : memref<8x128xf32, #tpu.memory_space<vmem>>, vector<8x8xf32>
      %155 = vector.broadcast %153 : vector<8x1xf32> to vector<8x8xf32>
      %156 = arith.mulf %154, %155 : vector<8x8xf32>
      %c0_111 = arith.constant 0 : index
      %c8_112 = arith.constant 8 : index
      %157 = vector.load %arg10[%c0_111, %c8_112] : memref<8x128xf32, #tpu.memory_space<vmem>>, vector<8x8xf32>
      tpu.vector_store %arg10[%c0_111, %c8_112], %156 {strides = array<i32>} : memref<8x128xf32, #tpu.memory_space<vmem>>, vector<8x8xf32>,
      %c0_113 = arith.constant 0 : index
      %c2_114 = arith.constant 2 : index
      %158 = vector.load %arg9[%c0_113, %c2_114] : memref<8x4xf32, #tpu.memory_space<vmem>>, vector<8x1xf32>
      %159 = tpu.reciprocal %158 {approx = true} : vector<8x1xf32> -> vector<8x1xf32>
      %c0_115 = arith.constant 0 : index
      %c16_116 = arith.constant 16 : index
      %160 = vector.load %arg10[%c0_115, %c16_116] : memref<8x128xf32, #tpu.memory_space<vmem>>, vector<8x8xf32>
      %161 = vector.broadcast %159 : vector<8x1xf32> to vector<8x8xf32>
      %162 = arith.mulf %160, %161 : vector<8x8xf32>
      %c0_117 = arith.constant 0 : index
      %c16_118 = arith.constant 16 : index
      %163 = vector.load %arg10[%c0_117, %c16_118] : memref<8x128xf32, #tpu.memory_space<vmem>>, vector<8x8xf32>
      tpu.vector_store %arg10[%c0_117, %c16_118], %162 {strides = array<i32>} : memref<8x128xf32, #tpu.memory_space<vmem>>, vector<8x8xf32>,
      %c0_119 = arith.constant 0 : index
      %c3_120 = arith.constant 3 : index
      %164 = vector.load %arg9[%c0_119, %c3_120] : memref<8x4xf32, #tpu.memory_space<vmem>>, vector<8x1xf32>
      %165 = tpu.reciprocal %164 {approx = true} : vector<8x1xf32> -> vector<8x1xf32>
      %c0_121 = arith.constant 0 : index
      %c24_122 = arith.constant 24 : index
      %166 = vector.load %arg10[%c0_121, %c24_122] : memref<8x128xf32, #tpu.memory_space<vmem>>, vector<8x8xf32>
      %167 = vector.broadcast %165 : vector<8x1xf32> to vector<8x8xf32>
      %168 = arith.mulf %166, %167 : vector<8x8xf32>
      %c0_123 = arith.constant 0 : index
      %c24_124 = arith.constant 24 : index
      %169 = vector.load %arg10[%c0_123, %c24_124] : memref<8x128xf32, #tpu.memory_space<vmem>>, vector<8x8xf32>
      tpu.vector_store %arg10[%c0_123, %c24_124], %168 {strides = array<i32>} : memref<8x128xf32, #tpu.memory_space<vmem>>, vector<8x8xf32>,
      %c0_125 = arith.constant 0 : index
      %c0_126 = arith.constant 0 : index
      %170 = vector.load %arg10[%c0_125, %c0_126] : memref<8x128xf32, #tpu.memory_space<vmem>>, vector<8x128xf32>
      %171 = arith.truncf %170 : vector<8x128xf32> to vector<8x128xbf16>
      %c0_127 = arith.constant 0 : index
      %c0_128 = arith.constant 0 : index
      %c0_129 = arith.constant 0 : index
      %172 = vector.load %arg7[%c0_127, %c0_128, %c0_129] : memref<1x8x128xbf16, #tpu.memory_space<vmem>>, vector<1x8x128xbf16>
      %173 = vector.shape_cast %172 : vector<1x8x128xbf16> to vector<8x128xbf16>
      %174 = vector.shape_cast %171 : vector<8x128xbf16> to vector<1x8x128xbf16>
      tpu.vector_store %arg7[%c0_127, %c0_128, %c0_129], %174 {strides = array<i32>} : memref<1x8x128xbf16, #tpu.memory_space<vmem>>, vector<1x8x128xbf16>,
    } else {
    }
    return
  }
  func.func @transform_0(%arg0: i32, %arg1: i32, %arg2: i32) -> (i32, i32, i32) {
    %c0_i32 = arith.constant 0 : i32
    %c0_i32_0 = arith.constant 0 : i32
    return %arg0, %c0_i32, %arg2 : i32, i32, i32
  }
  func.func @transform_1(%arg0: i32, %arg1: i32, %arg2: i32) -> (i32, i32, i32) {
    %c0_i32 = arith.constant 0 : i32
    %c0_i32_0 = arith.constant 0 : i32
    return %arg0, %arg1, %c0_i32 : i32, i32, i32
  }
  func.func @transform_2(%arg0: i32, %arg1: i32, %arg2: i32) -> (i32, i32, i32) {
    %c1_i32 = arith.constant 1 : i32
    %c0_i32 = arith.constant 0 : i32
    return %arg0, %arg2, %c1_i32 : i32, i32, i32
  }
  func.func @transform_3(%arg0: i32, %arg1: i32, %arg2: i32) -> (i32, i32, i32) {
    %c2_i32 = arith.constant 2 : i32
    %c0_i32 = arith.constant 0 : i32
    return %arg0, %arg2, %c2_i32 : i32, i32, i32
  }
  func.func @transform_4(%arg0: i32, %arg1: i32, %arg2: i32) -> (i32, i32, i32) {
    %c0_i32 = arith.constant 0 : i32
    %c0_i32_0 = arith.constant 0 : i32
    return %arg0, %arg1, %c0_i32 : i32, i32, i32
  }
}

module attributes {stable_mosaic.version = 11 : i64} {
  func.func @_matmul_kernel(%arg0: i32, %arg1: i32, %arg2: i32, %arg3: memref<16x128xf32, #tpu.memory_space<vmem>>, %arg4: memref<128x128xbf16, #tpu.memory_space<vmem>>, %arg5: memref<1x128xf32, #tpu.memory_space<vmem>>, %arg6: memref<16x128xbf16, #tpu.memory_space<vmem>>, %arg7: memref<16x128xf32, #tpu.memory_space<vmem>>) attributes {dimension_semantics = [#tpu.dimension_semantics<parallel>, #tpu.dimension_semantics<parallel>, #tpu.dimension_semantics<arbitrary>], iteration_bounds = array<i64: 1, 1, 1>, scalar_prefetch = 0 : i64, scratch_operands = 1 : i64, tpu.core_type = #tpu.core_type<tc>, window_params = [{transform_indices = @transform_0, window_bounds = array<i64: 16, 128>}, {transform_indices = @transform_1, window_bounds = array<i64: 128, 128>}, {transform_indices = @transform_2, window_bounds = array<i64: 1, 128>}, {transform_indices = @transform_3, window_bounds = array<i64: 16, 128>}]} {
    %c0_i32 = arith.constant 0 : i32
    %0 = arith.cmpi eq, %arg2, %c0_i32 : i32
    %1 = arith.extui %0 : i1 to i32
    %c0_i32_0 = arith.constant 0 : i32
    %2 = arith.cmpi ne, %1, %c0_i32_0 : i32
    scf.if %2 {
      %cst_10 = arith.constant 0.000000e+00 : f32
      %13 = vector.broadcast %cst_10 : f32 to vector<16x128xf32>
      %c0_11 = arith.constant 0 : index
      %c0_12 = arith.constant 0 : index
      %14 = vector.load %arg7[%c0_11, %c0_12] : memref<16x128xf32, #tpu.memory_space<vmem>>, vector<16x128xf32>
      tpu.vector_store %arg7[%c0_11, %c0_12], %13 {strides = array<i32>} : memref<16x128xf32, #tpu.memory_space<vmem>>, vector<16x128xf32>,
    } else {
    }
    %c0 = arith.constant 0 : index
    %c0_1 = arith.constant 0 : index
    %3 = vector.load %arg7[%c0, %c0_1] : memref<16x128xf32, #tpu.memory_space<vmem>>, vector<16x128xf32>
    %c0_2 = arith.constant 0 : index
    %c0_3 = arith.constant 0 : index
    %4 = vector.load %arg3[%c0_2, %c0_3] : memref<16x128xf32, #tpu.memory_space<vmem>>, vector<16x128xf32>
    %5 = arith.truncf %4 : vector<16x128xf32> to vector<16x128xbf16>
    %c0_4 = arith.constant 0 : index
    %c0_5 = arith.constant 0 : index
    %6 = vector.load %arg4[%c0_4, %c0_5] : memref<128x128xbf16, #tpu.memory_space<vmem>>, vector<128x128xbf16>
    %cst = arith.constant dense<0.000000e+00> : vector<16x128xf32>
    %7 = tpu.matmul %5, %6, %cst {dimension_numbers = #tpu.dot_dimension_numbers<[1], [0], [0], [1], [0, 0, 1, 1], [], []>} : vector<16x128xbf16>, vector<128x128xbf16>, vector<16x128xf32> -> vector<16x128xf32>
    %8 = arith.addf %3, %7 : vector<16x128xf32>
    %c0_6 = arith.constant 0 : index
    %c0_7 = arith.constant 0 : index
    %9 = vector.load %arg7[%c0_6, %c0_7] : memref<16x128xf32, #tpu.memory_space<vmem>>, vector<16x128xf32>
    tpu.vector_store %arg7[%c0_6, %c0_7], %8 {strides = array<i32>} : memref<16x128xf32, #tpu.memory_space<vmem>>, vector<16x128xf32>,
    %c0_i32_8 = arith.constant 0 : i32
    %10 = arith.cmpi eq, %arg2, %c0_i32_8 : i32
    %11 = arith.extui %10 : i1 to i32
    %c0_i32_9 = arith.constant 0 : i32
    %12 = arith.cmpi ne, %11, %c0_i32_9 : i32
    scf.if %12 {
      %c0_10 = arith.constant 0 : index
      %c0_11 = arith.constant 0 : index
      %13 = vector.load %arg7[%c0_10, %c0_11] : memref<16x128xf32, #tpu.memory_space<vmem>>, vector<16x128xf32>
      %c0_12 = arith.constant 0 : index
      %c0_13 = arith.constant 0 : index
      %14 = vector.load %arg5[%c0_12, %c0_13] : memref<1x128xf32, #tpu.memory_space<vmem>>, vector<1x128xf32>
      %15 = vector.broadcast %14 : vector<1x128xf32> to vector<16x128xf32>
      %16 = arith.addf %13, %15 : vector<16x128xf32>
      %cst_14 = arith.constant 0.000000e+00 : f32
      %17 = vector.broadcast %cst_14 : f32 to vector<16x128xf32>
      %18 = arith.maximumf %16, %17 : vector<16x128xf32>
      %19 = arith.truncf %18 : vector<16x128xf32> to vector<16x128xbf16>
      %c0_15 = arith.constant 0 : index
      %c0_16 = arith.constant 0 : index
      %20 = vector.load %arg6[%c0_15, %c0_16] : memref<16x128xbf16, #tpu.memory_space<vmem>>, vector<16x128xbf16>
      tpu.vector_store %arg6[%c0_15, %c0_16], %19 {strides = array<i32>} : memref<16x128xbf16, #tpu.memory_space<vmem>>, vector<16x128xbf16>,
    } else {
    }
    return
  }
  func.func @transform_0(%arg0: i32, %arg1: i32, %arg2: i32) -> (i32, i32) {
    %c0_i32 = arith.constant 0 : i32
    return %arg0, %arg2 : i32, i32
  }
  func.func @transform_1(%arg0: i32, %arg1: i32, %arg2: i32) -> (i32, i32) {
    %c0_i32 = arith.constant 0 : i32
    return %arg2, %arg1 : i32, i32
  }
  func.func @transform_2(%arg0: i32, %arg1: i32, %arg2: i32) -> (i32, i32) {
    %c0_i32 = arith.constant 0 : i32
    %c0_i32_0 = arith.constant 0 : i32
    return %c0_i32, %arg1 : i32, i32
  }
  func.func @transform_3(%arg0: i32, %arg1: i32, %arg2: i32) -> (i32, i32) {
    %c0_i32 = arith.constant 0 : i32
    return %arg0, %arg1 : i32, i32
  }
}

module attributes {stable_mosaic.version = 11 : i64} {
  func.func @_matmul_kernel(%arg0: i32, %arg1: i32, %arg2: i32, %arg3: memref<16x128xf32, #tpu.memory_space<vmem>>, %arg4: memref<128x256xbf16, #tpu.memory_space<vmem>>, %arg5: memref<1x256xf32, #tpu.memory_space<vmem>>, %arg6: memref<16x256xbf16, #tpu.memory_space<vmem>>, %arg7: memref<16x256xf32, #tpu.memory_space<vmem>>) attributes {dimension_semantics = [#tpu.dimension_semantics<parallel>, #tpu.dimension_semantics<parallel>, #tpu.dimension_semantics<arbitrary>], iteration_bounds = array<i64: 1, 1, 1>, scalar_prefetch = 0 : i64, scratch_operands = 1 : i64, tpu.core_type = #tpu.core_type<tc>, window_params = [{transform_indices = @transform_0, window_bounds = array<i64: 16, 128>}, {transform_indices = @transform_1, window_bounds = array<i64: 128, 256>}, {transform_indices = @transform_2, window_bounds = array<i64: 1, 256>}, {transform_indices = @transform_3, window_bounds = array<i64: 16, 256>}]} {
    %c0_i32 = arith.constant 0 : i32
    %0 = arith.cmpi eq, %arg2, %c0_i32 : i32
    %1 = arith.extui %0 : i1 to i32
    %c0_i32_0 = arith.constant 0 : i32
    %2 = arith.cmpi ne, %1, %c0_i32_0 : i32
    scf.if %2 {
      %cst_10 = arith.constant 0.000000e+00 : f32
      %13 = vector.broadcast %cst_10 : f32 to vector<16x256xf32>
      %c0_11 = arith.constant 0 : index
      %c0_12 = arith.constant 0 : index
      %14 = vector.load %arg7[%c0_11, %c0_12] : memref<16x256xf32, #tpu.memory_space<vmem>>, vector<16x256xf32>
      tpu.vector_store %arg7[%c0_11, %c0_12], %13 {strides = array<i32>} : memref<16x256xf32, #tpu.memory_space<vmem>>, vector<16x256xf32>,
    } else {
    }
    %c0 = arith.constant 0 : index
    %c0_1 = arith.constant 0 : index
    %3 = vector.load %arg7[%c0, %c0_1] : memref<16x256xf32, #tpu.memory_space<vmem>>, vector<16x256xf32>
    %c0_2 = arith.constant 0 : index
    %c0_3 = arith.constant 0 : index
    %4 = vector.load %arg3[%c0_2, %c0_3] : memref<16x128xf32, #tpu.memory_space<vmem>>, vector<16x128xf32>
    %5 = arith.truncf %4 : vector<16x128xf32> to vector<16x128xbf16>
    %c0_4 = arith.constant 0 : index
    %c0_5 = arith.constant 0 : index
    %6 = vector.load %arg4[%c0_4, %c0_5] : memref<128x256xbf16, #tpu.memory_space<vmem>>, vector<128x256xbf16>
    %cst = arith.constant dense<0.000000e+00> : vector<16x256xf32>
    %7 = tpu.matmul %5, %6, %cst {dimension_numbers = #tpu.dot_dimension_numbers<[1], [0], [0], [1], [0, 0, 1, 1], [], []>} : vector<16x128xbf16>, vector<128x256xbf16>, vector<16x256xf32> -> vector<16x256xf32>
    %8 = arith.addf %3, %7 : vector<16x256xf32>
    %c0_6 = arith.constant 0 : index
    %c0_7 = arith.constant 0 : index
    %9 = vector.load %arg7[%c0_6, %c0_7] : memref<16x256xf32, #tpu.memory_space<vmem>>, vector<16x256xf32>
    tpu.vector_store %arg7[%c0_6, %c0_7], %8 {strides = array<i32>} : memref<16x256xf32, #tpu.memory_space<vmem>>, vector<16x256xf32>,
    %c0_i32_8 = arith.constant 0 : i32
    %10 = arith.cmpi eq, %arg2, %c0_i32_8 : i32
    %11 = arith.extui %10 : i1 to i32
    %c0_i32_9 = arith.constant 0 : i32
    %12 = arith.cmpi ne, %11, %c0_i32_9 : i32
    scf.if %12 {
      %c0_10 = arith.constant 0 : index
      %c0_11 = arith.constant 0 : index
      %13 = vector.load %arg7[%c0_10, %c0_11] : memref<16x256xf32, #tpu.memory_space<vmem>>, vector<16x256xf32>
      %c0_12 = arith.constant 0 : index
      %c0_13 = arith.constant 0 : index
      %14 = vector.load %arg5[%c0_12, %c0_13] : memref<1x256xf32, #tpu.memory_space<vmem>>, vector<1x256xf32>
      %15 = vector.broadcast %14 : vector<1x256xf32> to vector<16x256xf32>
      %16 = arith.addf %13, %15 : vector<16x256xf32>
      %17 = arith.truncf %16 : vector<16x256xf32> to vector<16x256xbf16>
      %c0_14 = arith.constant 0 : index
      %c0_15 = arith.constant 0 : index
      %18 = vector.load %arg6[%c0_14, %c0_15] : memref<16x256xbf16, #tpu.memory_space<vmem>>, vector<16x256xbf16>
      tpu.vector_store %arg6[%c0_14, %c0_15], %17 {strides = array<i32>} : memref<16x256xbf16, #tpu.memory_space<vmem>>, vector<16x256xbf16>,
    } else {
    }
    return
  }
  func.func @transform_0(%arg0: i32, %arg1: i32, %arg2: i32) -> (i32, i32) {
    %c0_i32 = arith.constant 0 : i32
    return %arg0, %arg2 : i32, i32
  }
  func.func @transform_1(%arg0: i32, %arg1: i32, %arg2: i32) -> (i32, i32) {
    %c0_i32 = arith.constant 0 : i32
    return %arg2, %arg1 : i32, i32
  }
  func.func @transform_2(%arg0: i32, %arg1: i32, %arg2: i32) -> (i32, i32) {
    %c0_i32 = arith.constant 0 : i32
    %c0_i32_0 = arith.constant 0 : i32
    return %c0_i32, %arg1 : i32, i32
  }
  func.func @transform_3(%arg0: i32, %arg1: i32, %arg2: i32) -> (i32, i32) {
    %c0_i32 = arith.constant 0 : i32
    return %arg0, %arg1 : i32, i32
  }
}

module attributes {stable_mosaic.version = 11 : i64} {
  func.func @_mha_flash_kernel(%arg0: i32, %arg1: i32, %arg2: i32, %arg3: memref<1x1x8xf32, #tpu.memory_space<vmem>>, %arg4: memref<1x8x128xbf16, #tpu.memory_space<vmem>>, %arg5: memref<1x8x128xbf16, #tpu.memory_space<vmem>>, %arg6: memref<1x8x128xbf16, #tpu.memory_space<vmem>>, %arg7: memref<1x8x128xbf16, #tpu.memory_space<vmem>>, %arg8: memref<8x4xf32, #tpu.memory_space<vmem>>, %arg9: memref<8x4xf32, #tpu.memory_space<vmem>>, %arg10: memref<8x128xf32, #tpu.memory_space<vmem>>) attributes {dimension_semantics = [#tpu.dimension_semantics<parallel>, #tpu.dimension_semantics<parallel>, #tpu.dimension_semantics<arbitrary>], iteration_bounds = array<i64: 2, 1, 1>, scalar_prefetch = 0 : i64, scratch_operands = 3 : i64, tpu.core_type = #tpu.core_type<tc>, window_params = [{transform_indices = @transform_0, window_bounds = array<i64: 1, 1, 8>}, {transform_indices = @transform_1, window_bounds = array<i64: 1, 8, 128>}, {transform_indices = @transform_2, window_bounds = array<i64: 1, 8, 128>}, {transform_indices = @transform_3, window_bounds = array<i64: 1, 8, 128>}, {transform_indices = @transform_4, window_bounds = array<i64: 1, 8, 128>}]} {
    %c0_i32 = arith.constant 0 : i32
    %0 = arith.cmpi eq, %arg2, %c0_i32 : i32
    %1 = arith.extui %0 : i1 to i32
    %c0_i32_0 = arith.constant 0 : i32
    %2 = arith.cmpi ne, %1, %c0_i32_0 : i32
    scf.if %2 {
      %cst_98 = arith.constant -1.000000e+30 : f32
      %136 = vector.broadcast %cst_98 : f32 to vector<8x4xf32>
      %c0_99 = arith.constant 0 : index
      %c0_100 = arith.constant 0 : index
      %137 = vector.load %arg8[%c0_99, %c0_100] : memref<8x4xf32, #tpu.memory_space<vmem>>, vector<8x4xf32>
      tpu.vector_store %arg8[%c0_99, %c0_100], %136 {strides = array<i32>} : memref<8x4xf32, #tpu.memory_space<vmem>>, vector<8x4xf32>,
      %cst_101 = arith.constant 0.000000e+00 : f32
      %138 = vector.broadcast %cst_101 : f32 to vector<8x4xf32>
      %c0_102 = arith.constant 0 : index
      %c0_103 = arith.constant 0 : index
      %139 = vector.load %arg9[%c0_102, %c0_103] : memref<8x4xf32, #tpu.memory_space<vmem>>, vector<8x4xf32>
      tpu.vector_store %arg9[%c0_102, %c0_103], %138 {strides = array<i32>} : memref<8x4xf32, #tpu.memory_space<vmem>>, vector<8x4xf32>,
      %cst_104 = arith.constant 0.000000e+00 : f32
      %140 = vector.broadcast %cst_104 : f32 to vector<8x128xf32>
      %c0_105 = arith.constant 0 : index
      %c0_106 = arith.constant 0 : index
      %141 = vector.load %arg10[%c0_105, %c0_106] : memref<8x128xf32, #tpu.memory_space<vmem>>, vector<8x128xf32>
      tpu.vector_store %arg10[%c0_105, %c0_106], %140 {strides = array<i32>} : memref<8x128xf32, #tpu.memory_space<vmem>>, vector<8x128xf32>,
    } else {
    }
    %c0 = arith.constant 0 : index
    %c0_1 = arith.constant 0 : index
    %c0_2 = arith.constant 0 : index
    %3 = vector.load %arg3[%c0, %c0_1, %c0_2] : memref<1x1x8xf32, #tpu.memory_space<vmem>>, vector<1x1x8xf32>
    %4 = vector.shape_cast %3 : vector<1x1x8xf32> to vector<1x8xf32>
    %c0_3 = arith.constant 0 : index
    %c0_4 = arith.constant 0 : index
    %c0_5 = arith.constant 0 : index
    %5 = vector.load %arg4[%c0_3, %c0_4, %c0_5] : memref<1x8x128xbf16, #tpu.memory_space<vmem>>, vector<1x8x8xbf16>
    %6 = vector.shape_cast %5 : vector<1x8x8xbf16> to vector<8x8xbf16>
    %c0_6 = arith.constant 0 : index
    %c0_7 = arith.constant 0 : index
    %c0_8 = arith.constant 0 : index
    %7 = vector.load %arg5[%c0_6, %c0_7, %c0_8] : memref<1x8x128xbf16, #tpu.memory_space<vmem>>, vector<1x8x8xbf16>
    %8 = vector.shape_cast %7 : vector<1x8x8xbf16> to vector<8x8xbf16>
    %c0_9 = arith.constant 0 : index
    %c0_10 = arith.constant 0 : index
    %c0_11 = arith.constant 0 : index
    %9 = vector.load %arg6[%c0_9, %c0_10, %c0_11] : memref<1x8x128xbf16, #tpu.memory_space<vmem>>, vector<1x8x8xbf16>
    %10 = vector.shape_cast %9 : vector<1x8x8xbf16> to vector<8x8xbf16>
    %cst = arith.constant dense<0.000000e+00> : vector<8x8xf32>
    %11 = tpu.matmul %6, %8, %cst {dimension_numbers = #tpu.dot_dimension_numbers<[1], [1], [0], [0], [0, 0, 1, 0], [], []>} : vector<8x8xbf16>, vector<8x8xbf16>, vector<8x8xf32> -> vector<8x8xf32>
    %12 = vector.broadcast %4 : vector<1x8xf32> to vector<8x8xf32>
    %13 = arith.addf %11, %12 : vector<8x8xf32>
    %c0_12 = arith.constant 0 : index
    %c0_13 = arith.constant 0 : index
    %14 = vector.load %arg8[%c0_12, %c0_13] : memref<8x4xf32, #tpu.memory_space<vmem>>, vector<8x1xf32>
    %cst_14 = arith.constant dense<0xFF800000> : vector<8xf32>
    %15 = vector.multi_reduction <maximumf>, %13, %cst_14 [1] : vector<8x8xf32> to vector<8xf32>
    %16 = vector.shape_cast %15 : vector<8xf32> to vector<8x1xf32>
    %17 = arith.maximumf %14, %16 : vector<8x1xf32>
    %18 = arith.subf %14, %17 : vector<8x1xf32>
    %19 = math.exp %18 : vector<8x1xf32>
    %20 = vector.broadcast %17 : vector<8x1xf32> to vector<8x8xf32>
    %21 = arith.subf %13, %20 : vector<8x8xf32>
    %22 = math.exp %21 : vector<8x8xf32>
    %c0_15 = arith.constant 0 : index
    %c0_16 = arith.constant 0 : index
    %23 = vector.load %arg9[%c0_15, %c0_16] : memref<8x4xf32, #tpu.memory_space<vmem>>, vector<8x1xf32>
    %24 = arith.mulf %19, %23 : vector<8x1xf32>
    %cst_17 = arith.constant dense<0.000000e+00> : vector<8xf32>
    %25 = vector.multi_reduction <add>, %22, %cst_17 [1] : vector<8x8xf32> to vector<8xf32>
    %26 = vector.shape_cast %25 : vector<8xf32> to vector<8x1xf32>
    %27 = arith.addf %24, %26 : vector<8x1xf32>
    %c0_18 = arith.constant 0 : index
    %c0_19 = arith.constant 0 : index
    %28 = vector.load %arg9[%c0_18, %c0_19] : memref<8x4xf32, #tpu.memory_space<vmem>>, vector<8x1xf32>
    tpu.vector_store %arg9[%c0_18, %c0_19], %27 {strides = array<i32>} : memref<8x4xf32, #tpu.memory_space<vmem>>, vector<8x1xf32>,
    %c0_20 = arith.constant 0 : index
    %c0_21 = arith.constant 0 : index
    %29 = vector.load %arg10[%c0_20, %c0_21] : memref<8x128xf32, #tpu.memory_space<vmem>>, vector<8x8xf32>
    %30 = vector.broadcast %19 : vector<8x1xf32> to vector<8x8xf32>
    %31 = arith.mulf %30, %29 : vector<8x8xf32>
    %32 = arith.truncf %22 : vector<8x8xf32> to vector<8x8xbf16>
    %cst_22 = arith.constant dense<0.000000e+00> : vector<8x8xf32>
    %33 = tpu.matmul %32, %10, %cst_22 {dimension_numbers = #tpu.dot_dimension_numbers<[1], [0], [0], [1], [0, 0, 1, 1], [], []>} : vector<8x8xbf16>, vector<8x8xbf16>, vector<8x8xf32> -> vector<8x8xf32>
    %34 = arith.addf %31, %33 : vector<8x8xf32>
    %c0_23 = arith.constant 0 : index
    %c0_24 = arith.constant 0 : index
    %35 = vector.load %arg10[%c0_23, %c0_24] : memref<8x128xf32, #tpu.memory_space<vmem>>, vector<8x8xf32>
    tpu.vector_store %arg10[%c0_23, %c0_24], %34 {strides = array<i32>} : memref<8x128xf32, #tpu.memory_space<vmem>>, vector<8x8xf32>,
    %c0_25 = arith.constant 0 : index
    %c0_26 = arith.constant 0 : index
    %36 = vector.load %arg8[%c0_25, %c0_26] : memref<8x4xf32, #tpu.memory_space<vmem>>, vector<8x1xf32>
    tpu.vector_store %arg8[%c0_25, %c0_26], %17 {strides = array<i32>} : memref<8x4xf32, #tpu.memory_space<vmem>>, vector<8x1xf32>,
    %c0_27 = arith.constant 0 : index
    %c0_28 = arith.constant 0 : index
    %c8 = arith.constant 8 : index
    %37 = vector.load %arg4[%c0_27, %c0_28, %c8] : memref<1x8x128xbf16, #tpu.memory_space<vmem>>, vector<1x8x8xbf16>
    %38 = vector.shape_cast %37 : vector<1x8x8xbf16> to vector<8x8xbf16>
    %c0_29 = arith.constant 0 : index
    %c0_30 = arith.constant 0 : index
    %c8_31 = arith.constant 8 : index
    %39 = vector.load %arg5[%c0_29, %c0_30, %c8_31] : memref<1x8x128xbf16, #tpu.memory_space<vmem>>, vector<1x8x8xbf16>
    %40 = vector.shape_cast %39 : vector<1x8x8xbf16> to vector<8x8xbf16>
    %c0_32 = arith.constant 0 : index
    %c0_33 = arith.constant 0 : index
    %c8_34 = arith.constant 8 : index
    %41 = vector.load %arg6[%c0_32, %c0_33, %c8_34] : memref<1x8x128xbf16, #tpu.memory_space<vmem>>, vector<1x8x8xbf16>
    %42 = vector.shape_cast %41 : vector<1x8x8xbf16> to vector<8x8xbf16>
    %cst_35 = arith.constant dense<0.000000e+00> : vector<8x8xf32>
    %43 = tpu.matmul %38, %40, %cst_35 {dimension_numbers = #tpu.dot_dimension_numbers<[1], [1], [0], [0], [0, 0, 1, 0], [], []>} : vector<8x8xbf16>, vector<8x8xbf16>, vector<8x8xf32> -> vector<8x8xf32>
    %44 = vector.broadcast %4 : vector<1x8xf32> to vector<8x8xf32>
    %45 = arith.addf %43, %44 : vector<8x8xf32>
    %c0_36 = arith.constant 0 : index
    %c1 = arith.constant 1 : index
    %46 = vector.load %arg8[%c0_36, %c1] : memref<8x4xf32, #tpu.memory_space<vmem>>, vector<8x1xf32>
    %cst_37 = arith.constant dense<0xFF800000> : vector<8xf32>
    %47 = vector.multi_reduction <maximumf>, %45, %cst_37 [1] : vector<8x8xf32> to vector<8xf32>
    %48 = vector.shape_cast %47 : vector<8xf32> to vector<8x1xf32>
    %49 = arith.maximumf %46, %48 : vector<8x1xf32>
    %50 = arith.subf %46, %49 : vector<8x1xf32>
    %51 = math.exp %50 : vector<8x1xf32>
    %52 = vector.broadcast %49 : vector<8x1xf32> to vector<8x8xf32>
    %53 = arith.subf %45, %52 : vector<8x8xf32>
    %54 = math.exp %53 : vector<8x8xf32>
    %c0_38 = arith.constant 0 : index
    %c1_39 = arith.constant 1 : index
    %55 = vector.load %arg9[%c0_38, %c1_39] : memref<8x4xf32, #tpu.memory_space<vmem>>, vector<8x1xf32>
    %56 = arith.mulf %51, %55 : vector<8x1xf32>
    %cst_40 = arith.constant dense<0.000000e+00> : vector<8xf32>
    %57 = vector.multi_reduction <add>, %54, %cst_40 [1] : vector<8x8xf32> to vector<8xf32>
    %58 = vector.shape_cast %57 : vector<8xf32> to vector<8x1xf32>
    %59 = arith.addf %56, %58 : vector<8x1xf32>
    %c0_41 = arith.constant 0 : index
    %c1_42 = arith.constant 1 : index
    %60 = vector.load %arg9[%c0_41, %c1_42] : memref<8x4xf32, #tpu.memory_space<vmem>>, vector<8x1xf32>
    tpu.vector_store %arg9[%c0_41, %c1_42], %59 {strides = array<i32>} : memref<8x4xf32, #tpu.memory_space<vmem>>, vector<8x1xf32>,
    %c0_43 = arith.constant 0 : index
    %c8_44 = arith.constant 8 : index
    %61 = vector.load %arg10[%c0_43, %c8_44] : memref<8x128xf32, #tpu.memory_space<vmem>>, vector<8x8xf32>
    %62 = vector.broadcast %51 : vector<8x1xf32> to vector<8x8xf32>
    %63 = arith.mulf %62, %61 : vector<8x8xf32>
    %64 = arith.truncf %54 : vector<8x8xf32> to vector<8x8xbf16>
    %cst_45 = arith.constant dense<0.000000e+00> : vector<8x8xf32>
    %65 = tpu.matmul %64, %42, %cst_45 {dimension_numbers = #tpu.dot_dimension_numbers<[1], [0], [0], [1], [0, 0, 1, 1], [], []>} : vector<8x8xbf16>, vector<8x8xbf16>, vector<8x8xf32> -> vector<8x8xf32>
    %66 = arith.addf %63, %65 : vector<8x8xf32>
    %c0_46 = arith.constant 0 : index
    %c8_47 = arith.constant 8 : index
    %67 = vector.load %arg10[%c0_46, %c8_47] : memref<8x128xf32, #tpu.memory_space<vmem>>, vector<8x8xf32>
    tpu.vector_store %arg10[%c0_46, %c8_47], %66 {strides = array<i32>} : memref<8x128xf32, #tpu.memory_space<vmem>>, vector<8x8xf32>,
    %c0_48 = arith.constant 0 : index
    %c1_49 = arith.constant 1 : index
    %68 = vector.load %arg8[%c0_48, %c1_49] : memref<8x4xf32, #tpu.memory_space<vmem>>, vector<8x1xf32>
    tpu.vector_store %arg8[%c0_48, %c1_49], %49 {strides = array<i32>} : memref<8x4xf32, #tpu.memory_space<vmem>>, vector<8x1xf32>,
    %c0_50 = arith.constant 0 : index
    %c0_51 = arith.constant 0 : index
    %c16 = arith.constant 16 : index
    %69 = vector.load %arg4[%c0_50, %c0_51, %c16] : memref<1x8x128xbf16, #tpu.memory_space<vmem>>, vector<1x8x8xbf16>
    %70 = vector.shape_cast %69 : vector<1x8x8xbf16> to vector<8x8xbf16>
    %c0_52 = arith.constant 0 : index
    %c0_53 = arith.constant 0 : index
    %c16_54 = arith.constant 16 : index
    %71 = vector.load %arg5[%c0_52, %c0_53, %c16_54] : memref<1x8x128xbf16, #tpu.memory_space<vmem>>, vector<1x8x8xbf16>
    %72 = vector.shape_cast %71 : vector<1x8x8xbf16> to vector<8x8xbf16>
    %c0_55 = arith.constant 0 : index
    %c0_56 = arith.constant 0 : index
    %c16_57 = arith.constant 16 : index
    %73 = vector.load %arg6[%c0_55, %c0_56, %c16_57] : memref<1x8x128xbf16, #tpu.memory_space<vmem>>, vector<1x8x8xbf16>
    %74 = vector.shape_cast %73 : vector<1x8x8xbf16> to vector<8x8xbf16>
    %cst_58 = arith.constant dense<0.000000e+00> : vector<8x8xf32>
    %75 = tpu.matmul %70, %72, %cst_58 {dimension_numbers = #tpu.dot_dimension_numbers<[1], [1], [0], [0], [0, 0, 1, 0], [], []>} : vector<8x8xbf16>, vector<8x8xbf16>, vector<8x8xf32> -> vector<8x8xf32>
    %76 = vector.broadcast %4 : vector<1x8xf32> to vector<8x8xf32>
    %77 = arith.addf %75, %76 : vector<8x8xf32>
    %c0_59 = arith.constant 0 : index
    %c2 = arith.constant 2 : index
    %78 = vector.load %arg8[%c0_59, %c2] : memref<8x4xf32, #tpu.memory_space<vmem>>, vector<8x1xf32>
    %cst_60 = arith.constant dense<0xFF800000> : vector<8xf32>
    %79 = vector.multi_reduction <maximumf>, %77, %cst_60 [1] : vector<8x8xf32> to vector<8xf32>
    %80 = vector.shape_cast %79 : vector<8xf32> to vector<8x1xf32>
    %81 = arith.maximumf %78, %80 : vector<8x1xf32>
    %82 = arith.subf %78, %81 : vector<8x1xf32>
    %83 = math.exp %82 : vector<8x1xf32>
    %84 = vector.broadcast %81 : vector<8x1xf32> to vector<8x8xf32>
    %85 = arith.subf %77, %84 : vector<8x8xf32>
    %86 = math.exp %85 : vector<8x8xf32>
    %c0_61 = arith.constant 0 : index
    %c2_62 = arith.constant 2 : index
    %87 = vector.load %arg9[%c0_61, %c2_62] : memref<8x4xf32, #tpu.memory_space<vmem>>, vector<8x1xf32>
    %88 = arith.mulf %83, %87 : vector<8x1xf32>
    %cst_63 = arith.constant dense<0.000000e+00> : vector<8xf32>
    %89 = vector.multi_reduction <add>, %86, %cst_63 [1] : vector<8x8xf32> to vector<8xf32>
    %90 = vector.shape_cast %89 : vector<8xf32> to vector<8x1xf32>
    %91 = arith.addf %88, %90 : vector<8x1xf32>
    %c0_64 = arith.constant 0 : index
    %c2_65 = arith.constant 2 : index
    %92 = vector.load %arg9[%c0_64, %c2_65] : memref<8x4xf32, #tpu.memory_space<vmem>>, vector<8x1xf32>
    tpu.vector_store %arg9[%c0_64, %c2_65], %91 {strides = array<i32>} : memref<8x4xf32, #tpu.memory_space<vmem>>, vector<8x1xf32>,
    %c0_66 = arith.constant 0 : index
    %c16_67 = arith.constant 16 : index
    %93 = vector.load %arg10[%c0_66, %c16_67] : memref<8x128xf32, #tpu.memory_space<vmem>>, vector<8x8xf32>
    %94 = vector.broadcast %83 : vector<8x1xf32> to vector<8x8xf32>
    %95 = arith.mulf %94, %93 : vector<8x8xf32>
    %96 = arith.truncf %86 : vector<8x8xf32> to vector<8x8xbf16>
    %cst_68 = arith.constant dense<0.000000e+00> : vector<8x8xf32>
    %97 = tpu.matmul %96, %74, %cst_68 {dimension_numbers = #tpu.dot_dimension_numbers<[1], [0], [0], [1], [0, 0, 1, 1], [], []>} : vector<8x8xbf16>, vector<8x8xbf16>, vector<8x8xf32> -> vector<8x8xf32>
    %98 = arith.addf %95, %97 : vector<8x8xf32>
    %c0_69 = arith.constant 0 : index
    %c16_70 = arith.constant 16 : index
    %99 = vector.load %arg10[%c0_69, %c16_70] : memref<8x128xf32, #tpu.memory_space<vmem>>, vector<8x8xf32>
    tpu.vector_store %arg10[%c0_69, %c16_70], %98 {strides = array<i32>} : memref<8x128xf32, #tpu.memory_space<vmem>>, vector<8x8xf32>,
    %c0_71 = arith.constant 0 : index
    %c2_72 = arith.constant 2 : index
    %100 = vector.load %arg8[%c0_71, %c2_72] : memref<8x4xf32, #tpu.memory_space<vmem>>, vector<8x1xf32>
    tpu.vector_store %arg8[%c0_71, %c2_72], %81 {strides = array<i32>} : memref<8x4xf32, #tpu.memory_space<vmem>>, vector<8x1xf32>,
    %c0_73 = arith.constant 0 : index
    %c0_74 = arith.constant 0 : index
    %c24 = arith.constant 24 : index
    %101 = vector.load %arg4[%c0_73, %c0_74, %c24] : memref<1x8x128xbf16, #tpu.memory_space<vmem>>, vector<1x8x8xbf16>
    %102 = vector.shape_cast %101 : vector<1x8x8xbf16> to vector<8x8xbf16>
    %c0_75 = arith.constant 0 : index
    %c0_76 = arith.constant 0 : index
    %c24_77 = arith.constant 24 : index
    %103 = vector.load %arg5[%c0_75, %c0_76, %c24_77] : memref<1x8x128xbf16, #tpu.memory_space<vmem>>, vector<1x8x8xbf16>
    %104 = vector.shape_cast %103 : vector<1x8x8xbf16> to vector<8x8xbf16>
    %c0_78 = arith.constant 0 : index
    %c0_79 = arith.constant 0 : index
    %c24_80 = arith.constant 24 : index
    %105 = vector.load %arg6[%c0_78, %c0_79, %c24_80] : memref<1x8x128xbf16, #tpu.memory_space<vmem>>, vector<1x8x8xbf16>
    %106 = vector.shape_cast %105 : vector<1x8x8xbf16> to vector<8x8xbf16>
    %cst_81 = arith.constant dense<0.000000e+00> : vector<8x8xf32>
    %107 = tpu.matmul %102, %104, %cst_81 {dimension_numbers = #tpu.dot_dimension_numbers<[1], [1], [0], [0], [0, 0, 1, 0], [], []>} : vector<8x8xbf16>, vector<8x8xbf16>, vector<8x8xf32> -> vector<8x8xf32>
    %108 = vector.broadcast %4 : vector<1x8xf32> to vector<8x8xf32>
    %109 = arith.addf %107, %108 : vector<8x8xf32>
    %c0_82 = arith.constant 0 : index
    %c3 = arith.constant 3 : index
    %110 = vector.load %arg8[%c0_82, %c3] : memref<8x4xf32, #tpu.memory_space<vmem>>, vector<8x1xf32>
    %cst_83 = arith.constant dense<0xFF800000> : vector<8xf32>
    %111 = vector.multi_reduction <maximumf>, %109, %cst_83 [1] : vector<8x8xf32> to vector<8xf32>
    %112 = vector.shape_cast %111 : vector<8xf32> to vector<8x1xf32>
    %113 = arith.maximumf %110, %112 : vector<8x1xf32>
    %114 = arith.subf %110, %113 : vector<8x1xf32>
    %115 = math.exp %114 : vector<8x1xf32>
    %116 = vector.broadcast %113 : vector<8x1xf32> to vector<8x8xf32>
    %117 = arith.subf %109, %116 : vector<8x8xf32>
    %118 = math.exp %117 : vector<8x8xf32>
    %c0_84 = arith.constant 0 : index
    %c3_85 = arith.constant 3 : index
    %119 = vector.load %arg9[%c0_84, %c3_85] : memref<8x4xf32, #tpu.memory_space<vmem>>, vector<8x1xf32>
    %120 = arith.mulf %115, %119 : vector<8x1xf32>
    %cst_86 = arith.constant dense<0.000000e+00> : vector<8xf32>
    %121 = vector.multi_reduction <add>, %118, %cst_86 [1] : vector<8x8xf32> to vector<8xf32>
    %122 = vector.shape_cast %121 : vector<8xf32> to vector<8x1xf32>
    %123 = arith.addf %120, %122 : vector<8x1xf32>
    %c0_87 = arith.constant 0 : index
    %c3_88 = arith.constant 3 : index
    %124 = vector.load %arg9[%c0_87, %c3_88] : memref<8x4xf32, #tpu.memory_space<vmem>>, vector<8x1xf32>
    tpu.vector_store %arg9[%c0_87, %c3_88], %123 {strides = array<i32>} : memref<8x4xf32, #tpu.memory_space<vmem>>, vector<8x1xf32>,
    %c0_89 = arith.constant 0 : index
    %c24_90 = arith.constant 24 : index
    %125 = vector.load %arg10[%c0_89, %c24_90] : memref<8x128xf32, #tpu.memory_space<vmem>>, vector<8x8xf32>
    %126 = vector.broadcast %115 : vector<8x1xf32> to vector<8x8xf32>
    %127 = arith.mulf %126, %125 : vector<8x8xf32>
    %128 = arith.truncf %118 : vector<8x8xf32> to vector<8x8xbf16>
    %cst_91 = arith.constant dense<0.000000e+00> : vector<8x8xf32>
    %129 = tpu.matmul %128, %106, %cst_91 {dimension_numbers = #tpu.dot_dimension_numbers<[1], [0], [0], [1], [0, 0, 1, 1], [], []>} : vector<8x8xbf16>, vector<8x8xbf16>, vector<8x8xf32> -> vector<8x8xf32>
    %130 = arith.addf %127, %129 : vector<8x8xf32>
    %c0_92 = arith.constant 0 : index
    %c24_93 = arith.constant 24 : index
    %131 = vector.load %arg10[%c0_92, %c24_93] : memref<8x128xf32, #tpu.memory_space<vmem>>, vector<8x8xf32>
    tpu.vector_store %arg10[%c0_92, %c24_93], %130 {strides = array<i32>} : memref<8x128xf32, #tpu.memory_space<vmem>>, vector<8x8xf32>,
    %c0_94 = arith.constant 0 : index
    %c3_95 = arith.constant 3 : index
    %132 = vector.load %arg8[%c0_94, %c3_95] : memref<8x4xf32, #tpu.memory_space<vmem>>, vector<8x1xf32>
    tpu.vector_store %arg8[%c0_94, %c3_95], %113 {strides = array<i32>} : memref<8x4xf32, #tpu.memory_space<vmem>>, vector<8x1xf32>,
    %c0_i32_96 = arith.constant 0 : i32
    %133 = arith.cmpi eq, %arg2, %c0_i32_96 : i32
    %134 = arith.extui %133 : i1 to i32
    %c0_i32_97 = arith.constant 0 : i32
    %135 = arith.cmpi ne, %134, %c0_i32_97 : i32
    scf.if %135 {
      %c0_98 = arith.constant 0 : index
      %c0_99 = arith.constant 0 : index
      %136 = vector.load %arg9[%c0_98, %c0_99] : memref<8x4xf32, #tpu.memory_space<vmem>>, vector<8x1xf32>
      %137 = tpu.reciprocal %136 {approx = true} : vector<8x1xf32> -> vector<8x1xf32>
      %c0_100 = arith.constant 0 : index
      %c0_101 = arith.constant 0 : index
      %138 = vector.load %arg10[%c0_100, %c0_101] : memref<8x128xf32, #tpu.memory_space<vmem>>, vector<8x8xf32>
      %139 = vector.broadcast %137 : vector<8x1xf32> to vector<8x8xf32>
      %140 = arith.mulf %138, %139 : vector<8x8xf32>
      %c0_102 = arith.constant 0 : index
      %c0_103 = arith.constant 0 : index
      %141 = vector.load %arg10[%c0_102, %c0_103] : memref<8x128xf32, #tpu.memory_space<vmem>>, vector<8x8xf32>
      tpu.vector_store %arg10[%c0_102, %c0_103], %140 {strides = array<i32>} : memref<8x128xf32, #tpu.memory_space<vmem>>, vector<8x8xf32>,
      %c0_104 = arith.constant 0 : index
      %c1_105 = arith.constant 1 : index
      %142 = vector.load %arg9[%c0_104, %c1_105] : memref<8x4xf32, #tpu.memory_space<vmem>>, vector<8x1xf32>
      %143 = tpu.reciprocal %142 {approx = true} : vector<8x1xf32> -> vector<8x1xf32>
      %c0_106 = arith.constant 0 : index
      %c8_107 = arith.constant 8 : index
      %144 = vector.load %arg10[%c0_106, %c8_107] : memref<8x128xf32, #tpu.memory_space<vmem>>, vector<8x8xf32>
      %145 = vector.broadcast %143 : vector<8x1xf32> to vector<8x8xf32>
      %146 = arith.mulf %144, %145 : vector<8x8xf32>
      %c0_108 = arith.constant 0 : index
      %c8_109 = arith.constant 8 : index
      %147 = vector.load %arg10[%c0_108, %c8_109] : memref<8x128xf32, #tpu.memory_space<vmem>>, vector<8x8xf32>
      tpu.vector_store %arg10[%c0_108, %c8_109], %146 {strides = array<i32>} : memref<8x128xf32, #tpu.memory_space<vmem>>, vector<8x8xf32>,
      %c0_110 = arith.constant 0 : index
      %c2_111 = arith.constant 2 : index
      %148 = vector.load %arg9[%c0_110, %c2_111] : memref<8x4xf32, #tpu.memory_space<vmem>>, vector<8x1xf32>
      %149 = tpu.reciprocal %148 {approx = true} : vector<8x1xf32> -> vector<8x1xf32>
      %c0_112 = arith.constant 0 : index
      %c16_113 = arith.constant 16 : index
      %150 = vector.load %arg10[%c0_112, %c16_113] : memref<8x128xf32, #tpu.memory_space<vmem>>, vector<8x8xf32>
      %151 = vector.broadcast %149 : vector<8x1xf32> to vector<8x8xf32>
      %152 = arith.mulf %150, %151 : vector<8x8xf32>
      %c0_114 = arith.constant 0 : index
      %c16_115 = arith.constant 16 : index
      %153 = vector.load %arg10[%c0_114, %c16_115] : memref<8x128xf32, #tpu.memory_space<vmem>>, vector<8x8xf32>
      tpu.vector_store %arg10[%c0_114, %c16_115], %152 {strides = array<i32>} : memref<8x128xf32, #tpu.memory_space<vmem>>, vector<8x8xf32>,
      %c0_116 = arith.constant 0 : index
      %c3_117 = arith.constant 3 : index
      %154 = vector.load %arg9[%c0_116, %c3_117] : memref<8x4xf32, #tpu.memory_space<vmem>>, vector<8x1xf32>
      %155 = tpu.reciprocal %154 {approx = true} : vector<8x1xf32> -> vector<8x1xf32>
      %c0_118 = arith.constant 0 : index
      %c24_119 = arith.constant 24 : index
      %156 = vector.load %arg10[%c0_118, %c24_119] : memref<8x128xf32, #tpu.memory_space<vmem>>, vector<8x8xf32>
      %157 = vector.broadcast %155 : vector<8x1xf32> to vector<8x8xf32>
      %158 = arith.mulf %156, %157 : vector<8x8xf32>
      %c0_120 = arith.constant 0 : index
      %c24_121 = arith.constant 24 : index
      %159 = vector.load %arg10[%c0_120, %c24_121] : memref<8x128xf32, #tpu.memory_space<vmem>>, vector<8x8xf32>
      tpu.vector_store %arg10[%c0_120, %c24_121], %158 {strides = array<i32>} : memref<8x128xf32, #tpu.memory_space<vmem>>, vector<8x8xf32>,
      %c0_122 = arith.constant 0 : index
      %c0_123 = arith.constant 0 : index
      %160 = vector.load %arg10[%c0_122, %c0_123] : memref<8x128xf32, #tpu.memory_space<vmem>>, vector<8x128xf32>
      %161 = arith.truncf %160 : vector<8x128xf32> to vector<8x128xbf16>
      %c0_124 = arith.constant 0 : index
      %c0_125 = arith.constant 0 : index
      %c0_126 = arith.constant 0 : index
      %162 = vector.load %arg7[%c0_124, %c0_125, %c0_126] : memref<1x8x128xbf16, #tpu.memory_space<vmem>>, vector<1x8x128xbf16>
      %163 = vector.shape_cast %162 : vector<1x8x128xbf16> to vector<8x128xbf16>
      %164 = vector.shape_cast %161 : vector<8x128xbf16> to vector<1x8x128xbf16>
      tpu.vector_store %arg7[%c0_124, %c0_125, %c0_126], %164 {strides = array<i32>} : memref<1x8x128xbf16, #tpu.memory_space<vmem>>, vector<1x8x128xbf16>,
    } else {
    }
    return
  }
  func.func @transform_0(%arg0: i32, %arg1: i32, %arg2: i32) -> (i32, i32, i32) {
    %c0_i32 = arith.constant 0 : i32
    %c0_i32_0 = arith.constant 0 : i32
    return %arg0, %c0_i32, %arg2 : i32, i32, i32
  }
  func.func @transform_1(%arg0: i32, %arg1: i32, %arg2: i32) -> (i32, i32, i32) {
    %c0_i32 = arith.constant 0 : i32
    %c0_i32_0 = arith.constant 0 : i32
    return %arg0, %arg1, %c0_i32 : i32, i32, i32
  }
  func.func @transform_2(%arg0: i32, %arg1: i32, %arg2: i32) -> (i32, i32, i32) {
    %c1_i32 = arith.constant 1 : i32
    %c0_i32 = arith.constant 0 : i32
    return %arg0, %arg2, %c1_i32 : i32, i32, i32
  }
  func.func @transform_3(%arg0: i32, %arg1: i32, %arg2: i32) -> (i32, i32, i32) {
    %c2_i32 = arith.constant 2 : i32
    %c0_i32 = arith.constant 0 : i32
    return %arg0, %arg2, %c2_i32 : i32, i32, i32
  }
  func.func @transform_4(%arg0: i32, %arg1: i32, %arg2: i32) -> (i32, i32, i32) {
    %c0_i32 = arith.constant 0 : i32
    %c0_i32_0 = arith.constant 0 : i32
    return %arg0, %arg1, %c0_i32 : i32, i32, i32
  }
}

module attributes {stable_mosaic.version = 11 : i64} {
  func.func @_mha_flash_kernel(%arg0: i32, %arg1: i32, %arg2: i32, %arg3: memref<1x1x8xf32, #tpu.memory_space<vmem>>, %arg4: memref<1x8x128xbf16, #tpu.memory_space<vmem>>, %arg5: memref<1x8x128xbf16, #tpu.memory_space<vmem>>, %arg6: memref<1x8x128xbf16, #tpu.memory_space<vmem>>, %arg7: memref<1x8x128xbf16, #tpu.memory_space<vmem>>, %arg8: memref<8x4xf32, #tpu.memory_space<vmem>>, %arg9: memref<8x4xf32, #tpu.memory_space<vmem>>, %arg10: memref<8x128xf32, #tpu.memory_space<vmem>>) attributes {dimension_semantics = [#tpu.dimension_semantics<parallel>, #tpu.dimension_semantics<parallel>, #tpu.dimension_semantics<arbitrary>], iteration_bounds = array<i64: 2, 1, 1>, scalar_prefetch = 0 : i64, scratch_operands = 3 : i64, tpu.core_type = #tpu.core_type<tc>, window_params = [{transform_indices = @transform_0, window_bounds = array<i64: 1, 1, 8>}, {transform_indices = @transform_1, window_bounds = array<i64: 1, 8, 128>}, {transform_indices = @transform_2, window_bounds = array<i64: 1, 8, 128>}, {transform_indices = @transform_3, window_bounds = array<i64: 1, 8, 128>}, {transform_indices = @transform_4, window_bounds = array<i64: 1, 8, 128>}]} {
    %c0_i32 = arith.constant 0 : i32
    %0 = arith.cmpi eq, %arg2, %c0_i32 : i32
    %1 = arith.extui %0 : i1 to i32
    %c0_i32_0 = arith.constant 0 : i32
    %2 = arith.cmpi ne, %1, %c0_i32_0 : i32
    scf.if %2 {
      %cst_98 = arith.constant -1.000000e+30 : f32
      %136 = vector.broadcast %cst_98 : f32 to vector<8x4xf32>
      %c0_99 = arith.constant 0 : index
      %c0_100 = arith.constant 0 : index
      %137 = vector.load %arg8[%c0_99, %c0_100] : memref<8x4xf32, #tpu.memory_space<vmem>>, vector<8x4xf32>
      tpu.vector_store %arg8[%c0_99, %c0_100], %136 {strides = array<i32>} : memref<8x4xf32, #tpu.memory_space<vmem>>, vector<8x4xf32>,
      %cst_101 = arith.constant 0.000000e+00 : f32
      %138 = vector.broadcast %cst_101 : f32 to vector<8x4xf32>
      %c0_102 = arith.constant 0 : index
      %c0_103 = arith.constant 0 : index
      %139 = vector.load %arg9[%c0_102, %c0_103] : memref<8x4xf32, #tpu.memory_space<vmem>>, vector<8x4xf32>
      tpu.vector_store %arg9[%c0_102, %c0_103], %138 {strides = array<i32>} : memref<8x4xf32, #tpu.memory_space<vmem>>, vector<8x4xf32>,
      %cst_104 = arith.constant 0.000000e+00 : f32
      %140 = vector.broadcast %cst_104 : f32 to vector<8x128xf32>
      %c0_105 = arith.constant 0 : index
      %c0_106 = arith.constant 0 : index
      %141 = vector.load %arg10[%c0_105, %c0_106] : memref<8x128xf32, #tpu.memory_space<vmem>>, vector<8x128xf32>
      tpu.vector_store %arg10[%c0_105, %c0_106], %140 {strides = array<i32>} : memref<8x128xf32, #tpu.memory_space<vmem>>, vector<8x128xf32>,
    } else {
    }
    %c0 = arith.constant 0 : index
    %c0_1 = arith.constant 0 : index
    %c0_2 = arith.constant 0 : index
    %3 = vector.load %arg3[%c0, %c0_1, %c0_2] : memref<1x1x8xf32, #tpu.memory_space<vmem>>, vector<1x1x8xf32>
    %4 = vector.shape_cast %3 : vector<1x1x8xf32> to vector<1x8xf32>
    %c0_3 = arith.constant 0 : index
    %c0_4 = arith.constant 0 : index
    %c0_5 = arith.constant 0 : index
    %5 = vector.load %arg4[%c0_3, %c0_4, %c0_5] : memref<1x8x128xbf16, #tpu.memory_space<vmem>>, vector<1x8x8xbf16>
    %6 = vector.shape_cast %5 : vector<1x8x8xbf16> to vector<8x8xbf16>
    %c0_6 = arith.constant 0 : index
    %c0_7 = arith.constant 0 : index
    %c0_8 = arith.constant 0 : index
    %7 = vector.load %arg5[%c0_6, %c0_7, %c0_8] : memref<1x8x128xbf16, #tpu.memory_space<vmem>>, vector<1x8x8xbf16>
    %8 = vector.shape_cast %7 : vector<1x8x8xbf16> to vector<8x8xbf16>
    %c0_9 = arith.constant 0 : index
    %c0_10 = arith.constant 0 : index
    %c0_11 = arith.constant 0 : index
    %9 = vector.load %arg6[%c0_9, %c0_10, %c0_11] : memref<1x8x128xbf16, #tpu.memory_space<vmem>>, vector<1x8x8xbf16>
    %10 = vector.shape_cast %9 : vector<1x8x8xbf16> to vector<8x8xbf16>
    %cst = arith.constant dense<0.000000e+00> : vector<8x8xf32>
    %11 = tpu.matmul %6, %8, %cst {dimension_numbers = #tpu.dot_dimension_numbers<[1], [1], [0], [0], [0, 0, 1, 0], [], []>} : vector<8x8xbf16>, vector<8x8xbf16>, vector<8x8xf32> -> vector<8x8xf32>
    %12 = vector.broadcast %4 : vector<1x8xf32> to vector<8x8xf32>
    %13 = arith.addf %11, %12 : vector<8x8xf32>
    %c0_12 = arith.constant 0 : index
    %c0_13 = arith.constant 0 : index
    %14 = vector.load %arg8[%c0_12, %c0_13] : memref<8x4xf32, #tpu.memory_space<vmem>>, vector<8x1xf32>
    %cst_14 = arith.constant dense<0xFF800000> : vector<8xf32>
    %15 = vector.multi_reduction <maximumf>, %13, %cst_14 [1] : vector<8x8xf32> to vector<8xf32>
    %16 = vector.shape_cast %15 : vector<8xf32> to vector<8x1xf32>
    %17 = arith.maximumf %14, %16 : vector<8x1xf32>
    %18 = arith.subf %14, %17 : vector<8x1xf32>
    %19 = math.exp %18 : vector<8x1xf32>
    %20 = vector.broadcast %17 : vector<8x1xf32> to vector<8x8xf32>
    %21 = arith.subf %13, %20 : vector<8x8xf32>
    %22 = math.exp %21 : vector<8x8xf32>
    %c0_15 = arith.constant 0 : index
    %c0_16 = arith.constant 0 : index
    %23 = vector.load %arg9[%c0_15, %c0_16] : memref<8x4xf32, #tpu.memory_space<vmem>>, vector<8x1xf32>
    %24 = arith.mulf %19, %23 : vector<8x1xf32>
    %cst_17 = arith.constant dense<0.000000e+00> : vector<8xf32>
    %25 = vector.multi_reduction <add>, %22, %cst_17 [1] : vector<8x8xf32> to vector<8xf32>
    %26 = vector.shape_cast %25 : vector<8xf32> to vector<8x1xf32>
    %27 = arith.addf %24, %26 : vector<8x1xf32>
    %c0_18 = arith.constant 0 : index
    %c0_19 = arith.constant 0 : index
    %28 = vector.load %arg9[%c0_18, %c0_19] : memref<8x4xf32, #tpu.memory_space<vmem>>, vector<8x1xf32>
    tpu.vector_store %arg9[%c0_18, %c0_19], %27 {strides = array<i32>} : memref<8x4xf32, #tpu.memory_space<vmem>>, vector<8x1xf32>,
    %c0_20 = arith.constant 0 : index
    %c0_21 = arith.constant 0 : index
    %29 = vector.load %arg10[%c0_20, %c0_21] : memref<8x128xf32, #tpu.memory_space<vmem>>, vector<8x8xf32>
    %30 = vector.broadcast %19 : vector<8x1xf32> to vector<8x8xf32>
    %31 = arith.mulf %30, %29 : vector<8x8xf32>
    %32 = arith.truncf %22 : vector<8x8xf32> to vector<8x8xbf16>
    %cst_22 = arith.constant dense<0.000000e+00> : vector<8x8xf32>
    %33 = tpu.matmul %32, %10, %cst_22 {dimension_numbers = #tpu.dot_dimension_numbers<[1], [0], [0], [1], [0, 0, 1, 1], [], []>} : vector<8x8xbf16>, vector<8x8xbf16>, vector<8x8xf32> -> vector<8x8xf32>
    %34 = arith.addf %31, %33 : vector<8x8xf32>
    %c0_23 = arith.constant 0 : index
    %c0_24 = arith.constant 0 : index
    %35 = vector.load %arg10[%c0_23, %c0_24] : memref<8x128xf32, #tpu.memory_space<vmem>>, vector<8x8xf32>
    tpu.vector_store %arg10[%c0_23, %c0_24], %34 {strides = array<i32>} : memref<8x128xf32, #tpu.memory_space<vmem>>, vector<8x8xf32>,
    %c0_25 = arith.constant 0 : index
    %c0_26 = arith.constant 0 : index
    %36 = vector.load %arg8[%c0_25, %c0_26] : memref<8x4xf32, #tpu.memory_space<vmem>>, vector<8x1xf32>
    tpu.vector_store %arg8[%c0_25, %c0_26], %17 {strides = array<i32>} : memref<8x4xf32, #tpu.memory_space<vmem>>, vector<8x1xf32>,
    %c0_27 = arith.constant 0 : index
    %c0_28 = arith.constant 0 : index
    %c8 = arith.constant 8 : index
    %37 = vector.load %arg4[%c0_27, %c0_28, %c8] : memref<1x8x128xbf16, #tpu.memory_space<vmem>>, vector<1x8x8xbf16>
    %38 = vector.shape_cast %37 : vector<1x8x8xbf16> to vector<8x8xbf16>
    %c0_29 = arith.constant 0 : index
    %c0_30 = arith.constant 0 : index
    %c8_31 = arith.constant 8 : index
    %39 = vector.load %arg5[%c0_29, %c0_30, %c8_31] : memref<1x8x128xbf16, #tpu.memory_space<vmem>>, vector<1x8x8xbf16>
    %40 = vector.shape_cast %39 : vector<1x8x8xbf16> to vector<8x8xbf16>
    %c0_32 = arith.constant 0 : index
    %c0_33 = arith.constant 0 : index
    %c8_34 = arith.constant 8 : index
    %41 = vector.load %arg6[%c0_32, %c0_33, %c8_34] : memref<1x8x128xbf16, #tpu.memory_space<vmem>>, vector<1x8x8xbf16>
    %42 = vector.shape_cast %41 : vector<1x8x8xbf16> to vector<8x8xbf16>
    %cst_35 = arith.constant dense<0.000000e+00> : vector<8x8xf32>
    %43 = tpu.matmul %38, %40, %cst_35 {dimension_numbers = #tpu.dot_dimension_numbers<[1], [1], [0], [0], [0, 0, 1, 0], [], []>} : vector<8x8xbf16>, vector<8x8xbf16>, vector<8x8xf32> -> vector<8x8xf32>
    %44 = vector.broadcast %4 : vector<1x8xf32> to vector<8x8xf32>
    %45 = arith.addf %43, %44 : vector<8x8xf32>
    %c0_36 = arith.constant 0 : index
    %c1 = arith.constant 1 : index
    %46 = vector.load %arg8[%c0_36, %c1] : memref<8x4xf32, #tpu.memory_space<vmem>>, vector<8x1xf32>
    %cst_37 = arith.constant dense<0xFF800000> : vector<8xf32>
    %47 = vector.multi_reduction <maximumf>, %45, %cst_37 [1] : vector<8x8xf32> to vector<8xf32>
    %48 = vector.shape_cast %47 : vector<8xf32> to vector<8x1xf32>
    %49 = arith.maximumf %46, %48 : vector<8x1xf32>
    %50 = arith.subf %46, %49 : vector<8x1xf32>
    %51 = math.exp %50 : vector<8x1xf32>
    %52 = vector.broadcast %49 : vector<8x1xf32> to vector<8x8xf32>
    %53 = arith.subf %45, %52 : vector<8x8xf32>
    %54 = math.exp %53 : vector<8x8xf32>
    %c0_38 = arith.constant 0 : index
    %c1_39 = arith.constant 1 : index
    %55 = vector.load %arg9[%c0_38, %c1_39] : memref<8x4xf32, #tpu.memory_space<vmem>>, vector<8x1xf32>
    %56 = arith.mulf %51, %55 : vector<8x1xf32>
    %cst_40 = arith.constant dense<0.000000e+00> : vector<8xf32>
    %57 = vector.multi_reduction <add>, %54, %cst_40 [1] : vector<8x8xf32> to vector<8xf32>
    %58 = vector.shape_cast %57 : vector<8xf32> to vector<8x1xf32>
    %59 = arith.addf %56, %58 : vector<8x1xf32>
    %c0_41 = arith.constant 0 : index
    %c1_42 = arith.constant 1 : index
    %60 = vector.load %arg9[%c0_41, %c1_42] : memref<8x4xf32, #tpu.memory_space<vmem>>, vector<8x1xf32>
    tpu.vector_store %arg9[%c0_41, %c1_42], %59 {strides = array<i32>} : memref<8x4xf32, #tpu.memory_space<vmem>>, vector<8x1xf32>,
    %c0_43 = arith.constant 0 : index
    %c8_44 = arith.constant 8 : index
    %61 = vector.load %arg10[%c0_43, %c8_44] : memref<8x128xf32, #tpu.memory_space<vmem>>, vector<8x8xf32>
    %62 = vector.broadcast %51 : vector<8x1xf32> to vector<8x8xf32>
    %63 = arith.mulf %62, %61 : vector<8x8xf32>
    %64 = arith.truncf %54 : vector<8x8xf32> to vector<8x8xbf16>
    %cst_45 = arith.constant dense<0.000000e+00> : vector<8x8xf32>
    %65 = tpu.matmul %64, %42, %cst_45 {dimension_numbers = #tpu.dot_dimension_numbers<[1], [0], [0], [1], [0, 0, 1, 1], [], []>} : vector<8x8xbf16>, vector<8x8xbf16>, vector<8x8xf32> -> vector<8x8xf32>
    %66 = arith.addf %63, %65 : vector<8x8xf32>
    %c0_46 = arith.constant 0 : index
    %c8_47 = arith.constant 8 : index
    %67 = vector.load %arg10[%c0_46, %c8_47] : memref<8x128xf32, #tpu.memory_space<vmem>>, vector<8x8xf32>
    tpu.vector_store %arg10[%c0_46, %c8_47], %66 {strides = array<i32>} : memref<8x128xf32, #tpu.memory_space<vmem>>, vector<8x8xf32>,
    %c0_48 = arith.constant 0 : index
    %c1_49 = arith.constant 1 : index
    %68 = vector.load %arg8[%c0_48, %c1_49] : memref<8x4xf32, #tpu.memory_space<vmem>>, vector<8x1xf32>
    tpu.vector_store %arg8[%c0_48, %c1_49], %49 {strides = array<i32>} : memref<8x4xf32, #tpu.memory_space<vmem>>, vector<8x1xf32>,
    %c0_50 = arith.constant 0 : index
    %c0_51 = arith.constant 0 : index
    %c16 = arith.constant 16 : index
    %69 = vector.load %arg4[%c0_50, %c0_51, %c16] : memref<1x8x128xbf16, #tpu.memory_space<vmem>>, vector<1x8x8xbf16>
    %70 = vector.shape_cast %69 : vector<1x8x8xbf16> to vector<8x8xbf16>
    %c0_52 = arith.constant 0 : index
    %c0_53 = arith.constant 0 : index
    %c16_54 = arith.constant 16 : index
    %71 = vector.load %arg5[%c0_52, %c0_53, %c16_54] : memref<1x8x128xbf16, #tpu.memory_space<vmem>>, vector<1x8x8xbf16>
    %72 = vector.shape_cast %71 : vector<1x8x8xbf16> to vector<8x8xbf16>
    %c0_55 = arith.constant 0 : index
    %c0_56 = arith.constant 0 : index
    %c16_57 = arith.constant 16 : index
    %73 = vector.load %arg6[%c0_55, %c0_56, %c16_57] : memref<1x8x128xbf16, #tpu.memory_space<vmem>>, vector<1x8x8xbf16>
    %74 = vector.shape_cast %73 : vector<1x8x8xbf16> to vector<8x8xbf16>
    %cst_58 = arith.constant dense<0.000000e+00> : vector<8x8xf32>
    %75 = tpu.matmul %70, %72, %cst_58 {dimension_numbers = #tpu.dot_dimension_numbers<[1], [1], [0], [0], [0, 0, 1, 0], [], []>} : vector<8x8xbf16>, vector<8x8xbf16>, vector<8x8xf32> -> vector<8x8xf32>
    %76 = vector.broadcast %4 : vector<1x8xf32> to vector<8x8xf32>
    %77 = arith.addf %75, %76 : vector<8x8xf32>
    %c0_59 = arith.constant 0 : index
    %c2 = arith.constant 2 : index
    %78 = vector.load %arg8[%c0_59, %c2] : memref<8x4xf32, #tpu.memory_space<vmem>>, vector<8x1xf32>
    %cst_60 = arith.constant dense<0xFF800000> : vector<8xf32>
    %79 = vector.multi_reduction <maximumf>, %77, %cst_60 [1] : vector<8x8xf32> to vector<8xf32>
    %80 = vector.shape_cast %79 : vector<8xf32> to vector<8x1xf32>
    %81 = arith.maximumf %78, %80 : vector<8x1xf32>
    %82 = arith.subf %78, %81 : vector<8x1xf32>
    %83 = math.exp %82 : vector<8x1xf32>
    %84 = vector.broadcast %81 : vector<8x1xf32> to vector<8x8xf32>
    %85 = arith.subf %77, %84 : vector<8x8xf32>
    %86 = math.exp %85 : vector<8x8xf32>
    %c0_61 = arith.constant 0 : index
    %c2_62 = arith.constant 2 : index
    %87 = vector.load %arg9[%c0_61, %c2_62] : memref<8x4xf32, #tpu.memory_space<vmem>>, vector<8x1xf32>
    %88 = arith.mulf %83, %87 : vector<8x1xf32>
    %cst_63 = arith.constant dense<0.000000e+00> : vector<8xf32>
    %89 = vector.multi_reduction <add>, %86, %cst_63 [1] : vector<8x8xf32> to vector<8xf32>
    %90 = vector.shape_cast %89 : vector<8xf32> to vector<8x1xf32>
    %91 = arith.addf %88, %90 : vector<8x1xf32>
    %c0_64 = arith.constant 0 : index
    %c2_65 = arith.constant 2 : index
    %92 = vector.load %arg9[%c0_64, %c2_65] : memref<8x4xf32, #tpu.memory_space<vmem>>, vector<8x1xf32>
    tpu.vector_store %arg9[%c0_64, %c2_65], %91 {strides = array<i32>} : memref<8x4xf32, #tpu.memory_space<vmem>>, vector<8x1xf32>,
    %c0_66 = arith.constant 0 : index
    %c16_67 = arith.constant 16 : index
    %93 = vector.load %arg10[%c0_66, %c16_67] : memref<8x128xf32, #tpu.memory_space<vmem>>, vector<8x8xf32>
    %94 = vector.broadcast %83 : vector<8x1xf32> to vector<8x8xf32>
    %95 = arith.mulf %94, %93 : vector<8x8xf32>
    %96 = arith.truncf %86 : vector<8x8xf32> to vector<8x8xbf16>
    %cst_68 = arith.constant dense<0.000000e+00> : vector<8x8xf32>
    %97 = tpu.matmul %96, %74, %cst_68 {dimension_numbers = #tpu.dot_dimension_numbers<[1], [0], [0], [1], [0, 0, 1, 1], [], []>} : vector<8x8xbf16>, vector<8x8xbf16>, vector<8x8xf32> -> vector<8x8xf32>
    %98 = arith.addf %95, %97 : vector<8x8xf32>
    %c0_69 = arith.constant 0 : index
    %c16_70 = arith.constant 16 : index
    %99 = vector.load %arg10[%c0_69, %c16_70] : memref<8x128xf32, #tpu.memory_space<vmem>>, vector<8x8xf32>
    tpu.vector_store %arg10[%c0_69, %c16_70], %98 {strides = array<i32>} : memref<8x128xf32, #tpu.memory_space<vmem>>, vector<8x8xf32>,
    %c0_71 = arith.constant 0 : index
    %c2_72 = arith.constant 2 : index
    %100 = vector.load %arg8[%c0_71, %c2_72] : memref<8x4xf32, #tpu.memory_space<vmem>>, vector<8x1xf32>
    tpu.vector_store %arg8[%c0_71, %c2_72], %81 {strides = array<i32>} : memref<8x4xf32, #tpu.memory_space<vmem>>, vector<8x1xf32>,
    %c0_73 = arith.constant 0 : index
    %c0_74 = arith.constant 0 : index
    %c24 = arith.constant 24 : index
    %101 = vector.load %arg4[%c0_73, %c0_74, %c24] : memref<1x8x128xbf16, #tpu.memory_space<vmem>>, vector<1x8x8xbf16>
    %102 = vector.shape_cast %101 : vector<1x8x8xbf16> to vector<8x8xbf16>
    %c0_75 = arith.constant 0 : index
    %c0_76 = arith.constant 0 : index
    %c24_77 = arith.constant 24 : index
    %103 = vector.load %arg5[%c0_75, %c0_76, %c24_77] : memref<1x8x128xbf16, #tpu.memory_space<vmem>>, vector<1x8x8xbf16>
    %104 = vector.shape_cast %103 : vector<1x8x8xbf16> to vector<8x8xbf16>
    %c0_78 = arith.constant 0 : index
    %c0_79 = arith.constant 0 : index
    %c24_80 = arith.constant 24 : index
    %105 = vector.load %arg6[%c0_78, %c0_79, %c24_80] : memref<1x8x128xbf16, #tpu.memory_space<vmem>>, vector<1x8x8xbf16>
    %106 = vector.shape_cast %105 : vector<1x8x8xbf16> to vector<8x8xbf16>
    %cst_81 = arith.constant dense<0.000000e+00> : vector<8x8xf32>
    %107 = tpu.matmul %102, %104, %cst_81 {dimension_numbers = #tpu.dot_dimension_numbers<[1], [1], [0], [0], [0, 0, 1, 0], [], []>} : vector<8x8xbf16>, vector<8x8xbf16>, vector<8x8xf32> -> vector<8x8xf32>
    %108 = vector.broadcast %4 : vector<1x8xf32> to vector<8x8xf32>
    %109 = arith.addf %107, %108 : vector<8x8xf32>
    %c0_82 = arith.constant 0 : index
    %c3 = arith.constant 3 : index
    %110 = vector.load %arg8[%c0_82, %c3] : memref<8x4xf32, #tpu.memory_space<vmem>>, vector<8x1xf32>
    %cst_83 = arith.constant dense<0xFF800000> : vector<8xf32>
    %111 = vector.multi_reduction <maximumf>, %109, %cst_83 [1] : vector<8x8xf32> to vector<8xf32>
    %112 = vector.shape_cast %111 : vector<8xf32> to vector<8x1xf32>
    %113 = arith.maximumf %110, %112 : vector<8x1xf32>
    %114 = arith.subf %110, %113 : vector<8x1xf32>
    %115 = math.exp %114 : vector<8x1xf32>
    %116 = vector.broadcast %113 : vector<8x1xf32> to vector<8x8xf32>
    %117 = arith.subf %109, %116 : vector<8x8xf32>
    %118 = math.exp %117 : vector<8x8xf32>
    %c0_84 = arith.constant 0 : index
    %c3_85 = arith.constant 3 : index
    %119 = vector.load %arg9[%c0_84, %c3_85] : memref<8x4xf32, #tpu.memory_space<vmem>>, vector<8x1xf32>
    %120 = arith.mulf %115, %119 : vector<8x1xf32>
    %cst_86 = arith.constant dense<0.000000e+00> : vector<8xf32>
    %121 = vector.multi_reduction <add>, %118, %cst_86 [1] : vector<8x8xf32> to vector<8xf32>
    %122 = vector.shape_cast %121 : vector<8xf32> to vector<8x1xf32>
    %123 = arith.addf %120, %122 : vector<8x1xf32>
    %c0_87 = arith.constant 0 : index
    %c3_88 = arith.constant 3 : index
    %124 = vector.load %arg9[%c0_87, %c3_88] : memref<8x4xf32, #tpu.memory_space<vmem>>, vector<8x1xf32>
    tpu.vector_store %arg9[%c0_87, %c3_88], %123 {strides = array<i32>} : memref<8x4xf32, #tpu.memory_space<vmem>>, vector<8x1xf32>,
    %c0_89 = arith.constant 0 : index
    %c24_90 = arith.constant 24 : index
    %125 = vector.load %arg10[%c0_89, %c24_90] : memref<8x128xf32, #tpu.memory_space<vmem>>, vector<8x8xf32>
    %126 = vector.broadcast %115 : vector<8x1xf32> to vector<8x8xf32>
    %127 = arith.mulf %126, %125 : vector<8x8xf32>
    %128 = arith.truncf %118 : vector<8x8xf32> to vector<8x8xbf16>
    %cst_91 = arith.constant dense<0.000000e+00> : vector<8x8xf32>
    %129 = tpu.matmul %128, %106, %cst_91 {dimension_numbers = #tpu.dot_dimension_numbers<[1], [0], [0], [1], [0, 0, 1, 1], [], []>} : vector<8x8xbf16>, vector<8x8xbf16>, vector<8x8xf32> -> vector<8x8xf32>
    %130 = arith.addf %127, %129 : vector<8x8xf32>
    %c0_92 = arith.constant 0 : index
    %c24_93 = arith.constant 24 : index
    %131 = vector.load %arg10[%c0_92, %c24_93] : memref<8x128xf32, #tpu.memory_space<vmem>>, vector<8x8xf32>
    tpu.vector_store %arg10[%c0_92, %c24_93], %130 {strides = array<i32>} : memref<8x128xf32, #tpu.memory_space<vmem>>, vector<8x8xf32>,
    %c0_94 = arith.constant 0 : index
    %c3_95 = arith.constant 3 : index
    %132 = vector.load %arg8[%c0_94, %c3_95] : memref<8x4xf32, #tpu.memory_space<vmem>>, vector<8x1xf32>
    tpu.vector_store %arg8[%c0_94, %c3_95], %113 {strides = array<i32>} : memref<8x4xf32, #tpu.memory_space<vmem>>, vector<8x1xf32>,
    %c0_i32_96 = arith.constant 0 : i32
    %133 = arith.cmpi eq, %arg2, %c0_i32_96 : i32
    %134 = arith.extui %133 : i1 to i32
    %c0_i32_97 = arith.constant 0 : i32
    %135 = arith.cmpi ne, %134, %c0_i32_97 : i32
    scf.if %135 {
      %c0_98 = arith.constant 0 : index
      %c0_99 = arith.constant 0 : index
      %136 = vector.load %arg9[%c0_98, %c0_99] : memref<8x4xf32, #tpu.memory_space<vmem>>, vector<8x1xf32>
      %137 = tpu.reciprocal %136 {approx = true} : vector<8x1xf32> -> vector<8x1xf32>
      %c0_100 = arith.constant 0 : index
      %c0_101 = arith.constant 0 : index
      %138 = vector.load %arg10[%c0_100, %c0_101] : memref<8x128xf32, #tpu.memory_space<vmem>>, vector<8x8xf32>
      %139 = vector.broadcast %137 : vector<8x1xf32> to vector<8x8xf32>
      %140 = arith.mulf %138, %139 : vector<8x8xf32>
      %c0_102 = arith.constant 0 : index
      %c0_103 = arith.constant 0 : index
      %141 = vector.load %arg10[%c0_102, %c0_103] : memref<8x128xf32, #tpu.memory_space<vmem>>, vector<8x8xf32>
      tpu.vector_store %arg10[%c0_102, %c0_103], %140 {strides = array<i32>} : memref<8x128xf32, #tpu.memory_space<vmem>>, vector<8x8xf32>,
      %c0_104 = arith.constant 0 : index
      %c1_105 = arith.constant 1 : index
      %142 = vector.load %arg9[%c0_104, %c1_105] : memref<8x4xf32, #tpu.memory_space<vmem>>, vector<8x1xf32>
      %143 = tpu.reciprocal %142 {approx = true} : vector<8x1xf32> -> vector<8x1xf32>
      %c0_106 = arith.constant 0 : index
      %c8_107 = arith.constant 8 : index
      %144 = vector.load %arg10[%c0_106, %c8_107] : memref<8x128xf32, #tpu.memory_space<vmem>>, vector<8x8xf32>
      %145 = vector.broadcast %143 : vector<8x1xf32> to vector<8x8xf32>
      %146 = arith.mulf %144, %145 : vector<8x8xf32>
      %c0_108 = arith.constant 0 : index
      %c8_109 = arith.constant 8 : index
      %147 = vector.load %arg10[%c0_108, %c8_109] : memref<8x128xf32, #tpu.memory_space<vmem>>, vector<8x8xf32>
      tpu.vector_store %arg10[%c0_108, %c8_109], %146 {strides = array<i32>} : memref<8x128xf32, #tpu.memory_space<vmem>>, vector<8x8xf32>,
      %c0_110 = arith.constant 0 : index
      %c2_111 = arith.constant 2 : index
      %148 = vector.load %arg9[%c0_110, %c2_111] : memref<8x4xf32, #tpu.memory_space<vmem>>, vector<8x1xf32>
      %149 = tpu.reciprocal %148 {approx = true} : vector<8x1xf32> -> vector<8x1xf32>
      %c0_112 = arith.constant 0 : index
      %c16_113 = arith.constant 16 : index
      %150 = vector.load %arg10[%c0_112, %c16_113] : memref<8x128xf32, #tpu.memory_space<vmem>>, vector<8x8xf32>
      %151 = vector.broadcast %149 : vector<8x1xf32> to vector<8x8xf32>
      %152 = arith.mulf %150, %151 : vector<8x8xf32>
      %c0_114 = arith.constant 0 : index
      %c16_115 = arith.constant 16 : index
      %153 = vector.load %arg10[%c0_114, %c16_115] : memref<8x128xf32, #tpu.memory_space<vmem>>, vector<8x8xf32>
      tpu.vector_store %arg10[%c0_114, %c16_115], %152 {strides = array<i32>} : memref<8x128xf32, #tpu.memory_space<vmem>>, vector<8x8xf32>,
      %c0_116 = arith.constant 0 : index
      %c3_117 = arith.constant 3 : index
      %154 = vector.load %arg9[%c0_116, %c3_117] : memref<8x4xf32, #tpu.memory_space<vmem>>, vector<8x1xf32>
      %155 = tpu.reciprocal %154 {approx = true} : vector<8x1xf32> -> vector<8x1xf32>
      %c0_118 = arith.constant 0 : index
      %c24_119 = arith.constant 24 : index
      %156 = vector.load %arg10[%c0_118, %c24_119] : memref<8x128xf32, #tpu.memory_space<vmem>>, vector<8x8xf32>
      %157 = vector.broadcast %155 : vector<8x1xf32> to vector<8x8xf32>
      %158 = arith.mulf %156, %157 : vector<8x8xf32>
      %c0_120 = arith.constant 0 : index
      %c24_121 = arith.constant 24 : index
      %159 = vector.load %arg10[%c0_120, %c24_121] : memref<8x128xf32, #tpu.memory_space<vmem>>, vector<8x8xf32>
      tpu.vector_store %arg10[%c0_120, %c24_121], %158 {strides = array<i32>} : memref<8x128xf32, #tpu.memory_space<vmem>>, vector<8x8xf32>,
      %c0_122 = arith.constant 0 : index
      %c0_123 = arith.constant 0 : index
      %160 = vector.load %arg10[%c0_122, %c0_123] : memref<8x128xf32, #tpu.memory_space<vmem>>, vector<8x128xf32>
      %161 = arith.truncf %160 : vector<8x128xf32> to vector<8x128xbf16>
      %c0_124 = arith.constant 0 : index
      %c0_125 = arith.constant 0 : index
      %c0_126 = arith.constant 0 : index
      %162 = vector.load %arg7[%c0_124, %c0_125, %c0_126] : memref<1x8x128xbf16, #tpu.memory_space<vmem>>, vector<1x8x128xbf16>
      %163 = vector.shape_cast %162 : vector<1x8x128xbf16> to vector<8x128xbf16>
      %164 = vector.shape_cast %161 : vector<8x128xbf16> to vector<1x8x128xbf16>
      tpu.vector_store %arg7[%c0_124, %c0_125, %c0_126], %164 {strides = array<i32>} : memref<1x8x128xbf16, #tpu.memory_space<vmem>>, vector<1x8x128xbf16>,
    } else {
    }
    return
  }
  func.func @transform_0(%arg0: i32, %arg1: i32, %arg2: i32) -> (i32, i32, i32) {
    %c0_i32 = arith.constant 0 : i32
    %c0_i32_0 = arith.constant 0 : i32
    return %arg0, %c0_i32, %arg2 : i32, i32, i32
  }
  func.func @transform_1(%arg0: i32, %arg1: i32, %arg2: i32) -> (i32, i32, i32) {
    %c0_i32 = arith.constant 0 : i32
    %c0_i32_0 = arith.constant 0 : i32
    return %arg0, %arg1, %c0_i32 : i32, i32, i32
  }
  func.func @transform_2(%arg0: i32, %arg1: i32, %arg2: i32) -> (i32, i32, i32) {
    %c0_i32 = arith.constant 0 : i32
    %c0_i32_0 = arith.constant 0 : i32
    return %arg0, %arg2, %c0_i32 : i32, i32, i32
  }
  func.func @transform_3(%arg0: i32, %arg1: i32, %arg2: i32) -> (i32, i32, i32) {
    %c1_i32 = arith.constant 1 : i32
    %c0_i32 = arith.constant 0 : i32
    return %arg0, %arg2, %c1_i32 : i32, i32, i32
  }
  func.func @transform_4(%arg0: i32, %arg1: i32, %arg2: i32) -> (i32, i32, i32) {
    %c0_i32 = arith.constant 0 : i32
    %c0_i32_0 = arith.constant 0 : i32
    return %arg0, %arg1, %c0_i32 : i32, i32, i32
  }
}

module attributes {stable_mosaic.version = 11 : i64} {
  func.func @_matmul_kernel(%arg0: i32, %arg1: i32, %arg2: i32, %arg3: memref<16x128xf32, #tpu.memory_space<vmem>>, %arg4: memref<128x128xbf16, #tpu.memory_space<vmem>>, %arg5: memref<1x128xf32, #tpu.memory_space<vmem>>, %arg6: memref<16x128xf32, #tpu.memory_space<vmem>>, %arg7: memref<16x128xf32, #tpu.memory_space<vmem>>) attributes {dimension_semantics = [#tpu.dimension_semantics<parallel>, #tpu.dimension_semantics<parallel>, #tpu.dimension_semantics<arbitrary>], iteration_bounds = array<i64: 1, 1, 1>, scalar_prefetch = 0 : i64, scratch_operands = 1 : i64, tpu.core_type = #tpu.core_type<tc>, window_params = [{transform_indices = @transform_0, window_bounds = array<i64: 16, 128>}, {transform_indices = @transform_1, window_bounds = array<i64: 128, 128>}, {transform_indices = @transform_2, window_bounds = array<i64: 1, 128>}, {transform_indices = @transform_3, window_bounds = array<i64: 16, 128>}]} {
    %c0_i32 = arith.constant 0 : i32
    %0 = arith.cmpi eq, %arg2, %c0_i32 : i32
    %1 = arith.extui %0 : i1 to i32
    %c0_i32_0 = arith.constant 0 : i32
    %2 = arith.cmpi ne, %1, %c0_i32_0 : i32
    scf.if %2 {
      %cst_10 = arith.constant 0.000000e+00 : f32
      %13 = vector.broadcast %cst_10 : f32 to vector<16x128xf32>
      %c0_11 = arith.constant 0 : index
      %c0_12 = arith.constant 0 : index
      %14 = vector.load %arg7[%c0_11, %c0_12] : memref<16x128xf32, #tpu.memory_space<vmem>>, vector<16x128xf32>
      tpu.vector_store %arg7[%c0_11, %c0_12], %13 {strides = array<i32>} : memref<16x128xf32, #tpu.memory_space<vmem>>, vector<16x128xf32>,
    } else {
    }
    %c0 = arith.constant 0 : index
    %c0_1 = arith.constant 0 : index
    %3 = vector.load %arg7[%c0, %c0_1] : memref<16x128xf32, #tpu.memory_space<vmem>>, vector<16x128xf32>
    %c0_2 = arith.constant 0 : index
    %c0_3 = arith.constant 0 : index
    %4 = vector.load %arg3[%c0_2, %c0_3] : memref<16x128xf32, #tpu.memory_space<vmem>>, vector<16x128xf32>
    %5 = arith.truncf %4 : vector<16x128xf32> to vector<16x128xbf16>
    %c0_4 = arith.constant 0 : index
    %c0_5 = arith.constant 0 : index
    %6 = vector.load %arg4[%c0_4, %c0_5] : memref<128x128xbf16, #tpu.memory_space<vmem>>, vector<128x128xbf16>
    %cst = arith.constant dense<0.000000e+00> : vector<16x128xf32>
    %7 = tpu.matmul %5, %6, %cst {dimension_numbers = #tpu.dot_dimension_numbers<[1], [0], [0], [1], [0, 0, 1, 1], [], []>} : vector<16x128xbf16>, vector<128x128xbf16>, vector<16x128xf32> -> vector<16x128xf32>
    %8 = arith.addf %3, %7 : vector<16x128xf32>
    %c0_6 = arith.constant 0 : index
    %c0_7 = arith.constant 0 : index
    %9 = vector.load %arg7[%c0_6, %c0_7] : memref<16x128xf32, #tpu.memory_space<vmem>>, vector<16x128xf32>
    tpu.vector_store %arg7[%c0_6, %c0_7], %8 {strides = array<i32>} : memref<16x128xf32, #tpu.memory_space<vmem>>, vector<16x128xf32>,
    %c0_i32_8 = arith.constant 0 : i32
    %10 = arith.cmpi eq, %arg2, %c0_i32_8 : i32
    %11 = arith.extui %10 : i1 to i32
    %c0_i32_9 = arith.constant 0 : i32
    %12 = arith.cmpi ne, %11, %c0_i32_9 : i32
    scf.if %12 {
      %c0_10 = arith.constant 0 : index
      %c0_11 = arith.constant 0 : index
      %13 = vector.load %arg7[%c0_10, %c0_11] : memref<16x128xf32, #tpu.memory_space<vmem>>, vector<16x128xf32>
      %c0_12 = arith.constant 0 : index
      %c0_13 = arith.constant 0 : index
      %14 = vector.load %arg5[%c0_12, %c0_13] : memref<1x128xf32, #tpu.memory_space<vmem>>, vector<1x128xf32>
      %15 = vector.broadcast %14 : vector<1x128xf32> to vector<16x128xf32>
      %16 = arith.addf %13, %15 : vector<16x128xf32>
      %c0_14 = arith.constant 0 : index
      %c0_15 = arith.constant 0 : index
      %17 = vector.load %arg6[%c0_14, %c0_15] : memref<16x128xf32, #tpu.memory_space<vmem>>, vector<16x128xf32>
      tpu.vector_store %arg6[%c0_14, %c0_15], %16 {strides = array<i32>} : memref<16x128xf32, #tpu.memory_space<vmem>>, vector<16x128xf32>,
    } else {
    }
    return
  }
  func.func @transform_0(%arg0: i32, %arg1: i32, %arg2: i32) -> (i32, i32) {
    %c0_i32 = arith.constant 0 : i32
    return %arg0, %arg2 : i32, i32
  }
  func.func @transform_1(%arg0: i32, %arg1: i32, %arg2: i32) -> (i32, i32) {
    %c0_i32 = arith.constant 0 : i32
    return %arg2, %arg1 : i32, i32
  }
  func.func @transform_2(%arg0: i32, %arg1: i32, %arg2: i32) -> (i32, i32) {
    %c0_i32 = arith.constant 0 : i32
    %c0_i32_0 = arith.constant 0 : i32
    return %c0_i32, %arg1 : i32, i32
  }
  func.func @transform_3(%arg0: i32, %arg1: i32, %arg2: i32) -> (i32, i32) {
    %c0_i32 = arith.constant 0 : i32
    return %arg0, %arg1 : i32, i32
  }
}

</mosaic_0001>

<bundles_post_ra>
// kernel: _lambda_.42
= control target key start
LH: loop header
LB: loop body
LE: loop exit
PB: predicated region body
PF: predicated region fallthrough
CT: control target
= control target key end

     0   :  { %v220_v0 = vmov 0.0   ;;  %vm221_vm0 = vmmov 0   ;;  %s278_s1 = inlined_call_operand.vmem [shape: bf16[128,128], index: 1, kind: input, shape index: {}]   ;;  %s279_s0 = inlined_call_operand.vmem [shape: f32[16,128], index: 0, kind: input, shape index: {}]   ;;  %s280_s2 = inlined_call_operand.vmem [shape: f32[1,128], index: 2, kind: input, shape index: {}]   ;;  %s281_s3 = inlined_call_operand.vmem [shape: bf16[16,128], index: 3, kind: output, shape index: {}]  }
   0x1   :  { %190 = vmatprep.subr.bf16.mxu0 %v220_v0  ;;  %v212_v1 = vld [vmem:[%s278_s1] sm:$0xff]   ;;  %206 = vmatprep.mubr.msk.bf16.mxu0 %vm221_vm0, %v220_v0  ;;  %v213_v2 = vld [vmem:[%s278_s1 + $0x8] sm:$0xff]   ;;  %v214_v3 = vld [vmem:[%s278_s1 + $0x10] sm:$0xff]  }
   0x2   :  { %191 = vmatpush3.bf16.msra.mxu0 %v212_v1  ;;  %v215_v4 = vld [vmem:[%s278_s1 + $0x18] sm:$0xff]   ;;  %v216_v5 = vld [vmem:[%s278_s1 + $0x20] sm:$0xff]   ;;  %v217_v6 = vld [vmem:[%s278_s1 + $0x28] sm:$0xff]  }
   0x3   :  { %192 = vmatprep.subr.bf16.mxu0 %v220_v0  ;;  %v218_v7 = vld [vmem:[%s278_s1 + $0x30] sm:$0xff]   ;;  %v219_v8 = vld [vmem:[%s278_s1 + $0x38] sm:$0xff]   ;;  %v23_v9 = vld [vmem:[%s279_s0] sm:$0xff] }
   0x4   :  { %v24_v10 = vld [vmem:[%s279_s0 + $0x8] sm:$0xff]  ;;  %v171_v13 = vld [vmem:[%s280_s2] ss:$0 sm:$0xff] }
   0x5   :  { %v25_v11 = vpack.c.bf16 %v24_v10, %v23_v9 }
   0x6   :  { %193 = vmatpush3.bf16.msra.mxu0 %v213_v2 }
   0x7   :  { %194 = vmatprep.subr.bf16.mxu0 %v220_v0 }
   0xa   :  { %195 = vmatpush3.bf16.msra.mxu0 %v214_v3 }
   0xb   :  { %196 = vmatprep.subr.bf16.mxu0 %v220_v0 }
   0xe   :  { %197 = vmatpush3.bf16.msra.mxu0 %v215_v4 }
   0xf   :  { %198 = vmatprep.subr.bf16.mxu0 %v220_v0 }
  0x12   :  { %199 = vmatpush3.bf16.msra.mxu0 %v216_v5 }
  0x13   :  { %200 = vmatprep.subr.bf16.mxu0 %v220_v0 }
  0x16   :  { %201 = vmatpush3.bf16.msra.mxu0 %v217_v6 }
  0x17   :  { %202 = vmatprep.subr.bf16.mxu0 %v220_v0 }
  0x1a   :  { %203 = vmatpush3.bf16.msra.mxu0 %v218_v7 }
  0x1b   :  { %204 = vmatprep.subr.bf16.mxu0 %v220_v0 }
  0x1e   :  { %205 = vmatpush3.bf16.msra.mxu0 %v219_v8 }
  0x21   :  { %207 = vmatmul.mubr.bf16.vlgmr.msra.gmra.mrb[0].mxu0 %v25_v11 }
  0xf4   :  { %v124_v12 = vpop.f32.mrb[0].mxu0 }
  0xf5   :  { %v208_v14 = vpop.f32.mrb[1].mxu0  ;;  %v147_v16 = vadd.f32 %v171_v13, %v124_v12 }
  0xf6   :  { %v127_v15 = vpop.f32.mrb[2].mxu0 }
  0xf7   :  { %v148_v17 = vadd.f32 %v171_v13, %v127_v15  ;;  %v209_v18 = vpop.f32.mrb[3].mxu0 }
  0xf9   :  { %v179_v19 = vpack.c.bf16 %v148_v17, %v147_v16 }
  0xfb   :  { %180 = vst [vmem:[%s281_s3] sm:$0xff] %v179_v19  }

// kernel: _lambda_.41
= control target key start
LH: loop header
LB: loop body
LE: loop exit
PB: predicated region body
PF: predicated region fallthrough
CT: control target
= control target key end

     0   :  { %v274_v0 = vmov 0.0   ;;  %vm275_vm0 = vmmov 0   ;;  %v175_v21 = vlaneseq  ;;  %s359_s1 = inlined_call_operand.vmem [shape: bf16[128,128], index: 1, kind: input, shape index: {}]   ;;  %s360_s0 = inlined_call_operand.vmem [shape: bf16[16,128], index: 0, kind: input, shape index: {}]   ;;  %s361_s2 = inlined_call_operand.vmem [shape: f32[1,128], index: 2, kind: input, shape index: {}]   ;;  %s362_s3 = inlined_call_operand.vmem [shape: f32[16,128], index: 3, kind: input, shape index: {}]   ;;  %s363_s4 = inlined_call_operand.vmem [shape: f32[1,128], index: 4, kind: input, shape index: {}]   ;;  %s364_s5 = inlined_call_operand.vmem [shape: f32[1,128], index: 5, kind: input, shape index: {}]   ;;  %s365_s6 = inlined_call_operand.vmem [shape: f32[16,128], index: 6, kind: output, shape index: {}]  }
   0x1   :  { %239 = vmatprep.subr.bf16.mxu0 %v274_v0  ;;  %v261_v1 = vld [vmem:[%s359_s1] sm:$0xff]   ;;  %255 = vmatprep.mubr.msk.bf16.mxu0 %vm275_vm0, %v274_v0  ;;  %v262_v2 = vld [vmem:[%s359_s1 + $0x8] sm:$0xff]   ;;  %v263_v3 = vld [vmem:[%s359_s1 + $0x10] sm:$0xff]  }
   0x2   :  { %240 = vmatpush3.bf16.msra.mxu0 %v261_v1  ;;  %v264_v4 = vld [vmem:[%s359_s1 + $0x18] sm:$0xff]   ;;  %v265_v5 = vld [vmem:[%s359_s1 + $0x20] sm:$0xff]   ;;  %v266_v6 = vld [vmem:[%s359_s1 + $0x28] sm:$0xff]   ;;  %v176_v22 = vand.u32 127, %v175_v21 }
   0x3   :  { %241 = vmatprep.subr.bf16.mxu0 %v274_v0  ;;  %v267_v7 = vld [vmem:[%s359_s1 + $0x30] sm:$0xff]   ;;  %v268_v8 = vld [vmem:[%s359_s1 + $0x38] sm:$0xff]   ;;  %v269_v9 = vld [vmem:[%s360_s0] sm:$0xff]  }
   0x4   :  { %v227_v10 = vld [vmem:[%s361_s2] ss:$0 sm:$0xff]  ;;  %v164_v19 = vld [vmem:[%s362_s3 + $0x8] sm:$0xff]  ;;  %vm177_vm1 = vcmp.lt.s32.totalorder %v176_v22, 32 }
   0x5   :  { %v163_v12 = vld [vmem:[%s362_s3] sm:$0xff] }
   0x6   :  { %242 = vmatpush3.bf16.msra.mxu0 %v262_v2  ;;  %v228_v40 = vld [vmem:[%s363_s4] ss:$0 sm:$0xff] }
   0x7   :  { %243 = vmatprep.subr.bf16.mxu0 %v274_v0  ;;  %v229_v42 = vld [vmem:[%s364_s5] ss:$0 sm:$0xff] }
   0xa   :  { %244 = vmatpush3.bf16.msra.mxu0 %v263_v3 }
   0xb   :  { %245 = vmatprep.subr.bf16.mxu0 %v274_v0 }
   0xe   :  { %246 = vmatpush3.bf16.msra.mxu0 %v264_v4 }
   0xf   :  { %247 = vmatprep.subr.bf16.mxu0 %v274_v0 }
  0x12   :  { %248 = vmatpush3.bf16.msra.mxu0 %v265_v5 }
  0x13   :  { %249 = vmatprep.subr.bf16.mxu0 %v274_v0 }
  0x16   :  { %250 = vmatpush3.bf16.msra.mxu0 %v266_v6 }
  0x17   :  { %251 = vmatprep.subr.bf16.mxu0 %v274_v0 }
  0x1a   :  { %252 = vmatpush3.bf16.msra.mxu0 %v267_v7 }
  0x1b   :  { %253 = vmatprep.subr.bf16.mxu0 %v274_v0 }
  0x1e   :  { %254 = vmatpush3.bf16.msra.mxu0 %v268_v8 }
  0x21   :  { %256 = vmatmul.mubr.bf16.vlgmr.msra.gmra.mrb[0].mxu0 %v269_v9 }
  0xf4   :  { %v138_v11 = vpop.f32.mrb[0].mxu0 }
  0xf5   :  { %v161_v13 = vadd.f32 %v227_v10, %v138_v11  ;;  %v257_v14 = vpop.f32.mrb[1].mxu0 }
  0xf6   :  { %v141_v15 = vpop.f32.mrb[2].mxu0 }
  0xf7   :  { %v162_v16 = vadd.f32 %v227_v10, %v141_v15  ;;  %v258_v17 = vpop.f32.mrb[3].mxu0  ;;  %v165_v18 = vadd.f32 %v163_v12, %v161_v13 }
  0xf9   :  { %167 = vadd.xlane.f32.xlu0 %v165_v18  ;;  %v166_v20 = vadd.f32 %v164_v19, %v162_v16 }
  0xfd   :  { %169 = vadd.xlane.f32.xlu0 %v166_v20 }
 0x186   :  { %v168_v23 = vpop.xlane.xlu0 %167 }
 0x187   :  { %v171_v24 = vmul.f32 0.03125, %v168_v23 }
 0x189   :  { %v173_v25 = vsub.f32 %v165_v18, %v171_v24 }
 0x18a   :  { %v170_v26 = vpop.xlane.xlu0 %169 }
 0x18b   :  { %v172_v27 = vmul.f32 0.03125, %v170_v26  ;;  %v178_v28 = vsel %vm177_vm1, %v173_v25, 0.0 }
 0x18c   :  { %v180_v29 = vmul.f32 %v178_v28, %v178_v28 }
 0x18d   :  { %v174_v30 = vsub.f32 %v166_v20, %v172_v27 }
 0x18e   :  { %182 = vadd.xlane.f32.xlu1 %v180_v29 }
 0x18f   :  { %v179_v31 = vsel %vm177_vm1, %v174_v30, 0.0 }
 0x190   :  { %v181_v32 = vmul.f32 %v179_v31, %v179_v31 }
 0x192   :  { %184 = vadd.xlane.f32.xlu1 %v181_v32 }
 0x21b   :  { %v183_v33 = vpop.xlane.xlu1 %182 }
 0x21c   :  { %v186_v34 = vmul.f32 0.03125, %v183_v33 }
 0x21e   :  { %v188_v35 = vadd.f32 1e-05, %v186_v34 }
 0x21f   :  { %v185_v36 = vpop.xlane.xlu1 %184 }
 0x220   :  { %270 = vrsqrt.f32 %v188_v35  ;;  %v187_v37 = vmul.f32 0.03125, %v185_v36 }
 0x222   :  { %v189_v38 = vadd.f32 1e-05, %v187_v37 }
 0x224   :  { %272 = vrsqrt.f32 %v189_v38 }
 0x22a   :  { %v271_v39 = vpop.eup %270 }
 0x22b   :  { %v192_v41 = vmul.f32 %v271_v39, %v178_v28 }
 0x22d   :  { %v201_v43 = vmul.f32 %v228_v40, %v192_v41 }
 0x22e   :  { %v273_v44 = vpop.eup %272 }
 0x22f   :  { %v210_v45 = vadd.f32 %v229_v42, %v201_v43  ;;  %v193_v46 = vmul.f32 %v273_v44, %v179_v31 }
 0x231   :  { %212 = vst [vmem:[%s365_s6] sm:$0xff] %v210_v45  ;;  %v202_v47 = vmul.f32 %v228_v40, %v193_v46 }
 0x233   :  { %v211_v48 = vadd.f32 %v229_v42, %v202_v47 }
 0x235   :  { %213 = vst [vmem:[%s365_s6 + $0x8] sm:$0xff] %v211_v48 }

// kernel: _lambda_.39
= control target key start
LH: loop header
LB: loop body
LE: loop exit
PB: predicated region body
PF: predicated region fallthrough
CT: control target
= control target key end

     0   :  { %v446_v0 = vmov 0.0   ;;  %vm447_vm0 = vmmov 0   ;;  %v448_v3 = vmov 0   ;;  %v301_v29 = vlaneseq  ;;  %s562_s1 = inlined_call_operand.vmem [shape: bf16[128,384], index: 1, kind: input, shape index: {}]   ;;  %s563_s0 = inlined_call_operand.vmem [shape: f32[16,128], index: 0, kind: input, shape index: {}]   ;;  %s564_s2 = inlined_call_operand.vmem [shape: f32[1,384], index: 2, kind: input, shape index: {}]   ;;  %s565_s3 = inlined_call_operand.vmem [shape: bf16[16,384], index: 3, kind: output, shape index: {}]  }
   0x1   :  { %391 = vmatprep.subr.bf16.mxu1 %v446_v0  ;;  %v414_v1 = vld [vmem:[%s562_s1 + $0x4] ss:$12 sps:$4 sm:$0xff]   ;;  %407 = vmatprep.mubr.msk.bf16.mxu1 %vm447_vm0, %v446_v0  ;;  %v416_v2 = vld [vmem:[%s562_s1 + $0x8] ss:$12 sps:$4 sm:$0xff]   ;;  %v417_v4 = vld [vmem:[%s562_s1] ss:$12 sps:$4 sm:$0xff]  }
   0x2   :  { %226 = vmatprep.mubr.bf16.mxu0 %v448_v3  ;;  %194 = vmatprep.subr.bf16.mxu0 %v414_v1  ;;  %v418_v5 = vld [vmem:[%s562_s1 + $0x1c] ss:$12 sps:$4 sm:$0xff]   ;;  %v420_v6 = vld [vmem:[%s562_s1 + $0x20] ss:$12 sps:$4 sm:$0xff]   ;;  %v421_v7 = vld [vmem:[%s562_s1 + $0x18] ss:$12 sps:$4 sm:$0xff]  }
   0x3   :  { %392 = vmatpush3.bf16.msra.mxu1 %v416_v2  ;;  %195 = vmatpush1.bf16.msra.mxu0 %v417_v4  ;;  %v422_v8 = vld [vmem:[%s562_s1 + $0x34] ss:$12 sps:$4 sm:$0xff]   ;;  %v424_v9 = vld [vmem:[%s562_s1 + $0x38] ss:$12 sps:$4 sm:$0xff]   ;;  %v425_v10 = vld [vmem:[%s562_s1 + $0x30] ss:$12 sps:$4 sm:$0xff]  }
   0x4   :  { %393 = vmatprep.subr.bf16.mxu1 %v446_v0  ;;  %196 = vmatprep.subr.bf16.mxu0 %v418_v5  ;;  %v426_v11 = vld [vmem:[%s562_s1 + $0x4c] ss:$12 sps:$4 sm:$0xff]   ;;  %v428_v12 = vld [vmem:[%s562_s1 + $0x50] ss:$12 sps:$4 sm:$0xff]   ;;  %v429_v13 = vld [vmem:[%s562_s1 + $0x48] ss:$12 sps:$4 sm:$0xff]  }
   0x5   :  { %v430_v14 = vld [vmem:[%s562_s1 + $0x64] ss:$12 sps:$4 sm:$0xff]   ;;  %v432_v15 = vld [vmem:[%s562_s1 + $0x68] ss:$12 sps:$4 sm:$0xff]   ;;  %v433_v16 = vld [vmem:[%s562_s1 + $0x60] ss:$12 sps:$4 sm:$0xff]  }
   0x6   :  { %v434_v17 = vld [vmem:[%s562_s1 + $0x7c] ss:$12 sps:$4 sm:$0xff]   ;;  %v436_v18 = vld [vmem:[%s562_s1 + $0x80] ss:$12 sps:$4 sm:$0xff]   ;;  %v437_v19 = vld [vmem:[%s562_s1 + $0x78] ss:$12 sps:$4 sm:$0xff]  }
   0x7   :  { %394 = vmatpush3.bf16.msra.mxu1 %v420_v6  ;;  %197 = vmatpush1.bf16.msra.mxu0 %v421_v7  ;;  %v438_v20 = vld [vmem:[%s562_s1 + $0x94] ss:$12 sps:$4 sm:$0xff]   ;;  %v440_v21 = vld [vmem:[%s562_s1 + $0x98] ss:$12 sps:$4 sm:$0xff]   ;;  %v441_v22 = vld [vmem:[%s562_s1 + $0x90] ss:$12 sps:$4 sm:$0xff]  }
   0x8   :  { %395 = vmatprep.subr.bf16.mxu1 %v446_v0  ;;  %198 = vmatprep.subr.bf16.mxu0 %v422_v8  ;;  %v442_v23 = vld [vmem:[%s562_s1 + $0xac] ss:$12 sps:$4 sm:$0xff]   ;;  %v444_v24 = vld [vmem:[%s562_s1 + $0xb0] ss:$12 sps:$4 sm:$0xff]   ;;  %v31_v25 = vld [vmem:[%s563_s0] sm:$0xff]  ;;  %v302_v30 = vshrl.u32 %v301_v29, 7 }
   0x9   :  { %v32_v26 = vld [vmem:[%s563_s0 + $0x8] sm:$0xff]  ;;  %v299_v32 = vld [vmem:[%s564_s2] sm:$0x7] }
   0xa   :  { %v445_v27 = vld [vmem:[%s562_s1 + $0xa8] ss:$12 sps:$4 sm:$0xff]   ;;  %v33_v28 = vpack.c.bf16 %v32_v26, %v31_v25  ;;  %v311_v31 = vsub.s32 2, %v302_v30  ;;  %v303_v33 = vsub.s32 0, %v302_v30  ;;  %v307_v34 = vsub.s32 1, %v302_v30 }
   0xb   :  { %396 = vmatpush3.bf16.msra.mxu1 %v424_v9  ;;  %199 = vmatpush1.bf16.msra.mxu0 %v425_v10 }
   0xc   :  { %397 = vmatprep.subr.bf16.mxu1 %v446_v0  ;;  %200 = vmatprep.subr.bf16.mxu0 %v426_v11  ;;  %v312_v35 = vrot.slane %v299_v32, %v311_v31  ;;  %v304_v36 = vrot.slane %v299_v32, %v303_v33  ;;  %v308_v37 = vrot.slane %v299_v32, %v307_v34 }
   0xf   :  { %398 = vmatpush3.bf16.msra.mxu1 %v428_v12  ;;  %201 = vmatpush1.bf16.msra.mxu0 %v429_v13 }
  0x10   :  { %399 = vmatprep.subr.bf16.mxu1 %v446_v0  ;;  %202 = vmatprep.subr.bf16.mxu0 %v430_v14 }
  0x13   :  { %400 = vmatpush3.bf16.msra.mxu1 %v432_v15  ;;  %203 = vmatpush1.bf16.msra.mxu0 %v433_v16 }
  0x14   :  { %401 = vmatprep.subr.bf16.mxu1 %v446_v0  ;;  %204 = vmatprep.subr.bf16.mxu0 %v434_v17 }
  0x17   :  { %402 = vmatpush3.bf16.msra.mxu1 %v436_v18  ;;  %205 = vmatpush1.bf16.msra.mxu0 %v437_v19 }
  0x18   :  { %403 = vmatprep.subr.bf16.mxu1 %v446_v0  ;;  %206 = vmatprep.subr.bf16.mxu0 %v438_v20 }
  0x1b   :  { %404 = vmatpush3.bf16.msra.mxu1 %v440_v21  ;;  %207 = vmatpush1.bf16.msra.mxu0 %v441_v22 }
  0x1c   :  { %405 = vmatprep.subr.bf16.mxu1 %v446_v0  ;;  %208 = vmatprep.subr.bf16.mxu0 %v442_v23 }
  0x1f   :  { %406 = vmatpush3.bf16.msra.mxu1 %v444_v24  ;;  %209 = vmatpush1.bf16.msra.mxu0 %v445_v27 }
  0x22   :  { %408 = vmatmul.mubr.bf16.vlgmr.msra.gmra.mrb[0].mxu1 %v33_v28  ;;  %227 = vmatmul.mubr.bf16.vlgmr.msra.gmra.mrb[0].mxu0 %v33_v28 }
  0xf5   :  { %v271_v38 = vpop.f32.mrb[0].mxu1  ;;  %v228_v40 = vpop.f32.mrb[0].mxu0 }
  0xf6   :  { %v318_v39 = vadd.f32 %v312_v35, %v271_v38  ;;  %v409_v41 = vpop.f32.mrb[1].mxu1  ;;  %v316_v42 = vadd.f32 %v304_v36, %v228_v40  ;;  %v230_v43 = vpop.f32.mrb[1].mxu0 }
  0xf7   :  { %v274_v44 = vpop.f32.mrb[2].mxu1  ;;  %v317_v46 = vadd.f32 %v308_v37, %v230_v43  ;;  %v232_v48 = vpop.f32.mrb[2].mxu0 }
  0xf8   :  { %v379_v45 = vpack.c.bf16 %v318_v39, %v318_v39  ;;  %v321_v47 = vadd.f32 %v312_v35, %v274_v44  ;;  %v410_v49 = vpop.f32.mrb[3].mxu1  ;;  %v319_v50 = vadd.f32 %v304_v36, %v232_v48  ;;  %v234_v51 = vpop.f32.mrb[3].mxu0 }
  0xf9   :  { %v378_v52 = vpack.c.bf16 %v317_v46, %v316_v42  ;;  %v320_v54 = vadd.f32 %v308_v37, %v234_v51 }
  0xfa   :  { %343 = vst [vmem:[%s565_s3 + $0x8] sm:$0xf] %v379_v45  ;;  %v381_v53 = vpack.c.bf16 %v321_v47, %v321_v47 }
  0xfb   :  { %342 = vst [vmem:[%s565_s3] sm:$0xff] %v378_v52  ;;  %v380_v55 = vpack.c.bf16 %v320_v54, %v319_v50 }
  0xfc   :  { %345 = vst [vmem:[%s565_s3 + $0x14] sm:$0xf] %v381_v53 }
  0xfd   :  { %344 = vst [vmem:[%s565_s3 + $0xc] sm:$0xff] %v380_v55 }

// kernel: _lambda_.40
= control target key start
LH: loop header
LB: loop body
LE: loop exit
PB: predicated region body
PF: predicated region fallthrough
CT: control target
= control target key end

     0   :  { %s1377_s15 = smov 0   ;;  %s1379_s16 = smov 0   ;;  %s1610_s0 = inlined_call_operand.vmem [shape: f32[2,1,8], index: 0, kind: input, shape index: {}]   ;;  %s1611_s1 = inlined_call_operand.vmem [shape: bf16[2,8,384], index: 1, kind: input, shape index: {}, may-alias: {1,2,3}]   ;;  %s1612_s2 = inlined_call_operand.vmem [shape: bf16[2,8,384], index: 2, kind: input, shape index: {}, may-alias: {1,2,3}]   ;;  %s1613_s3 = inlined_call_operand.vmem [shape: bf16[2,8,384], index: 3, kind: input, shape index: {}, may-alias: {1,2,3}]   ;;  %s1614_s4 = inlined_call_operand.vmem [shape: bf16[2,8,128], index: 4, kind: output, shape index: {}]  }
   0x1   :  { %s1381_s17 = smov 0  }
   0x2 LB: > { %s33_s18 = sadd.s32 1, %s1333_s16  ;;  %p1140_p0 = scmp.ge.s32.totalorder %s1337_s17, 1  ;;  %s1337_s17 = sphi %s1381_s17, %s14_s17   ;;  %s1333_s16 = sphi %s1379_s16, %s1616_s16   ;;  %s1329_s15 = sphi %s1377_s15, %s1615_s15  }
   0x3   : > { %p35_p1 = scmp.ge.s32.totalorder %s33_s18, 2  ;;  %p236_p2 = scmp.lt.s32.totalorder %s1337_s17, 3 }
   0x5   : > { %s1618_s18 = smov (%p35_p1, %s33_s18), 0  ;;  %p237_p3 = pnand %p1140_p0, %p236_p2 }
   0x6   : > { %p294_p4 = scmp.lt.s32.totalorder (!%p237_p3), %s1329_s15, 1  ;;  %v1339_v0 = vmov (!%p237_p3), 0.0   ;;  %vm1340_vm0 = vmmov (!%p237_p3), 0   ;;  %vm368_vm1 = vcmask (!%p237_p3), 64512   ;;  %vm341_vm2 = vcmask (!%p237_p3), 31744   ;;  %s1343_s29 = smov (!%p237_p3), 120  }
   0x7   : > { %240 = sbr.rel (%p237_p3) target bundleno = 1453 (0x5ad), region = 36  ;;  %1189 = vmatprep.subr.bf16.mxu0 (!%p237_p3), %v1339_v0  ;;  %344 = vst [vmem:[#allocation4] sm:$0xff] (!%p237_p3), %v1339_v0  ;;  %1191 = vmatprep.mubr.msk.bf16.mxu0 (!%p237_p3), %vm1340_vm0, %v1339_v0  ;;  %v1341_v4 = vmov (!%p237_p3), -1e+30   ;;  %343 = vst.msk [vmem:[#allocation3] sm:$0xff] (!%p237_p3), %vm341_vm2, %v1339_v0  ;;  %v348_v5 = vlaneseq (!%p237_p3)  ;;  %v1342_v17 = vmov (!%p237_p3), 0  }
   0x8   : > { %1195 = vmatprep.subr.bf16.mxu1 (!%p237_p3), %v1339_v0  ;;  %1197 = vmatprep.mubr.msk.bf16.mxu1 (!%p237_p3), %vm1340_vm0, %v1339_v0  ;;  %342 = vst.msk [vmem:[#allocation2] sm:$0xff] (!%p237_p3), %vm341_vm2, %v1341_v4  ;;  %s1344_s30 = smov (!%p237_p3), 112   ;;  %s1345_s5 = smov (!%p237_p3), 104   ;;  %vm437_vm4 = vcmask (!%p237_p3), 7168   ;;  %vm450_vm5 = vcmask (!%p237_p3), 1043456   ;;  %v1347_v4 = vmov (!%p237_p3), 2  }
   0x9   : > { %v349_v6 = vshrl.u32 (!%p237_p3), %v348_v5, 7  ;;  %v353_v7 = vand.u32 (!%p237_p3), 127, %v348_v5  ;;  %1275 = vset.pattern.permute.xlu0 (!%p237_p3), %v1342_v17  ;;  %vm578_vm6 = vcmask (!%p237_p3), 15368   ;;  %vm728_vm7 = vcmask (!%p237_p3), 23568   ;;  %s1349_s9 = smov (!%p237_p3), 8   ;;  %s1350_s10 = smov (!%p237_p3), 16  }
   0xa   : > { %vm878_vm8 = vcmask (!%p237_p3), 31768   ;;  %s1351_s11 = smov (!%p237_p3), 24   ;;  %vm644_vm9 = vcmask (!%p237_p3), 130112   ;;  %vm794_vm10 = vcmask (!%p237_p3), 195712   ;;  %vm944_vm11 = vcmask (!%p237_p3), 261312  }
   0xb   : > { %vm356_vm3 = vcmp.gt.s32.totalorder (!%p237_p3), %v353_v7, %v349_v6 }
   0xc   : > { %v357_v9 = vsel (!%p237_p3), %vm356_vm3, -1e+09, %v1339_v0 }
   0xe   : > { %s1620_s15 = smov (!%p294_p4, %s1329_s15), 1 }
   0xf   : > { %s1405_s19 = smul.u32 12, %s1620_s15  ;;  %s299_s28 = scalar_lea.vmem %s1610_s0, %s1620_s15  ;;  %v1449_v24 = vld [vmem:[#allocation2] sm:$0xff] }
  0x10   : > { %v1145_v8 = vld [vmem:[%s299_s28] ss:$0 sm:$0xff]  ;;  %s1144_s12 = sshll.u32 %s1620_s15, 2 }
  0x11   : > { %s1411_s22 = scalar_lea.vmem %s1612_s2, %s1405_s19  ;;  %s1418_s25 = scalar_lea.vmem %s1611_s1, %s1405_s19  ;;  %v1432_v10 = vadd.f32 %v1145_v8, %v357_v9 }
  0x12   : > { %v1146_v1 = vld [vmem:[%s1411_s22 + $0x4] sm:$0xf]  ;;  %v365_v3 = vld [vmem:[%s1418_s25] sm:$0xf]  ;;  %s1463_s8 = scalar_lea.vmem %s1613_s3, %s1405_s19  ;;  %s335_s19 = scalar_lea.vmem %s1614_s4, %s1144_s12 }
  0x13   : > { %v373_v2 = vsel %vm368_vm1, %v1146_v1, 0  ;;  %v1288_v18 = vld [vmem:[%s1411_s22 + $0x4] ss:$0 sps:$4 sm:$0xff]   ;;  %v1289_v19 = vld [vmem:[%s1418_s25] ss:$0 sps:$4 sm:$0xff]  }
  0x14   : > { %1190 = vmatpush3.bf16.xpose.msra.mxu0 %v373_v2  ;;  %508 = vrot.lane.b32.xlu1 %v1288_v18, %s1343_s29  ;;  %v1290_v20 = vld [vmem:[%s1411_s22 + $0x4] ss:$0 sps:$4 sm:$0xff]   ;;  %v1291_v21 = vld [vmem:[%s1418_s25] ss:$0 sps:$4 sm:$0xff]   ;;  %v1147_v28 = vld [vmem:[%s1463_s8 + $0x8] sm:$0xf] }
  0x15   : > { %1207 = vmatprep.subr.bf16.mxu0 %v1339_v0  ;;  %v1292_v22 = vld [vmem:[%s1411_s22 + $0x4] ss:$0 sps:$4 sm:$0xff]   ;;  %v1293_v23 = vld [vmem:[%s1418_s25] ss:$0 sps:$4 sm:$0xff]   ;;  %v452_v29 = vsel %vm450_vm5, %v1147_v28, 0 }
  0x16   : > { %1196 = vmatpush3.bf16.msra.mxu1 %v452_v29  ;;  %v1294_v9 = vld [vmem:[%s1463_s8 + $0x8] ss:$0 sps:$4 sm:$0xff]  }
  0x17   : > { %1201 = vmatprep.subr.bf16.mxu1 %v1339_v0 }
  0x18   : > { %503 = vrot.lane.b32.xlu1 %v1289_v19, %s1343_s29 }
  0x1b   : > { %1192 = vmatmul.mubr.msk.bf16.vlgmr.msra.gmra.mrb[0].mxu0 %vm368_vm1, %v365_v3  ;;  %v1346_v3 = vmov 1  }
  0x1c   : > { %1209 = vmatprep.mubr.msk.bf16.mxu0 %vm1340_vm0, %v1339_v0  ;;  %658 = vrot.lane.b32.xlu1 %v1290_v20, %s1344_s30  ;;  %v1295_v20 = vld [vmem:[%s1463_s8 + $0x8] ss:$0 sps:$4 sm:$0xff]  }
  0x1d   : > { %1276 = vset.pattern.permute.xlu1 %v1346_v3 }
  0x20   : > { %653 = vrot.lane.b32.xlu1 %v1291_v21, %s1344_s30  ;;  %v1296_v21 = vld [vmem:[%s1463_s8 + $0x8] ss:$0 sps:$4 sm:$0xff]  }
  0x24   : > { %808 = vrot.lane.b32.xlu1 %v1292_v22, %s1345_s5 }
  0x28   : > { %803 = vrot.lane.b32.xlu1 %v1293_v23, %s1345_s5 }
  0x86   : > { %v509_v33 = vpop.permute.xlu1 %508 }
  0x87   : > { %v514_v36 = vsel %vm368_vm1, %v509_v33, 0 }
  0x8a   : > { %v504_v34 = vpop.permute.xlu1 %503 }
  0x8e   : > { %v659_v38 = vpop.permute.xlu1 %658 }
  0x8f   : > { %v664_v40 = vsel %vm368_vm1, %v659_v38, 0 }
  0x92   : > { %v654_v39 = vpop.permute.xlu1 %653 }
  0x96   : > { %v809_v41 = vpop.permute.xlu1 %808 }
  0x97   : > { %v814_v42 = vsel %vm368_vm1, %v809_v41, 0 }
  0x9a   : > { %v804_v43 = vpop.permute.xlu1 %803 }
  0xee   : > { %v409_v11 = vpop.f32.mrb[0].mxu0 }
  0xef   : > { %v410_v12 = vadd.f32 %v409_v11, %v1432_v10  ;;  %v1193_v13 = vpop.f32.mrb[1].mxu0 }
  0xf0   : > { %v412_v14 = vpop.f32.mrb[2].mxu0 }
  0xf1   : > { %v1194_v15 = vpop.f32.mrb[3].mxu0  ;;  %v416_v16 = vsel %vm368_vm1, %v410_v12, -inf }
  0xf2   : > { %417 = vmax.xlane.f32.xlu0 %v416_v16 }
 0x17f   : > { %v418_v25 = vpop.xlane.xlu0 %417 }
 0x180   : > { %v1452_v26 = vmax.f32 %v1449_v24, %v418_v25 }
 0x182   : > { %v420_v27 = vsub.f32 %v1449_v24, %v1452_v26  ;;  %496 = vst.msk [vmem:[#allocation2] sm:$0xff] %vm437_vm4, %v1452_v26  ;;  %425 = vperm.xlu0 %1275, %v1452_v26  }
 0x184   : > { %v421_v23 = vmul.f32 1.442695, %v420_v27 }
 0x186   : > { %1277 = vset.pattern.permute.xlu0 %v1347_v4 }
 0x189   : > { %v1506_v6 = vld [vmem:[#allocation2] sm:$0xff] }
 0x201   : > { %v426_v30 = vpop.permute.xlu0 %425 }
 0x202   : > { %v428_v31 = vsub.f32 %v410_v12, %v426_v30 }
 0x204   : > { %v429_v32 = vmul.f32 1.442695, %v428_v31 }
 0x206   : > { %1297 = vpow2.f32 %v429_v32 }
 0x207   : > { %1299 = vpow2.f32 %v421_v23 }
 0x210   : > { %v1468_v35 = vpop.eup %1297 }
 0x211   : > { %v446_v37 = vpack.c.bf16 %v1468_v35, %v1468_v35  ;;  %v433_v22 = vsel %vm368_vm1, %v1468_v35, 0.0  ;;  %v1300_v25 = vpop.eup %1299 }
 0x213   : > { %1198 = vmatmul.mubr.msk.bf16.vlgmr.msra.gmra.mrb[0].mxu1 %vm368_vm1, %v446_v37 }
 0x214   : > { %1202 = vmatpush3.bf16.xpose.msra.mxu1 %v514_v36  ;;  %1203 = vmatprep.mubr.msk.bf16.mxu1 %vm1340_vm0, %v1339_v0 }
 0x215   : > { %1213 = vmatprep.subr.bf16.mxu1 %v1339_v0 }
 0x21b   : > { %1204 = vmatmul.mubr.msk.bf16.vlgmr.msra.gmra.mrb[4].mxu1 %vm368_vm1, %v504_v34 }
 0x21c   : > { %1214 = vmatpush3.bf16.xpose.msra.mxu1 %v664_v40  ;;  %1215 = vmatprep.mubr.msk.bf16.mxu1 %vm1340_vm0, %v1339_v0 }
 0x21d   : > { %1225 = vmatprep.subr.bf16.mxu1 %v1339_v0 }
 0x223   : > { %1216 = vmatmul.mubr.msk.bf16.vlgmr.msra.gmra.mrb[8].mxu1 %vm368_vm1, %v654_v39 }
 0x224   : > { %1226 = vmatpush3.bf16.xpose.msra.mxu1 %v814_v42  ;;  %1227 = vmatprep.mubr.msk.bf16.mxu1 %vm1340_vm0, %v1339_v0 }
 0x22b   : > { %1228 = vmatmul.mubr.msk.bf16.vlgmr.msra.gmra.mrb[12].mxu1 %vm368_vm1, %v804_v43 }
 0x2e6   : > { %v1487_v44 = vpop.f32.mrb[0].mxu1 }
 0x2e7   : > { %v1199_v45 = vpop.f32.mrb[1].mxu1 }
 0x2e8   : > { %v491_v46 = vpop.f32.mrb[2].mxu1 }
 0x2e9   : > { %v1200_v47 = vpop.f32.mrb[3].mxu1 }
 0x2ee   : > { %v550_v48 = vpop.f32.mrb[4].mxu1 }
 0x2ef   : > { %v1490_v49 = vadd.f32 %v550_v48, %v1432_v10  ;;  %v1205_v50 = vpop.f32.mrb[5].mxu1 }
 0x2f0   : > { %v553_v51 = vpop.f32.mrb[6].mxu1 }
 0x2f1   : > { %v1206_v52 = vpop.f32.mrb[7].mxu1  ;;  %v557_v53 = vsel %vm368_vm1, %v1490_v49, -inf }
 0x2f2   : > { %558 = vmax.xlane.f32.xlu1 %v557_v53  ;;  %v431_v53 = vld [vmem:[#allocation3] sm:$0xff] }
 0x2f6   : > { %v700_v54 = vpop.f32.mrb[8].mxu1 }
 0x2f7   : > { %v1495_v55 = vadd.f32 %v700_v54, %v1432_v10  ;;  %v1217_v56 = vpop.f32.mrb[9].mxu1  ;;  %v432_v54 = vmul.f32 %v1300_v25, %v431_v53 }
 0x2f8   : > { %v703_v57 = vpop.f32.mrb[10].mxu1 }
 0x2f9   : > { %v1218_v58 = vpop.f32.mrb[11].mxu1  ;;  %v707_v59 = vsel %vm368_vm1, %v1495_v55, -inf }
 0x2fa   : > { %708 = vmax.xlane.f32.xlu0 %v707_v59 }
 0x2fe   : > { %v850_v60 = vpop.f32.mrb[12].mxu1 }
 0x2ff   : > { %v1500_v61 = vadd.f32 %v850_v60, %v1432_v10  ;;  %v1229_v62 = vpop.f32.mrb[13].mxu1  ;;  %v1348_v10 = vmov 3  }
 0x300   : > { %v853_v63 = vpop.f32.mrb[14].mxu1 }
 0x301   : > { %v1230_v1 = vpop.f32.mrb[15].mxu1  ;;  %v857_v2 = vsel %vm368_vm1, %v1500_v61, -inf }
 0x302   : > { %858 = vmax.xlane.f32.xlu1 %v857_v2 }
 0x37f   : > { %v559_v5 = vpop.xlane.xlu1 %558 }
 0x380   : > { %v1509_v7 = vmax.f32 %v1506_v6, %v559_v5 }
 0x382   : > { %v561_v8 = vsub.f32 %v1506_v6, %v1509_v7  ;;  %646 = vst.msk [vmem:[#allocation2] sm:$0xff] %vm578_vm6, %v1509_v7  ;;  %566 = vperm.xlu1 %1276, %v1509_v7  }
 0x384   : > { %v562_v50 = vmul.f32 1.442695, %v561_v8 }
 0x386   : > { %591 = vrot.lane.b32.xlu1 %v1294_v9, %s1343_s29 }
 0x387   : > { %1278 = vset.pattern.permute.xlu1 %v1348_v10  ;;  %v709_v11 = vpop.xlane.xlu0 %708 }
 0x389   : > { %v1519_v12 = vld [vmem:[#allocation2] sm:$0xff] }
 0x38a   : > { %v1522_v13 = vmax.f32 %v1519_v12, %v709_v11 }
 0x38c   : > { %v711_v14 = vsub.f32 %v1519_v12, %v1522_v13  ;;  %796 = vst.msk [vmem:[#allocation2] sm:$0xff] %vm728_vm7, %v1522_v13  ;;  %716 = vperm.xlu0 %1277, %v1522_v13  }
 0x38e   : > { %v712_v51 = vmul.f32 1.442695, %v711_v14 }
 0x38f   : > { %v859_v15 = vpop.xlane.xlu1 %858 }
 0x390   : > { %1280 = vset.pattern.permute.xlu0 %v1346_v3 }
 0x393   : > { %v1530_v16 = vld [vmem:[#allocation2] sm:$0xff] }
 0x394   : > { %v1533_v18 = vmax.f32 %v1530_v16, %v859_v15 }
 0x396   : > { %v861_v19 = vsub.f32 %v1530_v16, %v1533_v18  ;;  %946 = vst.msk [vmem:[#allocation2] sm:$0xff] %vm878_vm8, %v1533_v18  ;;  %866 = vperm.xlu1 %1278, %v1533_v18  }
 0x398   : > { %v862_v1 = vmul.f32 1.442695, %v861_v19 }
 0x39a   : > { %741 = vrot.lane.b32.xlu1 %v1295_v20, %s1344_s30 }
 0x39b   : > { %1279 = vset.pattern.permute.xlu1 %v1342_v17 }
 0x39e   : > { %891 = vrot.lane.b32.xlu1 %v1296_v21, %s1345_s5 }
 0x3c2   : > { %434 = vadd.xlane.f32.xlu1 %v433_v22 }
 0x3d3   : > { %442 = vperm.xlu1 %1279, %v1300_v25  }
 0x3d7   : > { %1282 = vset.pattern.permute.xlu1 %v1348_v10 }
 0x401   : > { %v567_v28 = vpop.permute.xlu1 %566 }
 0x402   : > { %v569_v29 = vsub.f32 %v1490_v49, %v567_v28 }
 0x404   : > { %v570_v30 = vmul.f32 1.442695, %v569_v29 }
 0x405   : > { %v592_v31 = vpop.permute.xlu1 %591 }
 0x406   : > { %1301 = vpow2.f32 %v570_v30  ;;  %v597_v32 = vsel %vm450_vm5, %v592_v31, 0 }
 0x407   : > { %1208 = vmatpush3.bf16.msra.mxu0 %v597_v32 }
 0x408   : > { %1219 = vmatprep.subr.bf16.mxu0 %v1339_v0 }
 0x40b   : > { %v717_v33 = vpop.permute.xlu0 %716 }
 0x40c   : > { %v719_v24 = vsub.f32 %v1495_v55, %v717_v33 }
 0x40e   : > { %v720_v26 = vmul.f32 1.442695, %v719_v24 }
 0x410   : > { %v1302_v27 = vpop.eup %1301  ;;  %1303 = vpow2.f32 %v720_v26 }
 0x411   : > { %v574_v34 = vsel %vm368_vm1, %v1302_v27, 0.0  ;;  %v587_v35 = vpack.c.bf16 %v1302_v27, %v1302_v27 }
 0x412   : > { %575 = vadd.xlane.f32.xlu0 %v574_v34 }
 0x413   : > { %1210 = vmatmul.mubr.msk.bf16.vlgmr.msra.gmra.mrb[4].mxu0 %vm368_vm1, %v587_v35 }
 0x414   : > { %1221 = vmatprep.mubr.msk.bf16.mxu0 %vm1340_vm0, %v1339_v0 }
 0x415   : > { %v867_v36 = vpop.permute.xlu1 %866 }
 0x416   : > { %v869_v37 = vsub.f32 %v1500_v61, %v867_v36 }
 0x418   : > { %v870_v38 = vmul.f32 1.442695, %v869_v37 }
 0x419   : > { %v742_v39 = vpop.permute.xlu1 %741 }
 0x41a   : > { %v1304_v40 = vpop.eup %1303  ;;  %1305 = vpow2.f32 %v870_v38  ;;  %v747_v41 = vsel %vm450_vm5, %v742_v39, 0 }
 0x41b   : > { %1220 = vmatpush3.bf16.msra.mxu0 %v747_v41  ;;  %v724_v42 = vsel %vm368_vm1, %v1304_v40, 0.0  ;;  %v737_v43 = vpack.c.bf16 %v1304_v40, %v1304_v40  ;;  %1307 = vpow2.f32 %v562_v50 }
 0x41c   : > { %725 = vadd.xlane.f32.xlu1 %v724_v42  ;;  %1231 = vmatprep.subr.bf16.mxu0 %v1339_v0  ;;  %1309 = vpow2.f32 %v712_v51 }
 0x41d   : > { %v892_v45 = vpop.permute.xlu1 %891  ;;  %1311 = vpow2.f32 %v862_v1 }
 0x41e   : > { %1222 = vmatmul.mubr.msk.bf16.vlgmr.msra.gmra.mrb[8].mxu0 %vm368_vm1, %v737_v43  ;;  %v897_v46 = vsel %vm450_vm5, %v892_v45, 0 }
 0x41f   : > { %1232 = vmatpush3.bf16.msra.mxu0 %v897_v46  ;;  %1233 = vmatprep.mubr.msk.bf16.mxu0 %vm1340_vm0, %v1339_v0 }
 0x424   : > { %v1306_v47 = vpop.eup %1305 }
 0x425   : > { %v874_v48 = vsel %vm368_vm1, %v1306_v47, 0.0  ;;  %v887_v49 = vpack.c.bf16 %v1306_v47, %v1306_v47  ;;  %v1308_v52 = vpop.eup %1307 }
 0x426   : > { %875 = vadd.xlane.f32.xlu0 %v874_v48  ;;  %v1310_v0 = vpop.eup %1309 }
 0x427   : > { %1234 = vmatmul.mubr.msk.bf16.vlgmr.msra.gmra.mrb[12].mxu0 %vm368_vm1, %v887_v49 }
 0x43c   : > { %583 = vperm.xlu0 %1280, %v1308_v52  }
 0x440   : > { %1281 = vset.pattern.permute.xlu0 %v1347_v4 }
 0x441   : > { %733 = vperm.xlu0 %1281, %v1310_v0  }
 0x445   : > { %1284 = vset.pattern.permute.xlu0 %v1346_v3 }
 0x44f   : > { %v435_v55 = vpop.xlane.xlu1 %434 }
 0x450   : > { %v436_v56 = vadd.f32 %v435_v55, %v432_v54 }
 0x452   : > { %438 = vst.msk [vmem:[#allocation3] sm:$0xff] %vm437_vm4, %v436_v56 }
 0x453   : > { %v443_v57 = vpop.permute.xlu1 %442 }
 0x454   : > { %v445_v58 = vmul.f32 0.0, %v443_v57 }
 0x456   : > { %v494_v59 = vadd.f32 %v1487_v44, %v445_v58  ;;  %v1312_v44 = vpop.eup %1311 }
 0x458   : > { %495 = vst.msk [vmem:[#allocation4] sm:$0xff] %vm368_vm1, %v494_v59 }
 0x459   : > { %v572_v60 = vld [vmem:[#allocation3] sm:$0xff] }
 0x45a   : > { %v573_v61 = vmul.f32 %v1308_v52, %v572_v60 }
 0x45f   : > { %v580_v31 = vld [vmem:[#allocation4] sm:$0xff] }
 0x49f   : > { %v576_v62 = vpop.xlane.xlu0 %575 }
 0x4a0   : > { %v577_v63 = vadd.f32 %v576_v62, %v573_v61 }
 0x4a2   : > { %579 = vst.msk [vmem:[#allocation3] sm:$0xff] %vm578_vm6, %v577_v63 }
 0x4a9   : > { %v722_v2 = vld [vmem:[#allocation3] sm:$0xff]  ;;  %v726_v5 = vpop.xlane.xlu1 %725 }
 0x4aa   : > { %v723_v3 = vmul.f32 %v1310_v0, %v722_v2 }
 0x4ac   : > { %v727_v6 = vadd.f32 %v726_v5, %v723_v3 }
 0x4ae   : > { %729 = vst.msk [vmem:[#allocation3] sm:$0xff] %vm728_vm7, %v727_v6 }
 0x4b3   : > { %v876_v9 = vpop.xlane.xlu0 %875 }
 0x4b5   : > { %v872_v7 = vld [vmem:[#allocation3] sm:$0xff] }
 0x4b6   : > { %v873_v8 = vmul.f32 %v1312_v44, %v872_v7 }
 0x4b8   : > { %v877_v11 = vadd.f32 %v876_v9, %v873_v8 }
 0x4ba   : > { %879 = vst.msk [vmem:[#allocation3] sm:$0xff] %vm878_vm8, %v877_v11 }
 0x4bb   : > { %v584_v30 = vpop.permute.xlu0 %583 }
 0x4bc   : > { %v586_v32 = vmul.f32 %v584_v30, %v580_v31 }
 0x4c0   : > { %v734_v24 = vpop.permute.xlu0 %733 }
 0x4c1   : > { %v950_v16 = vld [vmem:[#allocation3] sm:$0xff] }
 0x4c2   : > { %1313 = vrcp.f32 %v950_v16 }
 0x4cc   : > { %v1314_v22 = vpop.eup %1313 }
 0x4e6   : > { %v633_v12 = vpop.f32.mrb[4].mxu0 }
 0x4e7   : > { %v1211_v13 = vpop.f32.mrb[5].mxu0  ;;  %640 = vrot.lane.b32.xlu1 %v633_v12, %s1349_s9 }
 0x4e8   : > { %v636_v14 = vpop.f32.mrb[6].mxu0 }
 0x4e9   : > { %v1212_v15 = vpop.f32.mrb[7].mxu0 }
 0x4f1   : > { %v783_v18 = vpop.f32.mrb[8].mxu0 }
 0x4f2   : > { %v1223_v19 = vpop.f32.mrb[9].mxu0  ;;  %790 = vrot.lane.b32.xlu1 %v783_v18, %s1350_s10 }
 0x4f3   : > { %v786_v20 = vpop.f32.mrb[10].mxu0 }
 0x4f4   : > { %v1224_v21 = vpop.f32.mrb[11].mxu0 }
 0x4f6   : > { %883 = vperm.xlu1 %1282, %v1312_v44  }
 0x4fa   : > { %v933_v23 = vpop.f32.mrb[12].mxu0  ;;  %1283 = vset.pattern.permute.xlu1 %v1342_v17 }
 0x4fb   : > { %v1235_v25 = vpop.f32.mrb[13].mxu0  ;;  %940 = vrot.lane.b32.xlu0 %v933_v23, %s1351_s11  ;;  %955 = vperm.xlu1 %1283, %v1314_v22  }
 0x4fc   : > { %v936_v28 = vpop.f32.mrb[14].mxu0 }
 0x4fd   : > { %v1236_v29 = vpop.f32.mrb[15].mxu0 }
 0x4ff   : > { %965 = vperm.xlu0 %1284, %v1314_v22   ;;  %1285 = vset.pattern.permute.xlu1 %v1347_v4 }
 0x500   : > { %975 = vperm.xlu1 %1285, %v1314_v22  }
 0x503   : > { %1287 = vset.pattern.permute.xlu0 %v1348_v10 }
 0x504   : > { %1286 = vset.pattern.permute.xlu1 %v1348_v10 }
 0x505   : > { %985 = vperm.xlu1 %1286, %v1314_v22  }
 0x559   : > { %v641_v17 = vpop.permute.xlu1 %640 }
 0x55a   : > { %v643_v33 = vadd.f32 %v641_v17, %v586_v32 }
 0x55c   : > { %645 = vst.msk [vmem:[#allocation4] sm:$0xff] %vm644_vm9, %v643_v33 }
 0x563   : > { %v730_v26 = vld [vmem:[#allocation4] sm:$0xff] }
 0x564   : > { %v736_v27 = vmul.f32 %v734_v24, %v730_v26  ;;  %v791_v34 = vpop.permute.xlu1 %790 }
 0x566   : > { %v793_v4 = vadd.f32 %v791_v34, %v736_v27 }
 0x568   : > { %795 = vst.msk [vmem:[#allocation4] sm:$0xff] %vm794_vm10, %v793_v4 }
 0x56d   : > { %v941_v37 = vpop.permute.xlu0 %940 }
 0x56f   : > { %v880_v35 = vld [vmem:[#allocation4] sm:$0xff] }
 0x575   : > { %v884_v36 = vpop.permute.xlu1 %883 }
 0x576   : > { %v886_v10 = vmul.f32 %v884_v36, %v880_v35 }
 0x578   : > { %v943_v38 = vadd.f32 %v941_v37, %v886_v10 }
 0x57a   : > { %945 = vst.msk [vmem:[#allocation4] sm:$0xff] %vm944_vm11, %v943_v38  ;;  %v956_v40 = vpop.permute.xlu1 %955 }
 0x57e   : > { %v966_v42 = vpop.permute.xlu0 %965 }
 0x57f   : > { %v976_v47 = vpop.permute.xlu1 %975 }
 0x581   : > { %v952_v39 = vld [vmem:[#allocation4] sm:$0xff] }
 0x582   : > { %v958_v41 = vmul.f32 %v956_v40, %v952_v39 }
 0x584   : > { %959 = vst.msk [vmem:[#allocation4] sm:$0xff] %vm368_vm1, %v958_v41  ;;  %v986_v50 = vpop.permute.xlu1 %985 }
 0x58b   : > { %v962_v43 = vld [vmem:[#allocation4] sm:$0xff] }
 0x58c   : > { %v968_v45 = vmul.f32 %v966_v42, %v962_v43 }
 0x58e   : > { %969 = vst.msk [vmem:[#allocation4] sm:$0xff] %vm644_vm9, %v968_v45 }
 0x595   : > { %v972_v46 = vld [vmem:[#allocation4] sm:$0xff] }
 0x596   : > { %v978_v48 = vmul.f32 %v976_v47, %v972_v46 }
 0x598   : > { %979 = vst.msk [vmem:[#allocation4] sm:$0xff] %vm794_vm10, %v978_v48 }
 0x59f   : > { %v982_v49 = vld [vmem:[#allocation4] sm:$0xff] }
 0x5a0   : > { %v988_v51 = vmul.f32 %v986_v50, %v982_v49 }
 0x5a2   : > { %989 = vst.msk [vmem:[#allocation4] sm:$0xff] %vm944_vm11, %v988_v51 }
 0x5a9   : > { %v990_v52 = vld [vmem:[#allocation4] sm:$0xff] }
 0x5aa   : > { %v991_v0 = vpack.c.bf16 %v990_v52, %v990_v52 }
 0x5ac   : > { %992 = vst [vmem:[%s335_s19] sm:$0xf] %v991_v0 }
 0x5ad PF: > { %s14_s17 = sadd.s32 1, %s1337_s17   ;;  %s1615_s15 = smov %s1333_s16 }
 0x5ae   : > { %p11_p5 = scmp.ge.s32.totalorder %s14_s17, 4   ;;  %s1616_s16 = smov %s1618_s18 }
 0x5b0   :  { %13 = sbr.rel (!%p11_p5) target bundleno = 2 (0x2), region = 83 }

// kernel: _lambda_.32
= control target key start
LH: loop header
LB: loop body
LE: loop exit
PB: predicated region body
PF: predicated region fallthrough
CT: control target
= control target key end

     0   :  { %v222_v0 = vmov 0.0   ;;  %vm223_vm0 = vmmov 0   ;;  %s280_s1 = inlined_call_operand.vmem [shape: bf16[128,128], index: 1, kind: input, shape index: {}]   ;;  %s281_s0 = inlined_call_operand.vmem [shape: f32[16,128], index: 0, kind: input, shape index: {}]   ;;  %s282_s2 = inlined_call_operand.vmem [shape: f32[1,128], index: 2, kind: input, shape index: {}]   ;;  %s283_s3 = inlined_call_operand.vmem [shape: bf16[16,128], index: 3, kind: output, shape index: {}]  }
   0x1   :  { %192 = vmatprep.subr.bf16.mxu0 %v222_v0  ;;  %v214_v1 = vld [vmem:[%s280_s1] sm:$0xff]   ;;  %208 = vmatprep.mubr.msk.bf16.mxu0 %vm223_vm0, %v222_v0  ;;  %v215_v2 = vld [vmem:[%s280_s1 + $0x8] sm:$0xff]   ;;  %v216_v3 = vld [vmem:[%s280_s1 + $0x10] sm:$0xff]  }
   0x2   :  { %193 = vmatpush3.bf16.msra.mxu0 %v214_v1  ;;  %v217_v4 = vld [vmem:[%s280_s1 + $0x18] sm:$0xff]   ;;  %v218_v5 = vld [vmem:[%s280_s1 + $0x20] sm:$0xff]   ;;  %v219_v6 = vld [vmem:[%s280_s1 + $0x28] sm:$0xff]  }
   0x3   :  { %194 = vmatprep.subr.bf16.mxu0 %v222_v0  ;;  %v220_v7 = vld [vmem:[%s280_s1 + $0x30] sm:$0xff]   ;;  %v221_v8 = vld [vmem:[%s280_s1 + $0x38] sm:$0xff]   ;;  %v23_v9 = vld [vmem:[%s281_s0] sm:$0xff] }
   0x4   :  { %v24_v10 = vld [vmem:[%s281_s0 + $0x8] sm:$0xff]  ;;  %v173_v12 = vld [vmem:[%s282_s2] ss:$0 sm:$0xff] }
   0x5   :  { %v25_v11 = vpack.c.bf16 %v24_v10, %v23_v9 }
   0x6   :  { %195 = vmatpush3.bf16.msra.mxu0 %v215_v2 }
   0x7   :  { %196 = vmatprep.subr.bf16.mxu0 %v222_v0 }
   0xa   :  { %197 = vmatpush3.bf16.msra.mxu0 %v216_v3 }
   0xb   :  { %198 = vmatprep.subr.bf16.mxu0 %v222_v0 }
   0xe   :  { %199 = vmatpush3.bf16.msra.mxu0 %v217_v4 }
   0xf   :  { %200 = vmatprep.subr.bf16.mxu0 %v222_v0 }
  0x12   :  { %201 = vmatpush3.bf16.msra.mxu0 %v218_v5 }
  0x13   :  { %202 = vmatprep.subr.bf16.mxu0 %v222_v0 }
  0x16   :  { %203 = vmatpush3.bf16.msra.mxu0 %v219_v6 }
  0x17   :  { %204 = vmatprep.subr.bf16.mxu0 %v222_v0 }
  0x1a   :  { %205 = vmatpush3.bf16.msra.mxu0 %v220_v7 }
  0x1b   :  { %206 = vmatprep.subr.bf16.mxu0 %v222_v0 }
  0x1e   :  { %207 = vmatpush3.bf16.msra.mxu0 %v221_v8 }
  0x21   :  { %209 = vmatmul.mubr.bf16.vlgmr.msra.gmra.mrb[0].mxu0 %v25_v11 }
  0xf4   :  { %v124_v13 = vpop.f32.mrb[0].mxu0 }
  0xf5   :  { %v147_v14 = vadd.f32 %v173_v12, %v124_v13  ;;  %v210_v15 = vpop.f32.mrb[1].mxu0 }
  0xf6   :  { %v127_v16 = vpop.f32.mrb[2].mxu0 }
  0xf7   :  { %v148_v17 = vadd.f32 %v173_v12, %v127_v16  ;;  %v211_v18 = vpop.f32.mrb[3].mxu0  ;;  %v149_v19 = vmax.f32 %v147_v14, 0.0 }
  0xf9   :  { %v150_v20 = vmax.f32 %v148_v17, 0.0 }
  0xfb   :  { %v181_v21 = vpack.c.bf16 %v150_v20, %v149_v19 }
  0xfd   :  { %182 = vst [vmem:[%s283_s3] sm:$0xff] %v181_v21  }

// kernel: _lambda_.43
= control target key start
LH: loop header
LB: loop body
LE: loop exit
PB: predicated region body
PF: predicated region fallthrough
CT: control target
= control target key end

     0   :  { %v263_v1 = vmov 0   ;;  %v186_v20 = vlaneseq  ;;  %s347_s1 = inlined_call_operand.vmem [shape: bf16[128,256], index: 1, kind: input, shape index: {}]   ;;  %s348_s0 = inlined_call_operand.vmem [shape: f32[16,128], index: 0, kind: input, shape index: {}]   ;;  %s349_s2 = inlined_call_operand.vmem [shape: f32[1,256], index: 2, kind: input, shape index: {}]   ;;  %s350_s3 = inlined_call_operand.vmem [shape: bf16[16,256], index: 3, kind: output, shape index: {}]  }
   0x1   :  { %v239_v0 = vld [vmem:[%s347_s1 + $0x4] ss:$8 sps:$4 sm:$0xff]   ;;  %158 = vmatprep.mubr.bf16.mxu0 %v263_v1  ;;  %v241_v2 = vld [vmem:[%s347_s1] ss:$8 sps:$4 sm:$0xff]   ;;  %v242_v3 = vld [vmem:[%s347_s1 + $0x14] ss:$8 sps:$4 sm:$0xff]  }
   0x2   :  { %126 = vmatprep.subr.bf16.mxu0 %v239_v0  ;;  %v244_v4 = vld [vmem:[%s347_s1 + $0x10] ss:$8 sps:$4 sm:$0xff]   ;;  %v245_v5 = vld [vmem:[%s347_s1 + $0x24] ss:$8 sps:$4 sm:$0xff]   ;;  %v247_v6 = vld [vmem:[%s347_s1 + $0x20] ss:$8 sps:$4 sm:$0xff]  }
   0x3   :  { %127 = vmatpush1.bf16.msra.mxu0 %v241_v2  ;;  %v248_v7 = vld [vmem:[%s347_s1 + $0x34] ss:$8 sps:$4 sm:$0xff]   ;;  %v250_v8 = vld [vmem:[%s347_s1 + $0x30] ss:$8 sps:$4 sm:$0xff]   ;;  %v251_v9 = vld [vmem:[%s347_s1 + $0x44] ss:$8 sps:$4 sm:$0xff]  }
   0x4   :  { %128 = vmatprep.subr.bf16.mxu0 %v242_v3  ;;  %v253_v10 = vld [vmem:[%s347_s1 + $0x40] ss:$8 sps:$4 sm:$0xff]   ;;  %v254_v11 = vld [vmem:[%s347_s1 + $0x54] ss:$8 sps:$4 sm:$0xff]   ;;  %v256_v12 = vld [vmem:[%s347_s1 + $0x50] ss:$8 sps:$4 sm:$0xff]  }
   0x5   :  { %v257_v13 = vld [vmem:[%s347_s1 + $0x64] ss:$8 sps:$4 sm:$0xff]   ;;  %v259_v14 = vld [vmem:[%s347_s1 + $0x60] ss:$8 sps:$4 sm:$0xff]   ;;  %v260_v15 = vld [vmem:[%s347_s1 + $0x74] ss:$8 sps:$4 sm:$0xff]  }
   0x6   :  { %v262_v16 = vld [vmem:[%s347_s1 + $0x70] ss:$8 sps:$4 sm:$0xff]   ;;  %v27_v17 = vld [vmem:[%s348_s0] sm:$0xff]  ;;  %v28_v18 = vld [vmem:[%s348_s0 + $0x8] sm:$0xff]  ;;  %v187_v21 = vshrl.u32 %v186_v20, 7 }
   0x7   :  { %129 = vmatpush1.bf16.msra.mxu0 %v244_v4  ;;  %v29_v19 = vpack.c.bf16 %v28_v18, %v27_v17  ;;  %v184_v23 = vld [vmem:[%s349_s2] sm:$0x3] }
   0x8   :  { %130 = vmatprep.subr.bf16.mxu0 %v245_v5  ;;  %v188_v22 = vsub.s32 0, %v187_v21  ;;  %v192_v24 = vsub.s32 1, %v187_v21 }
   0xa   :  { %v189_v25 = vrot.slane %v184_v23, %v188_v22  ;;  %v193_v26 = vrot.slane %v184_v23, %v192_v24 }
   0xb   :  { %131 = vmatpush1.bf16.msra.mxu0 %v247_v6 }
   0xc   :  { %132 = vmatprep.subr.bf16.mxu0 %v248_v7 }
   0xf   :  { %133 = vmatpush1.bf16.msra.mxu0 %v250_v8 }
  0x10   :  { %134 = vmatprep.subr.bf16.mxu0 %v251_v9 }
  0x13   :  { %135 = vmatpush1.bf16.msra.mxu0 %v253_v10 }
  0x14   :  { %136 = vmatprep.subr.bf16.mxu0 %v254_v11 }
  0x17   :  { %137 = vmatpush1.bf16.msra.mxu0 %v256_v12 }
  0x18   :  { %138 = vmatprep.subr.bf16.mxu0 %v257_v13 }
  0x1b   :  { %139 = vmatpush1.bf16.msra.mxu0 %v259_v14 }
  0x1c   :  { %140 = vmatprep.subr.bf16.mxu0 %v260_v15 }
  0x1f   :  { %141 = vmatpush1.bf16.msra.mxu0 %v262_v16 }
  0x22   :  { %159 = vmatmul.mubr.bf16.vlgmr.msra.gmra.mrb[0].mxu0 %v29_v19 }
  0xf5   :  { %v160_v27 = vpop.f32.mrb[0].mxu0 }
  0xf6   :  { %v196_v28 = vadd.f32 %v189_v25, %v160_v27  ;;  %v162_v29 = vpop.f32.mrb[1].mxu0 }
  0xf7   :  { %v197_v30 = vadd.f32 %v193_v26, %v162_v29  ;;  %v164_v31 = vpop.f32.mrb[2].mxu0 }
  0xf8   :  { %v198_v32 = vadd.f32 %v189_v25, %v164_v31  ;;  %v166_v33 = vpop.f32.mrb[3].mxu0 }
  0xf9   :  { %v236_v34 = vpack.c.bf16 %v197_v30, %v196_v28  ;;  %v199_v35 = vadd.f32 %v193_v26, %v166_v33 }
  0xfb   :  { %212 = vst [vmem:[%s350_s3] sm:$0xff] %v236_v34  ;;  %v237_v36 = vpack.c.bf16 %v199_v35, %v198_v32 }
  0xfd   :  { %213 = vst [vmem:[%s350_s3 + $0x8] sm:$0xff] %v237_v36 }

// kernel: _lambda_.30
= control target key start
LH: loop header
LB: loop body
LE: loop exit
PB: predicated region body
PF: predicated region fallthrough
CT: control target
= control target key end

     0   :  { %s1364_s15 = smov 0   ;;  %s1366_s16 = smov 0   ;;  %s1596_s0 = inlined_call_operand.vmem [shape: f32[2,1,8], index: 0, kind: input, shape index: {}]   ;;  %s1597_s1 = inlined_call_operand.vmem [shape: bf16[2,8,384], index: 1, kind: input, shape index: {}, may-alias: {1,2,3}]   ;;  %s1598_s2 = inlined_call_operand.vmem [shape: bf16[2,8,384], index: 2, kind: input, shape index: {}, may-alias: {1,2,3}]   ;;  %s1599_s3 = inlined_call_operand.vmem [shape: bf16[2,8,384], index: 3, kind: input, shape index: {}, may-alias: {1,2,3}]   ;;  %s1600_s4 = inlined_call_operand.vmem [shape: bf16[2,8,128], index: 4, kind: output, shape index: {}]  }
   0x1   :  { %s1368_s17 = smov 0  }
   0x2 LB: > { %s33_s18 = sadd.s32 1, %s1320_s16  ;;  %p1127_p0 = scmp.ge.s32.totalorder %s1324_s17, 1  ;;  %s1324_s17 = sphi %s1368_s17, %s14_s17   ;;  %s1320_s16 = sphi %s1366_s16, %s1602_s16   ;;  %s1316_s15 = sphi %s1364_s15, %s1601_s15  }
   0x3   : > { %p35_p1 = scmp.ge.s32.totalorder %s33_s18, 2  ;;  %p236_p2 = scmp.lt.s32.totalorder %s1324_s17, 3 }
   0x5   : > { %s1604_s18 = smov (%p35_p1, %s33_s18), 0  ;;  %p237_p3 = pnand %p1127_p0, %p236_p2 }
   0x6   : > { %p294_p4 = scmp.lt.s32.totalorder (!%p237_p3), %s1316_s15, 1  ;;  %v1326_v0 = vmov (!%p237_p3), 0.0   ;;  %vm1327_vm0 = vmmov (!%p237_p3), 0   ;;  %vm355_vm1 = vcmask (!%p237_p3), 64512   ;;  %vm341_vm2 = vcmask (!%p237_p3), 31744   ;;  %s1330_s29 = smov (!%p237_p3), 120  }
   0x7   : > { %240 = sbr.rel (%p237_p3) target bundleno = 1453 (0x5ad), region = 36  ;;  %1176 = vmatprep.subr.bf16.mxu0 (!%p237_p3), %v1326_v0  ;;  %344 = vst [vmem:[#allocation4] sm:$0xff] (!%p237_p3), %v1326_v0  ;;  %1178 = vmatprep.mubr.msk.bf16.mxu0 (!%p237_p3), %vm1327_vm0, %v1326_v0  ;;  %v1328_v4 = vmov (!%p237_p3), -1e+30   ;;  %343 = vst.msk [vmem:[#allocation3] sm:$0xff] (!%p237_p3), %vm341_vm2, %v1326_v0  ;;  %v1329_v12 = vmov (!%p237_p3), 0  }
   0x8   : > { %1182 = vmatprep.subr.bf16.mxu1 (!%p237_p3), %v1326_v0  ;;  %1184 = vmatprep.mubr.msk.bf16.mxu1 (!%p237_p3), %vm1327_vm0, %v1326_v0  ;;  %342 = vst.msk [vmem:[#allocation2] sm:$0xff] (!%p237_p3), %vm341_vm2, %v1328_v4  ;;  %s1331_s30 = smov (!%p237_p3), 112   ;;  %s1332_s5 = smov (!%p237_p3), 104   ;;  %vm424_vm3 = vcmask (!%p237_p3), 7168   ;;  %vm437_vm4 = vcmask (!%p237_p3), 1043456   ;;  %v1333_v61 = vmov (!%p237_p3), 1  }
   0x9   : > { %1262 = vset.pattern.permute.xlu0 (!%p237_p3), %v1329_v12  ;;  %1263 = vset.pattern.permute.xlu1 (!%p237_p3), %v1333_v61  ;;  %v1334_v62 = vmov (!%p237_p3), 2   ;;  %vm565_vm5 = vcmask (!%p237_p3), 15368   ;;  %vm715_vm6 = vcmask (!%p237_p3), 23568   ;;  %vm865_vm7 = vcmask (!%p237_p3), 31768   ;;  %s1336_s9 = smov (!%p237_p3), 8   ;;  %s1337_s10 = smov (!%p237_p3), 16  }
   0xa   : > { %s1338_s11 = smov (!%p237_p3), 24   ;;  %vm631_vm8 = vcmask (!%p237_p3), 130112   ;;  %vm781_vm9 = vcmask (!%p237_p3), 195712   ;;  %vm931_vm10 = vcmask (!%p237_p3), 261312  }
   0xe   : > { %s1606_s15 = smov (!%p294_p4, %s1316_s15), 1 }
   0xf   : > { %s1392_s19 = smul.u32 12, %s1606_s15  ;;  %s299_s28 = scalar_lea.vmem %s1596_s0, %s1606_s15  ;;  %v1435_v19 = vld [vmem:[#allocation2] sm:$0xff] }
  0x10   : > { %v1418_v5 = vld [vmem:[%s299_s28] ss:$0 sm:$0xff]  ;;  %s1131_s12 = sshll.u32 %s1606_s15, 2 }
  0x11   : > { %s1398_s22 = scalar_lea.vmem %s1598_s2, %s1392_s19  ;;  %s1405_s25 = scalar_lea.vmem %s1597_s1, %s1392_s19 }
  0x12   : > { %v1132_v1 = vld [vmem:[%s1398_s22 + $0x4] sm:$0xf]  ;;  %v346_v3 = vld [vmem:[%s1405_s25] sm:$0xf]  ;;  %s1449_s8 = scalar_lea.vmem %s1599_s3, %s1392_s19  ;;  %s335_s19 = scalar_lea.vmem %s1600_s4, %s1131_s12 }
  0x13   : > { %v360_v2 = vsel %vm355_vm1, %v1132_v1, 0  ;;  %v1275_v13 = vld [vmem:[%s1398_s22 + $0x4] ss:$0 sps:$4 sm:$0xff]   ;;  %v1276_v14 = vld [vmem:[%s1405_s25] ss:$0 sps:$4 sm:$0xff]  }
  0x14   : > { %1177 = vmatpush3.bf16.xpose.msra.mxu0 %v360_v2  ;;  %495 = vrot.lane.b32.xlu1 %v1275_v13, %s1330_s29  ;;  %v1277_v15 = vld [vmem:[%s1398_s22 + $0x4] ss:$0 sps:$4 sm:$0xff]   ;;  %v1278_v16 = vld [vmem:[%s1405_s25] ss:$0 sps:$4 sm:$0xff]   ;;  %v1133_v23 = vld [vmem:[%s1449_s8 + $0x8] sm:$0xf] }
  0x15   : > { %1194 = vmatprep.subr.bf16.mxu0 %v1326_v0  ;;  %v1279_v17 = vld [vmem:[%s1398_s22 + $0x4] ss:$0 sps:$4 sm:$0xff]   ;;  %v1280_v18 = vld [vmem:[%s1405_s25] ss:$0 sps:$4 sm:$0xff]   ;;  %v439_v24 = vsel %vm437_vm4, %v1133_v23, 0 }
  0x16   : > { %1183 = vmatpush3.bf16.msra.mxu1 %v439_v24  ;;  %v1281_v4 = vld [vmem:[%s1449_s8 + $0x8] ss:$0 sps:$4 sm:$0xff]  }
  0x17   : > { %1188 = vmatprep.subr.bf16.mxu1 %v1326_v0 }
  0x18   : > { %490 = vrot.lane.b32.xlu1 %v1276_v14, %s1330_s29 }
  0x1b   : > { %1179 = vmatmul.mubr.msk.bf16.vlgmr.msra.gmra.mrb[0].mxu0 %vm355_vm1, %v346_v3 }
  0x1c   : > { %1196 = vmatprep.mubr.msk.bf16.mxu0 %vm1327_vm0, %v1326_v0  ;;  %645 = vrot.lane.b32.xlu1 %v1277_v15, %s1331_s30  ;;  %v1282_v15 = vld [vmem:[%s1449_s8 + $0x8] ss:$0 sps:$4 sm:$0xff]  }
  0x20   : > { %640 = vrot.lane.b32.xlu1 %v1278_v16, %s1331_s30  ;;  %v1283_v16 = vld [vmem:[%s1449_s8 + $0x8] ss:$0 sps:$4 sm:$0xff]  }
  0x24   : > { %795 = vrot.lane.b32.xlu1 %v1279_v17, %s1332_s5 }
  0x28   : > { %790 = vrot.lane.b32.xlu1 %v1280_v18, %s1332_s5 }
  0x86   : > { %v496_v28 = vpop.permute.xlu1 %495 }
  0x87   : > { %v501_v31 = vsel %vm355_vm1, %v496_v28, 0 }
  0x8a   : > { %v491_v29 = vpop.permute.xlu1 %490 }
  0x8e   : > { %v646_v33 = vpop.permute.xlu1 %645 }
  0x8f   : > { %v651_v35 = vsel %vm355_vm1, %v646_v33, 0 }
  0x92   : > { %v641_v34 = vpop.permute.xlu1 %640 }
  0x96   : > { %v796_v36 = vpop.permute.xlu1 %795 }
  0x97   : > { %v801_v37 = vsel %vm355_vm1, %v796_v36, 0 }
  0x9a   : > { %v791_v38 = vpop.permute.xlu1 %790 }
  0xee   : > { %v396_v6 = vpop.f32.mrb[0].mxu0 }
  0xef   : > { %v397_v7 = vadd.f32 %v1418_v5, %v396_v6  ;;  %v1180_v8 = vpop.f32.mrb[1].mxu0 }
  0xf0   : > { %v399_v9 = vpop.f32.mrb[2].mxu0 }
  0xf1   : > { %v1181_v10 = vpop.f32.mrb[3].mxu0  ;;  %v403_v11 = vsel %vm355_vm1, %v397_v7, -inf }
  0xf2   : > { %404 = vmax.xlane.f32.xlu0 %v403_v11 }
 0x17f   : > { %v405_v20 = vpop.xlane.xlu0 %404 }
 0x180   : > { %v1438_v21 = vmax.f32 %v1435_v19, %v405_v20 }
 0x182   : > { %v407_v22 = vsub.f32 %v1435_v19, %v1438_v21  ;;  %483 = vst.msk [vmem:[#allocation2] sm:$0xff] %vm424_vm3, %v1438_v21  ;;  %412 = vperm.xlu0 %1262, %v1438_v21  }
 0x184   : > { %v408_v18 = vmul.f32 1.442695, %v407_v22 }
 0x186   : > { %1264 = vset.pattern.permute.xlu0 %v1334_v62 }
 0x189   : > { %v1492_v1 = vld [vmem:[#allocation2] sm:$0xff] }
 0x201   : > { %v413_v25 = vpop.permute.xlu0 %412 }
 0x202   : > { %v415_v26 = vsub.f32 %v397_v7, %v413_v25 }
 0x204   : > { %v416_v27 = vmul.f32 1.442695, %v415_v26 }
 0x206   : > { %1284 = vpow2.f32 %v416_v27 }
 0x207   : > { %1286 = vpow2.f32 %v408_v18 }
 0x210   : > { %v1454_v30 = vpop.eup %1284 }
 0x211   : > { %v433_v32 = vpack.c.bf16 %v1454_v30, %v1454_v30  ;;  %v420_v17 = vsel %vm355_vm1, %v1454_v30, 0.0  ;;  %v1287_v20 = vpop.eup %1286 }
 0x213   : > { %1185 = vmatmul.mubr.msk.bf16.vlgmr.msra.gmra.mrb[0].mxu1 %vm355_vm1, %v433_v32 }
 0x214   : > { %1189 = vmatpush3.bf16.xpose.msra.mxu1 %v501_v31  ;;  %1190 = vmatprep.mubr.msk.bf16.mxu1 %vm1327_vm0, %v1326_v0 }
 0x215   : > { %1200 = vmatprep.subr.bf16.mxu1 %v1326_v0 }
 0x21b   : > { %1191 = vmatmul.mubr.msk.bf16.vlgmr.msra.gmra.mrb[4].mxu1 %vm355_vm1, %v491_v29 }
 0x21c   : > { %1201 = vmatpush3.bf16.xpose.msra.mxu1 %v651_v35  ;;  %1202 = vmatprep.mubr.msk.bf16.mxu1 %vm1327_vm0, %v1326_v0 }
 0x21d   : > { %1212 = vmatprep.subr.bf16.mxu1 %v1326_v0 }
 0x223   : > { %1203 = vmatmul.mubr.msk.bf16.vlgmr.msra.gmra.mrb[8].mxu1 %vm355_vm1, %v641_v34 }
 0x224   : > { %1213 = vmatpush3.bf16.xpose.msra.mxu1 %v801_v37  ;;  %1214 = vmatprep.mubr.msk.bf16.mxu1 %vm1327_vm0, %v1326_v0 }
 0x22b   : > { %1215 = vmatmul.mubr.msk.bf16.vlgmr.msra.gmra.mrb[12].mxu1 %vm355_vm1, %v791_v38 }
 0x2e6   : > { %v1473_v39 = vpop.f32.mrb[0].mxu1 }
 0x2e7   : > { %v1186_v40 = vpop.f32.mrb[1].mxu1 }
 0x2e8   : > { %v478_v41 = vpop.f32.mrb[2].mxu1 }
 0x2e9   : > { %v1187_v42 = vpop.f32.mrb[3].mxu1 }
 0x2ee   : > { %v537_v43 = vpop.f32.mrb[4].mxu1 }
 0x2ef   : > { %v1476_v44 = vadd.f32 %v1418_v5, %v537_v43  ;;  %v1192_v45 = vpop.f32.mrb[5].mxu1 }
 0x2f0   : > { %v540_v46 = vpop.f32.mrb[6].mxu1 }
 0x2f1   : > { %v1193_v47 = vpop.f32.mrb[7].mxu1  ;;  %v544_v48 = vsel %vm355_vm1, %v1476_v44, -inf }
 0x2f2   : > { %545 = vmax.xlane.f32.xlu1 %v544_v48  ;;  %v418_v48 = vld [vmem:[#allocation3] sm:$0xff] }
 0x2f6   : > { %v687_v49 = vpop.f32.mrb[8].mxu1 }
 0x2f7   : > { %v1481_v50 = vadd.f32 %v1418_v5, %v687_v49  ;;  %v1204_v51 = vpop.f32.mrb[9].mxu1  ;;  %v419_v49 = vmul.f32 %v1287_v20, %v418_v48 }
 0x2f8   : > { %v690_v52 = vpop.f32.mrb[10].mxu1 }
 0x2f9   : > { %v1205_v53 = vpop.f32.mrb[11].mxu1  ;;  %v694_v54 = vsel %vm355_vm1, %v1481_v50, -inf }
 0x2fa   : > { %695 = vmax.xlane.f32.xlu0 %v694_v54 }
 0x2fe   : > { %v837_v55 = vpop.f32.mrb[12].mxu1 }
 0x2ff   : > { %v1486_v56 = vadd.f32 %v1418_v5, %v837_v55  ;;  %v1216_v57 = vpop.f32.mrb[13].mxu1  ;;  %v1335_v5 = vmov 3  }
 0x300   : > { %v840_v58 = vpop.f32.mrb[14].mxu1 }
 0x301   : > { %v1217_v59 = vpop.f32.mrb[15].mxu1  ;;  %v844_v60 = vsel %vm355_vm1, %v1486_v56, -inf }
 0x302   : > { %845 = vmax.xlane.f32.xlu1 %v844_v60 }
 0x37f   : > { %v546_v63 = vpop.xlane.xlu1 %545 }
 0x380   : > { %v1495_v2 = vmax.f32 %v1492_v1, %v546_v63 }
 0x382   : > { %v548_v3 = vsub.f32 %v1492_v1, %v1495_v2  ;;  %633 = vst.msk [vmem:[#allocation2] sm:$0xff] %vm565_vm5, %v1495_v2  ;;  %553 = vperm.xlu1 %1263, %v1495_v2  }
 0x384   : > { %v549_v45 = vmul.f32 1.442695, %v548_v3 }
 0x386   : > { %578 = vrot.lane.b32.xlu1 %v1281_v4, %s1330_s29 }
 0x387   : > { %1265 = vset.pattern.permute.xlu1 %v1335_v5  ;;  %v696_v6 = vpop.xlane.xlu0 %695 }
 0x389   : > { %v1505_v7 = vld [vmem:[#allocation2] sm:$0xff] }
 0x38a   : > { %v1508_v8 = vmax.f32 %v1505_v7, %v696_v6 }
 0x38c   : > { %v698_v9 = vsub.f32 %v1505_v7, %v1508_v8  ;;  %783 = vst.msk [vmem:[#allocation2] sm:$0xff] %vm715_vm6, %v1508_v8  ;;  %703 = vperm.xlu0 %1264, %v1508_v8  }
 0x38e   : > { %v699_v46 = vmul.f32 1.442695, %v698_v9 }
 0x38f   : > { %v846_v10 = vpop.xlane.xlu1 %845 }
 0x390   : > { %1267 = vset.pattern.permute.xlu0 %v1333_v61 }
 0x393   : > { %v1516_v11 = vld [vmem:[#allocation2] sm:$0xff] }
 0x394   : > { %v1519_v13 = vmax.f32 %v1516_v11, %v846_v10 }
 0x396   : > { %v848_v14 = vsub.f32 %v1516_v11, %v1519_v13  ;;  %933 = vst.msk [vmem:[#allocation2] sm:$0xff] %vm865_vm7, %v1519_v13  ;;  %853 = vperm.xlu1 %1265, %v1519_v13  }
 0x398   : > { %v849_v59 = vmul.f32 1.442695, %v848_v14 }
 0x39a   : > { %728 = vrot.lane.b32.xlu1 %v1282_v15, %s1331_s30 }
 0x39b   : > { %1266 = vset.pattern.permute.xlu1 %v1329_v12 }
 0x39e   : > { %878 = vrot.lane.b32.xlu1 %v1283_v16, %s1332_s5 }
 0x3c2   : > { %421 = vadd.xlane.f32.xlu1 %v420_v17 }
 0x3d3   : > { %429 = vperm.xlu1 %1266, %v1287_v20  }
 0x3d7   : > { %1269 = vset.pattern.permute.xlu1 %v1335_v5 }
 0x401   : > { %v554_v23 = vpop.permute.xlu1 %553 }
 0x402   : > { %v556_v24 = vsub.f32 %v1476_v44, %v554_v23 }
 0x404   : > { %v557_v25 = vmul.f32 1.442695, %v556_v24 }
 0x405   : > { %v579_v26 = vpop.permute.xlu1 %578 }
 0x406   : > { %1288 = vpow2.f32 %v557_v25  ;;  %v584_v27 = vsel %vm437_vm4, %v579_v26, 0 }
 0x407   : > { %1195 = vmatpush3.bf16.msra.mxu0 %v584_v27 }
 0x408   : > { %1206 = vmatprep.subr.bf16.mxu0 %v1326_v0 }
 0x40b   : > { %v704_v28 = vpop.permute.xlu0 %703 }
 0x40c   : > { %v706_v19 = vsub.f32 %v1481_v50, %v704_v28 }
 0x40e   : > { %v707_v21 = vmul.f32 1.442695, %v706_v19 }
 0x410   : > { %v1289_v22 = vpop.eup %1288  ;;  %1290 = vpow2.f32 %v707_v21 }
 0x411   : > { %v561_v29 = vsel %vm355_vm1, %v1289_v22, 0.0  ;;  %v574_v30 = vpack.c.bf16 %v1289_v22, %v1289_v22 }
 0x412   : > { %562 = vadd.xlane.f32.xlu0 %v561_v29 }
 0x413   : > { %1197 = vmatmul.mubr.msk.bf16.vlgmr.msra.gmra.mrb[4].mxu0 %vm355_vm1, %v574_v30 }
 0x414   : > { %1208 = vmatprep.mubr.msk.bf16.mxu0 %vm1327_vm0, %v1326_v0 }
 0x415   : > { %v854_v31 = vpop.permute.xlu1 %853 }
 0x416   : > { %v856_v32 = vsub.f32 %v1486_v56, %v854_v31 }
 0x418   : > { %v857_v33 = vmul.f32 1.442695, %v856_v32 }
 0x419   : > { %v729_v34 = vpop.permute.xlu1 %728 }
 0x41a   : > { %v1291_v35 = vpop.eup %1290  ;;  %1292 = vpow2.f32 %v857_v33  ;;  %v734_v36 = vsel %vm437_vm4, %v729_v34, 0 }
 0x41b   : > { %1207 = vmatpush3.bf16.msra.mxu0 %v734_v36  ;;  %v711_v37 = vsel %vm355_vm1, %v1291_v35, 0.0  ;;  %v724_v38 = vpack.c.bf16 %v1291_v35, %v1291_v35  ;;  %1294 = vpow2.f32 %v549_v45 }
 0x41c   : > { %712 = vadd.xlane.f32.xlu1 %v711_v37  ;;  %1218 = vmatprep.subr.bf16.mxu0 %v1326_v0  ;;  %1296 = vpow2.f32 %v699_v46 }
 0x41d   : > { %v879_v40 = vpop.permute.xlu1 %878  ;;  %1298 = vpow2.f32 %v849_v59 }
 0x41e   : > { %1209 = vmatmul.mubr.msk.bf16.vlgmr.msra.gmra.mrb[8].mxu0 %vm355_vm1, %v724_v38  ;;  %v884_v41 = vsel %vm437_vm4, %v879_v40, 0 }
 0x41f   : > { %1219 = vmatpush3.bf16.msra.mxu0 %v884_v41  ;;  %1220 = vmatprep.mubr.msk.bf16.mxu0 %vm1327_vm0, %v1326_v0 }
 0x424   : > { %v1293_v42 = vpop.eup %1292 }
 0x425   : > { %v861_v43 = vsel %vm355_vm1, %v1293_v42, 0.0  ;;  %v874_v44 = vpack.c.bf16 %v1293_v42, %v1293_v42  ;;  %v1295_v47 = vpop.eup %1294 }
 0x426   : > { %862 = vadd.xlane.f32.xlu0 %v861_v43  ;;  %v1297_v0 = vpop.eup %1296 }
 0x427   : > { %1221 = vmatmul.mubr.msk.bf16.vlgmr.msra.gmra.mrb[12].mxu0 %vm355_vm1, %v874_v44 }
 0x43c   : > { %570 = vperm.xlu0 %1267, %v1295_v47  }
 0x440   : > { %1268 = vset.pattern.permute.xlu0 %v1334_v62 }
 0x441   : > { %720 = vperm.xlu0 %1268, %v1297_v0  }
 0x445   : > { %1271 = vset.pattern.permute.xlu0 %v1333_v61 }
 0x44f   : > { %v422_v50 = vpop.xlane.xlu1 %421 }
 0x450   : > { %v423_v51 = vadd.f32 %v422_v50, %v419_v49 }
 0x452   : > { %425 = vst.msk [vmem:[#allocation3] sm:$0xff] %vm424_vm3, %v423_v51 }
 0x453   : > { %v430_v52 = vpop.permute.xlu1 %429 }
 0x454   : > { %v432_v53 = vmul.f32 0.0, %v430_v52 }
 0x456   : > { %v481_v54 = vadd.f32 %v1473_v39, %v432_v53  ;;  %v1299_v39 = vpop.eup %1298 }
 0x458   : > { %482 = vst.msk [vmem:[#allocation4] sm:$0xff] %vm355_vm1, %v481_v54 }
 0x459   : > { %v559_v55 = vld [vmem:[#allocation3] sm:$0xff] }
 0x45a   : > { %v560_v56 = vmul.f32 %v1295_v47, %v559_v55 }
 0x45f   : > { %v567_v26 = vld [vmem:[#allocation4] sm:$0xff] }
 0x49f   : > { %v563_v57 = vpop.xlane.xlu0 %562 }
 0x4a0   : > { %v564_v58 = vadd.f32 %v563_v57, %v560_v56 }
 0x4a2   : > { %566 = vst.msk [vmem:[#allocation3] sm:$0xff] %vm565_vm5, %v564_v58 }
 0x4a9   : > { %v709_v60 = vld [vmem:[#allocation3] sm:$0xff]  ;;  %v713_v63 = vpop.xlane.xlu1 %712 }
 0x4aa   : > { %v710_v61 = vmul.f32 %v1297_v0, %v709_v60 }
 0x4ac   : > { %v714_v1 = vadd.f32 %v713_v63, %v710_v61 }
 0x4ae   : > { %716 = vst.msk [vmem:[#allocation3] sm:$0xff] %vm715_vm6, %v714_v1 }
 0x4b3   : > { %v863_v4 = vpop.xlane.xlu0 %862 }
 0x4b5   : > { %v859_v2 = vld [vmem:[#allocation3] sm:$0xff] }
 0x4b6   : > { %v860_v3 = vmul.f32 %v1299_v39, %v859_v2 }
 0x4b8   : > { %v864_v6 = vadd.f32 %v863_v4, %v860_v3 }
 0x4ba   : > { %866 = vst.msk [vmem:[#allocation3] sm:$0xff] %vm865_vm7, %v864_v6 }
 0x4bb   : > { %v571_v25 = vpop.permute.xlu0 %570 }
 0x4bc   : > { %v573_v27 = vmul.f32 %v571_v25, %v567_v26 }
 0x4c0   : > { %v721_v19 = vpop.permute.xlu0 %720 }
 0x4c1   : > { %v937_v11 = vld [vmem:[#allocation3] sm:$0xff] }
 0x4c2   : > { %1300 = vrcp.f32 %v937_v11 }
 0x4cc   : > { %v1301_v17 = vpop.eup %1300 }
 0x4e6   : > { %v620_v7 = vpop.f32.mrb[4].mxu0 }
 0x4e7   : > { %v1198_v8 = vpop.f32.mrb[5].mxu0  ;;  %627 = vrot.lane.b32.xlu1 %v620_v7, %s1336_s9 }
 0x4e8   : > { %v623_v9 = vpop.f32.mrb[6].mxu0 }
 0x4e9   : > { %v1199_v10 = vpop.f32.mrb[7].mxu0 }
 0x4f1   : > { %v770_v13 = vpop.f32.mrb[8].mxu0 }
 0x4f2   : > { %v1210_v14 = vpop.f32.mrb[9].mxu0  ;;  %777 = vrot.lane.b32.xlu1 %v770_v13, %s1337_s10 }
 0x4f3   : > { %v773_v15 = vpop.f32.mrb[10].mxu0 }
 0x4f4   : > { %v1211_v16 = vpop.f32.mrb[11].mxu0 }
 0x4f6   : > { %870 = vperm.xlu1 %1269, %v1299_v39  }
 0x4fa   : > { %v920_v18 = vpop.f32.mrb[12].mxu0  ;;  %1270 = vset.pattern.permute.xlu1 %v1329_v12 }
 0x4fb   : > { %v1222_v20 = vpop.f32.mrb[13].mxu0  ;;  %927 = vrot.lane.b32.xlu0 %v920_v18, %s1338_s11  ;;  %942 = vperm.xlu1 %1270, %v1301_v17  }
 0x4fc   : > { %v923_v23 = vpop.f32.mrb[14].mxu0 }
 0x4fd   : > { %v1223_v24 = vpop.f32.mrb[15].mxu0 }
 0x4ff   : > { %952 = vperm.xlu0 %1271, %v1301_v17   ;;  %1272 = vset.pattern.permute.xlu1 %v1334_v62 }
 0x500   : > { %962 = vperm.xlu1 %1272, %v1301_v17  }
 0x503   : > { %1274 = vset.pattern.permute.xlu0 %v1335_v5 }
 0x504   : > { %1273 = vset.pattern.permute.xlu1 %v1335_v5 }
 0x505   : > { %972 = vperm.xlu1 %1273, %v1301_v17  }
 0x559   : > { %v628_v12 = vpop.permute.xlu1 %627 }
 0x55a   : > { %v630_v28 = vadd.f32 %v628_v12, %v573_v27 }
 0x55c   : > { %632 = vst.msk [vmem:[#allocation4] sm:$0xff] %vm631_vm8, %v630_v28 }
 0x563   : > { %v717_v21 = vld [vmem:[#allocation4] sm:$0xff] }
 0x564   : > { %v723_v22 = vmul.f32 %v721_v19, %v717_v21  ;;  %v778_v29 = vpop.permute.xlu1 %777 }
 0x566   : > { %v780_v62 = vadd.f32 %v778_v29, %v723_v22 }
 0x568   : > { %782 = vst.msk [vmem:[#allocation4] sm:$0xff] %vm781_vm9, %v780_v62 }
 0x56d   : > { %v928_v32 = vpop.permute.xlu0 %927 }
 0x56f   : > { %v867_v30 = vld [vmem:[#allocation4] sm:$0xff] }
 0x575   : > { %v871_v31 = vpop.permute.xlu1 %870 }
 0x576   : > { %v873_v5 = vmul.f32 %v871_v31, %v867_v30 }
 0x578   : > { %v930_v33 = vadd.f32 %v928_v32, %v873_v5 }
 0x57a   : > { %932 = vst.msk [vmem:[#allocation4] sm:$0xff] %vm931_vm10, %v930_v33  ;;  %v943_v35 = vpop.permute.xlu1 %942 }
 0x57e   : > { %v953_v37 = vpop.permute.xlu0 %952 }
 0x57f   : > { %v963_v42 = vpop.permute.xlu1 %962 }
 0x581   : > { %v939_v34 = vld [vmem:[#allocation4] sm:$0xff] }
 0x582   : > { %v945_v36 = vmul.f32 %v943_v35, %v939_v34 }
 0x584   : > { %946 = vst.msk [vmem:[#allocation4] sm:$0xff] %vm355_vm1, %v945_v36  ;;  %v973_v45 = vpop.permute.xlu1 %972 }
 0x58b   : > { %v949_v38 = vld [vmem:[#allocation4] sm:$0xff] }
 0x58c   : > { %v955_v40 = vmul.f32 %v953_v37, %v949_v38 }
 0x58e   : > { %956 = vst.msk [vmem:[#allocation4] sm:$0xff] %vm631_vm8, %v955_v40 }
 0x595   : > { %v959_v41 = vld [vmem:[#allocation4] sm:$0xff] }
 0x596   : > { %v965_v43 = vmul.f32 %v963_v42, %v959_v41 }
 0x598   : > { %966 = vst.msk [vmem:[#allocation4] sm:$0xff] %vm781_vm9, %v965_v43 }
 0x59f   : > { %v969_v44 = vld [vmem:[#allocation4] sm:$0xff] }
 0x5a0   : > { %v975_v46 = vmul.f32 %v973_v45, %v969_v44 }
 0x5a2   : > { %976 = vst.msk [vmem:[#allocation4] sm:$0xff] %vm931_vm10, %v975_v46 }
 0x5a9   : > { %v977_v47 = vld [vmem:[#allocation4] sm:$0xff] }
 0x5aa   : > { %v978_v0 = vpack.c.bf16 %v977_v47, %v977_v47 }
 0x5ac   : > { %979 = vst [vmem:[%s335_s19] sm:$0xf] %v978_v0 }
 0x5ad PF: > { %s14_s17 = sadd.s32 1, %s1324_s17   ;;  %s1601_s15 = smov %s1320_s16 }
 0x5ae   : > { %p11_p5 = scmp.ge.s32.totalorder %s14_s17, 4   ;;  %s1602_s16 = smov %s1604_s18 }
 0x5b0   :  { %13 = sbr.rel (!%p11_p5) target bundleno = 2 (0x2), region = 83 }

// kernel: _lambda_.57
= control target key start
LH: loop header
LB: loop body
LE: loop exit
PB: predicated region body
PF: predicated region fallthrough
CT: control target
= control target key end

     0   :  { %v203_v0 = vmov 0.0   ;;  %vm204_vm0 = vmmov 0   ;;  %s264_s1 = inlined_call_operand.vmem [shape: bf16[128,128], index: 1, kind: input, shape index: {}]   ;;  %s265_s0 = inlined_call_operand.vmem [shape: f32[16,128], index: 0, kind: input, shape index: {}]   ;;  %s266_s2 = inlined_call_operand.vmem [shape: f32[1,128], index: 2, kind: input, shape index: {}]   ;;  %s267_s3 = inlined_call_operand.vmem [shape: f32[16,128], index: 3, kind: output, shape index: {}]  }
   0x1   :  { %173 = vmatprep.subr.bf16.mxu0 %v203_v0  ;;  %v195_v1 = vld [vmem:[%s264_s1] sm:$0xff]   ;;  %189 = vmatprep.mubr.msk.bf16.mxu0 %vm204_vm0, %v203_v0  ;;  %v196_v2 = vld [vmem:[%s264_s1 + $0x8] sm:$0xff]   ;;  %v197_v3 = vld [vmem:[%s264_s1 + $0x10] sm:$0xff]  }
   0x2   :  { %174 = vmatpush3.bf16.msra.mxu0 %v195_v1  ;;  %v198_v4 = vld [vmem:[%s264_s1 + $0x18] sm:$0xff]   ;;  %v199_v5 = vld [vmem:[%s264_s1 + $0x20] sm:$0xff]   ;;  %v200_v6 = vld [vmem:[%s264_s1 + $0x28] sm:$0xff]  }
   0x3   :  { %175 = vmatprep.subr.bf16.mxu0 %v203_v0  ;;  %v201_v7 = vld [vmem:[%s264_s1 + $0x30] sm:$0xff]   ;;  %v202_v8 = vld [vmem:[%s264_s1 + $0x38] sm:$0xff]   ;;  %v23_v9 = vld [vmem:[%s265_s0] sm:$0xff] }
   0x4   :  { %v24_v10 = vld [vmem:[%s265_s0 + $0x8] sm:$0xff]  ;;  %v163_v12 = vld [vmem:[%s266_s2] ss:$0 sm:$0xff] }
   0x5   :  { %v25_v11 = vpack.c.bf16 %v24_v10, %v23_v9 }
   0x6   :  { %176 = vmatpush3.bf16.msra.mxu0 %v196_v2 }
   0x7   :  { %177 = vmatprep.subr.bf16.mxu0 %v203_v0 }
   0xa   :  { %178 = vmatpush3.bf16.msra.mxu0 %v197_v3 }
   0xb   :  { %179 = vmatprep.subr.bf16.mxu0 %v203_v0 }
   0xe   :  { %180 = vmatpush3.bf16.msra.mxu0 %v198_v4 }
   0xf   :  { %181 = vmatprep.subr.bf16.mxu0 %v203_v0 }
  0x12   :  { %182 = vmatpush3.bf16.msra.mxu0 %v199_v5 }
  0x13   :  { %183 = vmatprep.subr.bf16.mxu0 %v203_v0 }
  0x16   :  { %184 = vmatpush3.bf16.msra.mxu0 %v200_v6 }
  0x17   :  { %185 = vmatprep.subr.bf16.mxu0 %v203_v0 }
  0x1a   :  { %186 = vmatpush3.bf16.msra.mxu0 %v201_v7 }
  0x1b   :  { %187 = vmatprep.subr.bf16.mxu0 %v203_v0 }
  0x1e   :  { %188 = vmatpush3.bf16.msra.mxu0 %v202_v8 }
  0x21   :  { %190 = vmatmul.mubr.bf16.vlgmr.msra.gmra.mrb[0].mxu0 %v25_v11 }
  0xf4   :  { %v124_v13 = vpop.f32.mrb[0].mxu0 }
  0xf5   :  { %v147_v14 = vadd.f32 %v163_v12, %v124_v13  ;;  %v191_v15 = vpop.f32.mrb[1].mxu0 }
  0xf6   :  { %v127_v16 = vpop.f32.mrb[2].mxu0 }
  0xf7   :  { %149 = vst [vmem:[%s267_s3] sm:$0xff] %v147_v14  ;;  %v148_v17 = vadd.f32 %v163_v12, %v127_v16  ;;  %v192_v18 = vpop.f32.mrb[3].mxu0 }
  0xf9   :  { %150 = vst [vmem:[%s267_s3 + $0x8] sm:$0xff] %v148_v17 }

// kernel: _lambda_.44
= control target key start
LH: loop header
LB: loop body
LE: loop exit
PB: predicated region body
PF: predicated region fallthrough
CT: control target
= control target key end

     0   :  { %s1345_s15 = smov 0   ;;  %s1347_s16 = smov 0   ;;  %s1580_s0 = inlined_call_operand.vmem [shape: f32[2,1,8], index: 0, kind: input, shape index: {}]   ;;  %s1581_s1 = inlined_call_operand.vmem [shape: bf16[2,8,128], index: 1, kind: input, shape index: {}]   ;;  %s1582_s2 = inlined_call_operand.vmem [shape: bf16[2,8,256], index: 2, kind: input, shape index: {}, may-alias: {2,3}]   ;;  %s1583_s3 = inlined_call_operand.vmem [shape: bf16[2,8,256], index: 3, kind: input, shape index: {}, may-alias: {2,3}]   ;;  %s1584_s4 = inlined_call_operand.vmem [shape: bf16[2,8,128], index: 4, kind: output, shape index: {}]  }
   0x1   :  { %s1349_s17 = smov 0  }
   0x2 LB: > { %s33_s18 = sadd.s32 1, %s1301_s16  ;;  %p1109_p0 = scmp.ge.s32.totalorder %s1305_s17, 1  ;;  %s1305_s17 = sphi %s1349_s17, %s14_s17   ;;  %s1301_s16 = sphi %s1347_s16, %s1586_s16   ;;  %s1297_s15 = sphi %s1345_s15, %s1585_s15  }
   0x3   : > { %p35_p1 = scmp.ge.s32.totalorder %s33_s18, 2  ;;  %p233_p2 = scmp.lt.s32.totalorder %s1305_s17, 3 }
   0x5   : > { %s1588_s18 = smov (%p35_p1, %s33_s18), 0  ;;  %p234_p3 = pnand %p1109_p0, %p233_p2 }
   0x6   : > { %p288_p4 = scmp.lt.s32.totalorder (!%p234_p3), %s1297_s15, 1  ;;  %v1307_v0 = vmov (!%p234_p3), 0.0   ;;  %vm1308_vm0 = vmmov (!%p234_p3), 0   ;;  %vm346_vm1 = vcmask (!%p234_p3), 64512   ;;  %vm332_vm2 = vcmask (!%p234_p3), 31744   ;;  %s1311_s30 = smov (!%p234_p3), 120  }
   0x7   : > { %237 = sbr.rel (%p234_p3) target bundleno = 1452 (0x5ac), region = 36  ;;  %1158 = vmatprep.subr.bf16.mxu0 (!%p234_p3), %v1307_v0  ;;  %335 = vst [vmem:[#allocation4] sm:$0xff] (!%p234_p3), %v1307_v0  ;;  %1160 = vmatprep.mubr.msk.bf16.mxu0 (!%p234_p3), %vm1308_vm0, %v1307_v0  ;;  %v1309_v4 = vmov (!%p234_p3), -1e+30   ;;  %334 = vst.msk [vmem:[#allocation3] sm:$0xff] (!%p234_p3), %vm332_vm2, %v1307_v0  ;;  %v1310_v12 = vmov (!%p234_p3), 0  }
   0x8   : > { %1164 = vmatprep.subr.bf16.mxu1 (!%p234_p3), %v1307_v0  ;;  %1166 = vmatprep.mubr.msk.bf16.mxu1 (!%p234_p3), %vm1308_vm0, %v1307_v0  ;;  %333 = vst.msk [vmem:[#allocation2] sm:$0xff] (!%p234_p3), %vm332_vm2, %v1309_v4  ;;  %s1312_s5 = smov (!%p234_p3), 112   ;;  %s1313_s6 = smov (!%p234_p3), 104   ;;  %vm415_vm3 = vcmask (!%p234_p3), 7168   ;;  %vm428_vm4 = vcmask (!%p234_p3), 1043456   ;;  %v1314_v61 = vmov (!%p234_p3), 1  }
   0x9   : > { %1243 = vset.pattern.permute.xlu0 (!%p234_p3), %v1310_v12  ;;  %1244 = vset.pattern.permute.xlu1 (!%p234_p3), %v1314_v61  ;;  %v1315_v62 = vmov (!%p234_p3), 2   ;;  %vm556_vm5 = vcmask (!%p234_p3), 15368   ;;  %vm706_vm6 = vcmask (!%p234_p3), 23568   ;;  %vm856_vm7 = vcmask (!%p234_p3), 31768   ;;  %s1317_s10 = smov (!%p234_p3), 8   ;;  %s1318_s11 = smov (!%p234_p3), 16  }
   0xa   : > { %s1319_s12 = smov (!%p234_p3), 24   ;;  %vm622_vm8 = vcmask (!%p234_p3), 130112   ;;  %vm772_vm9 = vcmask (!%p234_p3), 195712   ;;  %vm922_vm10 = vcmask (!%p234_p3), 261312  }
   0xe   : > { %s1590_s15 = smov (!%p288_p4, %s1297_s15), 1 }
   0xf   : > { %s1140_s19 = sshll.u32 %s1590_s15, 3  ;;  %s1110_s20 = sshll.u32 %s1590_s15, 2  ;;  %v1417_v19 = vld [vmem:[#allocation2] sm:$0xff] }
  0x10   : > { %s1379_s23 = scalar_lea.vmem %s1582_s2, %s1140_s19  ;;  %s1387_s26 = scalar_lea.vmem %s1581_s1, %s1110_s20 }
  0x11   : > { %v338_v1 = vld [vmem:[%s1379_s23] sm:$0xf]  ;;  %s293_s29 = scalar_lea.vmem %s1580_s0, %s1590_s15  ;;  %s1432_s9 = scalar_lea.vmem %s1583_s3, %s1140_s19 }
  0x12   : > { %v351_v2 = vsel %vm346_vm1, %v338_v1, 0  ;;  %v337_v3 = vld [vmem:[%s1387_s26] sm:$0xf]  ;;  %v1116_v23 = vld [vmem:[%s1432_s9 + $0x4] sm:$0xf]  ;;  %s326_s19 = scalar_lea.vmem %s1584_s4, %s1110_s20 }
  0x13   : > { %1159 = vmatpush3.bf16.xpose.msra.mxu0 %v351_v2  ;;  %v1400_v5 = vld [vmem:[%s293_s29] ss:$0 sm:$0xff]  ;;  %v430_v24 = vsel %vm428_vm4, %v1116_v23, 0  ;;  %v1262_v4 = vld [vmem:[%s1432_s9 + $0x4] ss:$0 sps:$4 sm:$0xff]  }
  0x14   : > { %1176 = vmatprep.subr.bf16.mxu0 %v1307_v0  ;;  %v1256_v13 = vld [vmem:[%s1379_s23] ss:$0 sps:$4 sm:$0xff]   ;;  %1165 = vmatpush3.bf16.msra.mxu1 %v430_v24 }
  0x15   : > { %486 = vrot.lane.b32.xlu1 %v1256_v13, %s1311_s30  ;;  %v1257_v14 = vld [vmem:[%s1387_s26] ss:$0 sps:$4 sm:$0xff]   ;;  %1170 = vmatprep.subr.bf16.mxu1 %v1307_v0 }
  0x16   : > { %v1258_v15 = vld [vmem:[%s1379_s23] ss:$0 sps:$4 sm:$0xff]  }
  0x17   : > { %v1259_v16 = vld [vmem:[%s1387_s26] ss:$0 sps:$4 sm:$0xff]  }
  0x18   : > { %v1260_v17 = vld [vmem:[%s1379_s23] ss:$0 sps:$4 sm:$0xff]  }
  0x19   : > { %481 = vrot.lane.b32.xlu1 %v1257_v14, %s1311_s30  ;;  %v1261_v18 = vld [vmem:[%s1387_s26] ss:$0 sps:$4 sm:$0xff]  }
  0x1a   : > { %1161 = vmatmul.mubr.msk.bf16.vlgmr.msra.gmra.mrb[0].mxu0 %vm346_vm1, %v337_v3 }
  0x1b   : > { %1178 = vmatprep.mubr.msk.bf16.mxu0 %vm1308_vm0, %v1307_v0 }
  0x1d   : > { %636 = vrot.lane.b32.xlu1 %v1258_v15, %s1312_s5  ;;  %v1263_v15 = vld [vmem:[%s1432_s9 + $0x4] ss:$0 sps:$4 sm:$0xff]  }
  0x21   : > { %631 = vrot.lane.b32.xlu1 %v1259_v16, %s1312_s5  ;;  %v1264_v16 = vld [vmem:[%s1432_s9 + $0x4] ss:$0 sps:$4 sm:$0xff]  }
  0x25   : > { %786 = vrot.lane.b32.xlu1 %v1260_v17, %s1313_s6 }
  0x29   : > { %781 = vrot.lane.b32.xlu1 %v1261_v18, %s1313_s6 }
  0x87   : > { %v487_v28 = vpop.permute.xlu1 %486 }
  0x88   : > { %v492_v31 = vsel %vm346_vm1, %v487_v28, 0 }
  0x8b   : > { %v482_v29 = vpop.permute.xlu1 %481 }
  0x8f   : > { %v637_v33 = vpop.permute.xlu1 %636 }
  0x90   : > { %v642_v35 = vsel %vm346_vm1, %v637_v33, 0 }
  0x93   : > { %v632_v34 = vpop.permute.xlu1 %631 }
  0x97   : > { %v787_v36 = vpop.permute.xlu1 %786 }
  0x98   : > { %v792_v37 = vsel %vm346_vm1, %v787_v36, 0 }
  0x9b   : > { %v782_v38 = vpop.permute.xlu1 %781 }
  0xed   : > { %v387_v6 = vpop.f32.mrb[0].mxu0 }
  0xee   : > { %v388_v7 = vadd.f32 %v1400_v5, %v387_v6  ;;  %v1162_v8 = vpop.f32.mrb[1].mxu0 }
  0xef   : > { %v390_v9 = vpop.f32.mrb[2].mxu0 }
  0xf0   : > { %v1163_v10 = vpop.f32.mrb[3].mxu0  ;;  %v394_v11 = vsel %vm346_vm1, %v388_v7, -inf }
  0xf1   : > { %395 = vmax.xlane.f32.xlu0 %v394_v11 }
 0x17e   : > { %v396_v20 = vpop.xlane.xlu0 %395 }
 0x17f   : > { %v1420_v21 = vmax.f32 %v1417_v19, %v396_v20 }
 0x181   : > { %v398_v22 = vsub.f32 %v1417_v19, %v1420_v21  ;;  %474 = vst.msk [vmem:[#allocation2] sm:$0xff] %vm415_vm3, %v1420_v21  ;;  %403 = vperm.xlu0 %1243, %v1420_v21  }
 0x183   : > { %v399_v18 = vmul.f32 1.442695, %v398_v22 }
 0x185   : > { %1245 = vset.pattern.permute.xlu0 %v1315_v62 }
 0x188   : > { %v1475_v1 = vld [vmem:[#allocation2] sm:$0xff] }
 0x200   : > { %v404_v25 = vpop.permute.xlu0 %403 }
 0x201   : > { %v406_v26 = vsub.f32 %v388_v7, %v404_v25 }
 0x203   : > { %v407_v27 = vmul.f32 1.442695, %v406_v26 }
 0x205   : > { %1265 = vpow2.f32 %v407_v27 }
 0x206   : > { %1267 = vpow2.f32 %v399_v18 }
 0x20f   : > { %v1437_v30 = vpop.eup %1265 }
 0x210   : > { %v424_v32 = vpack.c.bf16 %v1437_v30, %v1437_v30  ;;  %v411_v17 = vsel %vm346_vm1, %v1437_v30, 0.0  ;;  %v1268_v20 = vpop.eup %1267 }
 0x212   : > { %1167 = vmatmul.mubr.msk.bf16.vlgmr.msra.gmra.mrb[0].mxu1 %vm346_vm1, %v424_v32 }
 0x213   : > { %1171 = vmatpush3.bf16.xpose.msra.mxu1 %v492_v31  ;;  %1172 = vmatprep.mubr.msk.bf16.mxu1 %vm1308_vm0, %v1307_v0 }
 0x214   : > { %1182 = vmatprep.subr.bf16.mxu1 %v1307_v0 }
 0x21a   : > { %1173 = vmatmul.mubr.msk.bf16.vlgmr.msra.gmra.mrb[4].mxu1 %vm346_vm1, %v482_v29 }
 0x21b   : > { %1183 = vmatpush3.bf16.xpose.msra.mxu1 %v642_v35  ;;  %1184 = vmatprep.mubr.msk.bf16.mxu1 %vm1308_vm0, %v1307_v0 }
 0x21c   : > { %1194 = vmatprep.subr.bf16.mxu1 %v1307_v0 }
 0x222   : > { %1185 = vmatmul.mubr.msk.bf16.vlgmr.msra.gmra.mrb[8].mxu1 %vm346_vm1, %v632_v34 }
 0x223   : > { %1195 = vmatpush3.bf16.xpose.msra.mxu1 %v792_v37  ;;  %1196 = vmatprep.mubr.msk.bf16.mxu1 %vm1308_vm0, %v1307_v0 }
 0x22a   : > { %1197 = vmatmul.mubr.msk.bf16.vlgmr.msra.gmra.mrb[12].mxu1 %vm346_vm1, %v782_v38 }
 0x2e5   : > { %v1456_v39 = vpop.f32.mrb[0].mxu1 }
 0x2e6   : > { %v1168_v40 = vpop.f32.mrb[1].mxu1 }
 0x2e7   : > { %v469_v41 = vpop.f32.mrb[2].mxu1 }
 0x2e8   : > { %v1169_v42 = vpop.f32.mrb[3].mxu1 }
 0x2ed   : > { %v528_v43 = vpop.f32.mrb[4].mxu1 }
 0x2ee   : > { %v1459_v44 = vadd.f32 %v1400_v5, %v528_v43  ;;  %v1174_v45 = vpop.f32.mrb[5].mxu1 }
 0x2ef   : > { %v531_v46 = vpop.f32.mrb[6].mxu1 }
 0x2f0   : > { %v1175_v47 = vpop.f32.mrb[7].mxu1  ;;  %v535_v48 = vsel %vm346_vm1, %v1459_v44, -inf }
 0x2f1   : > { %536 = vmax.xlane.f32.xlu1 %v535_v48  ;;  %v409_v48 = vld [vmem:[#allocation3] sm:$0xff] }
 0x2f5   : > { %v678_v49 = vpop.f32.mrb[8].mxu1 }
 0x2f6   : > { %v1464_v50 = vadd.f32 %v1400_v5, %v678_v49  ;;  %v1186_v51 = vpop.f32.mrb[9].mxu1  ;;  %v410_v49 = vmul.f32 %v1268_v20, %v409_v48 }
 0x2f7   : > { %v681_v52 = vpop.f32.mrb[10].mxu1 }
 0x2f8   : > { %v1187_v53 = vpop.f32.mrb[11].mxu1  ;;  %v685_v54 = vsel %vm346_vm1, %v1464_v50, -inf }
 0x2f9   : > { %686 = vmax.xlane.f32.xlu0 %v685_v54 }
 0x2fd   : > { %v828_v55 = vpop.f32.mrb[12].mxu1 }
 0x2fe   : > { %v1469_v56 = vadd.f32 %v1400_v5, %v828_v55  ;;  %v1198_v57 = vpop.f32.mrb[13].mxu1  ;;  %v1316_v5 = vmov 3  }
 0x2ff   : > { %v831_v58 = vpop.f32.mrb[14].mxu1 }
 0x300   : > { %v1199_v59 = vpop.f32.mrb[15].mxu1  ;;  %v835_v60 = vsel %vm346_vm1, %v1469_v56, -inf }
 0x301   : > { %836 = vmax.xlane.f32.xlu1 %v835_v60 }
 0x37e   : > { %v537_v63 = vpop.xlane.xlu1 %536 }
 0x37f   : > { %v1478_v2 = vmax.f32 %v1475_v1, %v537_v63 }
 0x381   : > { %v539_v3 = vsub.f32 %v1475_v1, %v1478_v2  ;;  %624 = vst.msk [vmem:[#allocation2] sm:$0xff] %vm556_vm5, %v1478_v2  ;;  %544 = vperm.xlu1 %1244, %v1478_v2  }
 0x383   : > { %v540_v45 = vmul.f32 1.442695, %v539_v3 }
 0x385   : > { %569 = vrot.lane.b32.xlu1 %v1262_v4, %s1311_s30 }
 0x386   : > { %1246 = vset.pattern.permute.xlu1 %v1316_v5  ;;  %v687_v6 = vpop.xlane.xlu0 %686 }
 0x388   : > { %v1488_v7 = vld [vmem:[#allocation2] sm:$0xff] }
 0x389   : > { %v1491_v8 = vmax.f32 %v1488_v7, %v687_v6 }
 0x38b   : > { %v689_v9 = vsub.f32 %v1488_v7, %v1491_v8  ;;  %774 = vst.msk [vmem:[#allocation2] sm:$0xff] %vm706_vm6, %v1491_v8  ;;  %694 = vperm.xlu0 %1245, %v1491_v8  }
 0x38d   : > { %v690_v46 = vmul.f32 1.442695, %v689_v9 }
 0x38e   : > { %v837_v10 = vpop.xlane.xlu1 %836 }
 0x38f   : > { %1248 = vset.pattern.permute.xlu0 %v1314_v61 }
 0x392   : > { %v1499_v11 = vld [vmem:[#allocation2] sm:$0xff] }
 0x393   : > { %v1502_v13 = vmax.f32 %v1499_v11, %v837_v10 }
 0x395   : > { %v839_v14 = vsub.f32 %v1499_v11, %v1502_v13  ;;  %924 = vst.msk [vmem:[#allocation2] sm:$0xff] %vm856_vm7, %v1502_v13  ;;  %844 = vperm.xlu1 %1246, %v1502_v13  }
 0x397   : > { %v840_v59 = vmul.f32 1.442695, %v839_v14 }
 0x399   : > { %719 = vrot.lane.b32.xlu1 %v1263_v15, %s1312_s5 }
 0x39a   : > { %1247 = vset.pattern.permute.xlu1 %v1310_v12 }
 0x39d   : > { %869 = vrot.lane.b32.xlu1 %v1264_v16, %s1313_s6 }
 0x3c1   : > { %412 = vadd.xlane.f32.xlu1 %v411_v17 }
 0x3d2   : > { %420 = vperm.xlu1 %1247, %v1268_v20  }
 0x3d6   : > { %1250 = vset.pattern.permute.xlu1 %v1316_v5 }
 0x400   : > { %v545_v23 = vpop.permute.xlu1 %544 }
 0x401   : > { %v547_v24 = vsub.f32 %v1459_v44, %v545_v23 }
 0x403   : > { %v548_v25 = vmul.f32 1.442695, %v547_v24 }
 0x404   : > { %v570_v26 = vpop.permute.xlu1 %569 }
 0x405   : > { %1269 = vpow2.f32 %v548_v25  ;;  %v575_v27 = vsel %vm428_vm4, %v570_v26, 0 }
 0x406   : > { %1177 = vmatpush3.bf16.msra.mxu0 %v575_v27 }
 0x407   : > { %1188 = vmatprep.subr.bf16.mxu0 %v1307_v0 }
 0x40a   : > { %v695_v28 = vpop.permute.xlu0 %694 }
 0x40b   : > { %v697_v19 = vsub.f32 %v1464_v50, %v695_v28 }
 0x40d   : > { %v698_v21 = vmul.f32 1.442695, %v697_v19 }
 0x40f   : > { %v1270_v22 = vpop.eup %1269  ;;  %1271 = vpow2.f32 %v698_v21 }
 0x410   : > { %v552_v29 = vsel %vm346_vm1, %v1270_v22, 0.0  ;;  %v565_v30 = vpack.c.bf16 %v1270_v22, %v1270_v22 }
 0x411   : > { %553 = vadd.xlane.f32.xlu0 %v552_v29 }
 0x412   : > { %1179 = vmatmul.mubr.msk.bf16.vlgmr.msra.gmra.mrb[4].mxu0 %vm346_vm1, %v565_v30 }
 0x413   : > { %1190 = vmatprep.mubr.msk.bf16.mxu0 %vm1308_vm0, %v1307_v0 }
 0x414   : > { %v845_v31 = vpop.permute.xlu1 %844 }
 0x415   : > { %v847_v32 = vsub.f32 %v1469_v56, %v845_v31 }
 0x417   : > { %v848_v33 = vmul.f32 1.442695, %v847_v32 }
 0x418   : > { %v720_v34 = vpop.permute.xlu1 %719 }
 0x419   : > { %v1272_v35 = vpop.eup %1271  ;;  %1273 = vpow2.f32 %v848_v33  ;;  %v725_v36 = vsel %vm428_vm4, %v720_v34, 0 }
 0x41a   : > { %1189 = vmatpush3.bf16.msra.mxu0 %v725_v36  ;;  %v702_v37 = vsel %vm346_vm1, %v1272_v35, 0.0  ;;  %v715_v38 = vpack.c.bf16 %v1272_v35, %v1272_v35  ;;  %1275 = vpow2.f32 %v540_v45 }
 0x41b   : > { %703 = vadd.xlane.f32.xlu1 %v702_v37  ;;  %1200 = vmatprep.subr.bf16.mxu0 %v1307_v0  ;;  %1277 = vpow2.f32 %v690_v46 }
 0x41c   : > { %v870_v40 = vpop.permute.xlu1 %869  ;;  %1279 = vpow2.f32 %v840_v59 }
 0x41d   : > { %1191 = vmatmul.mubr.msk.bf16.vlgmr.msra.gmra.mrb[8].mxu0 %vm346_vm1, %v715_v38  ;;  %v875_v41 = vsel %vm428_vm4, %v870_v40, 0 }
 0x41e   : > { %1201 = vmatpush3.bf16.msra.mxu0 %v875_v41  ;;  %1202 = vmatprep.mubr.msk.bf16.mxu0 %vm1308_vm0, %v1307_v0 }
 0x423   : > { %v1274_v42 = vpop.eup %1273 }
 0x424   : > { %v852_v43 = vsel %vm346_vm1, %v1274_v42, 0.0  ;;  %v865_v44 = vpack.c.bf16 %v1274_v42, %v1274_v42  ;;  %v1276_v47 = vpop.eup %1275 }
 0x425   : > { %853 = vadd.xlane.f32.xlu0 %v852_v43  ;;  %v1278_v0 = vpop.eup %1277 }
 0x426   : > { %1203 = vmatmul.mubr.msk.bf16.vlgmr.msra.gmra.mrb[12].mxu0 %vm346_vm1, %v865_v44 }
 0x43b   : > { %561 = vperm.xlu0 %1248, %v1276_v47  }
 0x43f   : > { %1249 = vset.pattern.permute.xlu0 %v1315_v62 }
 0x440   : > { %711 = vperm.xlu0 %1249, %v1278_v0  }
 0x444   : > { %1252 = vset.pattern.permute.xlu0 %v1314_v61 }
 0x44e   : > { %v413_v50 = vpop.xlane.xlu1 %412 }
 0x44f   : > { %v414_v51 = vadd.f32 %v413_v50, %v410_v49 }
 0x451   : > { %416 = vst.msk [vmem:[#allocation3] sm:$0xff] %vm415_vm3, %v414_v51 }
 0x452   : > { %v421_v52 = vpop.permute.xlu1 %420 }
 0x453   : > { %v423_v53 = vmul.f32 0.0, %v421_v52 }
 0x455   : > { %v472_v54 = vadd.f32 %v1456_v39, %v423_v53  ;;  %v1280_v39 = vpop.eup %1279 }
 0x457   : > { %473 = vst.msk [vmem:[#allocation4] sm:$0xff] %vm346_vm1, %v472_v54 }
 0x458   : > { %v550_v55 = vld [vmem:[#allocation3] sm:$0xff] }
 0x459   : > { %v551_v56 = vmul.f32 %v1276_v47, %v550_v55 }
 0x45e   : > { %v558_v26 = vld [vmem:[#allocation4] sm:$0xff] }
 0x49e   : > { %v554_v57 = vpop.xlane.xlu0 %553 }
 0x49f   : > { %v555_v58 = vadd.f32 %v554_v57, %v551_v56 }
 0x4a1   : > { %557 = vst.msk [vmem:[#allocation3] sm:$0xff] %vm556_vm5, %v555_v58 }
 0x4a8   : > { %v700_v60 = vld [vmem:[#allocation3] sm:$0xff]  ;;  %v704_v63 = vpop.xlane.xlu1 %703 }
 0x4a9   : > { %v701_v61 = vmul.f32 %v1278_v0, %v700_v60 }
 0x4ab   : > { %v705_v1 = vadd.f32 %v704_v63, %v701_v61 }
 0x4ad   : > { %707 = vst.msk [vmem:[#allocation3] sm:$0xff] %vm706_vm6, %v705_v1 }
 0x4b2   : > { %v854_v4 = vpop.xlane.xlu0 %853 }
 0x4b4   : > { %v850_v2 = vld [vmem:[#allocation3] sm:$0xff] }
 0x4b5   : > { %v851_v3 = vmul.f32 %v1280_v39, %v850_v2 }
 0x4b7   : > { %v855_v6 = vadd.f32 %v854_v4, %v851_v3 }
 0x4b9   : > { %857 = vst.msk [vmem:[#allocation3] sm:$0xff] %vm856_vm7, %v855_v6 }
 0x4ba   : > { %v562_v25 = vpop.permute.xlu0 %561 }
 0x4bb   : > { %v564_v27 = vmul.f32 %v562_v25, %v558_v26 }
 0x4bf   : > { %v712_v19 = vpop.permute.xlu0 %711 }
 0x4c0   : > { %v928_v11 = vld [vmem:[#allocation3] sm:$0xff] }
 0x4c1   : > { %1281 = vrcp.f32 %v928_v11 }
 0x4cb   : > { %v1282_v17 = vpop.eup %1281 }
 0x4e5   : > { %v611_v7 = vpop.f32.mrb[4].mxu0 }
 0x4e6   : > { %v1180_v8 = vpop.f32.mrb[5].mxu0  ;;  %618 = vrot.lane.b32.xlu1 %v611_v7, %s1317_s10 }
 0x4e7   : > { %v614_v9 = vpop.f32.mrb[6].mxu0 }
 0x4e8   : > { %v1181_v10 = vpop.f32.mrb[7].mxu0 }
 0x4f0   : > { %v761_v13 = vpop.f32.mrb[8].mxu0 }
 0x4f1   : > { %v1192_v14 = vpop.f32.mrb[9].mxu0  ;;  %768 = vrot.lane.b32.xlu1 %v761_v13, %s1318_s11 }
 0x4f2   : > { %v764_v15 = vpop.f32.mrb[10].mxu0 }
 0x4f3   : > { %v1193_v16 = vpop.f32.mrb[11].mxu0 }
 0x4f5   : > { %861 = vperm.xlu1 %1250, %v1280_v39  }
 0x4f9   : > { %v911_v18 = vpop.f32.mrb[12].mxu0  ;;  %1251 = vset.pattern.permute.xlu1 %v1310_v12 }
 0x4fa   : > { %v1204_v20 = vpop.f32.mrb[13].mxu0  ;;  %918 = vrot.lane.b32.xlu0 %v911_v18, %s1319_s12  ;;  %933 = vperm.xlu1 %1251, %v1282_v17  }
 0x4fb   : > { %v914_v23 = vpop.f32.mrb[14].mxu0 }
 0x4fc   : > { %v1205_v24 = vpop.f32.mrb[15].mxu0 }
 0x4fe   : > { %943 = vperm.xlu0 %1252, %v1282_v17   ;;  %1253 = vset.pattern.permute.xlu1 %v1315_v62 }
 0x4ff   : > { %953 = vperm.xlu1 %1253, %v1282_v17  }
 0x502   : > { %1255 = vset.pattern.permute.xlu0 %v1316_v5 }
 0x503   : > { %1254 = vset.pattern.permute.xlu1 %v1316_v5 }
 0x504   : > { %963 = vperm.xlu1 %1254, %v1282_v17  }
 0x558   : > { %v619_v12 = vpop.permute.xlu1 %618 }
 0x559   : > { %v621_v28 = vadd.f32 %v619_v12, %v564_v27 }
 0x55b   : > { %623 = vst.msk [vmem:[#allocation4] sm:$0xff] %vm622_vm8, %v621_v28 }
 0x562   : > { %v708_v21 = vld [vmem:[#allocation4] sm:$0xff] }
 0x563   : > { %v714_v22 = vmul.f32 %v712_v19, %v708_v21  ;;  %v769_v29 = vpop.permute.xlu1 %768 }
 0x565   : > { %v771_v62 = vadd.f32 %v769_v29, %v714_v22 }
 0x567   : > { %773 = vst.msk [vmem:[#allocation4] sm:$0xff] %vm772_vm9, %v771_v62 }
 0x56c   : > { %v919_v32 = vpop.permute.xlu0 %918 }
 0x56e   : > { %v858_v30 = vld [vmem:[#allocation4] sm:$0xff] }
 0x574   : > { %v862_v31 = vpop.permute.xlu1 %861 }
 0x575   : > { %v864_v5 = vmul.f32 %v862_v31, %v858_v30 }
 0x577   : > { %v921_v33 = vadd.f32 %v919_v32, %v864_v5 }
 0x579   : > { %923 = vst.msk [vmem:[#allocation4] sm:$0xff] %vm922_vm10, %v921_v33  ;;  %v934_v35 = vpop.permute.xlu1 %933 }
 0x57d   : > { %v944_v37 = vpop.permute.xlu0 %943 }
 0x57e   : > { %v954_v42 = vpop.permute.xlu1 %953 }
 0x580   : > { %v930_v34 = vld [vmem:[#allocation4] sm:$0xff] }
 0x581   : > { %v936_v36 = vmul.f32 %v934_v35, %v930_v34 }
 0x583   : > { %937 = vst.msk [vmem:[#allocation4] sm:$0xff] %vm346_vm1, %v936_v36  ;;  %v964_v45 = vpop.permute.xlu1 %963 }
 0x58a   : > { %v940_v38 = vld [vmem:[#allocation4] sm:$0xff] }
 0x58b   : > { %v946_v40 = vmul.f32 %v944_v37, %v940_v38 }
 0x58d   : > { %947 = vst.msk [vmem:[#allocation4] sm:$0xff] %vm622_vm8, %v946_v40 }
 0x594   : > { %v950_v41 = vld [vmem:[#allocation4] sm:$0xff] }
 0x595   : > { %v956_v43 = vmul.f32 %v954_v42, %v950_v41 }
 0x597   : > { %957 = vst.msk [vmem:[#allocation4] sm:$0xff] %vm772_vm9, %v956_v43 }
 0x59e   : > { %v960_v44 = vld [vmem:[#allocation4] sm:$0xff] }
 0x59f   : > { %v966_v46 = vmul.f32 %v964_v45, %v960_v44 }
 0x5a1   : > { %967 = vst.msk [vmem:[#allocation4] sm:$0xff] %vm922_vm10, %v966_v46 }
 0x5a8   : > { %v968_v47 = vld [vmem:[#allocation4] sm:$0xff] }
 0x5a9   : > { %v969_v0 = vpack.c.bf16 %v968_v47, %v968_v47 }
 0x5ab   : > { %970 = vst [vmem:[%s326_s19] sm:$0xf] %v969_v0 }
 0x5ac PF: > { %s14_s17 = sadd.s32 1, %s1305_s17   ;;  %s1585_s15 = smov %s1301_s16 }
 0x5ad   : > { %p11_p5 = scmp.ge.s32.totalorder %s14_s17, 4   ;;  %s1586_s16 = smov %s1588_s18 }
 0x5af   :  { %13 = sbr.rel (!%p11_p5) target bundleno = 2 (0x2), region = 83 }

</bundles_post_ra>
